<compile_context>
chip_gen: v7x
topology: tpu7x:2x2x1
jax: 0.10.0
libtpu: 0.0.40
codegen_flags: <defaults>
</compile_context>

<pallas_src>
import math

import jax
import jax.numpy as jnp
from jax.experimental import pallas as pl
from jax.experimental.pallas import tpu as pltpu

# ---- problem sizes (small, consistent with the module) ----
B, T, S, D = 2, 8, 8, 32        # batch, tgt seq, src seq, d_model
H = 4                           # attention heads
DK = D // H                     # per-head dim
DFF = 64                        # feed-forward hidden
NLAYERS = 2                     # N decoder layers
EPS = 1e-6                      # LayerNorm eps
NEG_INF = -1e9

_SCALE = 1.0 / math.sqrt(DK)

_COMPILER_PARAMS = pltpu.CompilerParams(
    dimension_semantics=("parallel",),
    vmem_limit_bytes=32 * 1024 * 1024,
)


# ------------------------------ fused decoder kernel ------------------------------
def decoder_kernel(x_ref, mem_ref, tgt_bias_ref, src_bias_ref,
                   ln_a_ref, ln_b_ref,
                   w_qkv_ref, b_qkv_ref, w_o_ref, b_o_ref,
                   w1_ref, b1_ref, w2_ref, b2_ref,
                   o_ref):
    x = x_ref[0]                 # (T, D)
    mem = mem_ref[0]             # (S, D)
    tgt_bias = tgt_bias_ref[0]   # (T, T) additive mask bias (0 / -1e9)
    src_bias = src_bias_ref[0]   # (T, S) additive mask bias

    def layer_norm(v, idx):
        # torch: a * (x - mean) / (std_unbiased + eps) + b
        a = ln_a_ref[idx:idx + 1, :]
        b = ln_b_ref[idx:idx + 1, :]
        mean = jnp.mean(v, axis=-1, keepdims=True)
        var = jnp.sum((v - mean) ** 2, axis=-1, keepdims=True) * (1.0 / (D - 1))
        return a * (v - mean) / (jnp.sqrt(var) + EPS) + b

    def mha(x_q, x_kv, bias, l, ai, is_self):
        idx = l * 2 + ai            # which attention block (layer, self/cross)
        base = idx * 3 * H          # row offset into the stacked head-major weights
        n_q = x_q.shape[0]
        n_kv = x_kv.shape[0]

        if is_self:
            # fused Q|K|V projection: one batched matmul over 3*H heads
            xb = jnp.broadcast_to(x_q[None], (3 * H, n_q, D))
            qkvh = jnp.einsum('htd,hkd->htk', xb,
                              w_qkv_ref[base:base + 3 * H, :, :],
                              preferred_element_type=jnp.float32)
            qkvh = qkvh + b_qkv_ref[base:base + 3 * H, :, :]
            qh = qkvh[:H]            # (H, T, DK)
            kh = qkvh[H:2 * H]
            vh = qkvh[2 * H:]
        else:
            # Q from the decoder state, fused K|V from encoder memory
            xq_b = jnp.broadcast_to(x_q[None], (H, n_q, D))
            xkv_b = jnp.broadcast_to(x_kv[None], (2 * H, n_kv, D))
            qh = jnp.einsum('htd,hkd->htk', xq_b,
                            w_qkv_ref[base:base + H, :, :],
                            preferred_element_type=jnp.float32)
            qh = qh + b_qkv_ref[base:base + H, :, :]
            kvh = jnp.einsum('hsd,hkd->hsk', xkv_b,
                             w_qkv_ref[base + H:base + 3 * H, :, :],
                             preferred_element_type=jnp.float32)
            kvh = kvh + b_qkv_ref[base + H:base + 3 * H, :, :]
            kh = kvh[:H]             # (H, S, DK)
            vh = kvh[H:]

        # scaled dot-product attention, all heads batched
        s = jnp.einsum('hqd,hkd->hqk', qh, kh,
                       preferred_element_type=jnp.float32) * _SCALE
        s = s + bias[None, :, :]     # masked_fill(mask==0, -1e9) as additive bias
        s = s - jnp.max(s, axis=-1, keepdims=True)
        e = jnp.exp(s)
        p = e / jnp.sum(e, axis=-1, keepdims=True)
        ctx = jnp.einsum('hqk,hkd->hqd', p, vh,
                         preferred_element_type=jnp.float32)   # (H, T, DK)

        # output projection accumulated per head (no lane-axis concat)
        wo_base = idx * H
        acc = jnp.zeros((n_q, D), jnp.float32)
        for h in range(H):
            acc = acc + jnp.dot(ctx[h], w_o_ref[wo_base + h],
                                preferred_element_type=jnp.float32)
        return acc + b_o_ref[idx:idx + 1, :]

    for l in range(NLAYERS):
        n1 = layer_norm(x, 3 * l + 0)
        x = x + mha(n1, n1, tgt_bias, l, 0, True)     # masked self-attn
        n2 = layer_norm(x, 3 * l + 1)
        x = x + mha(n2, mem, src_bias, l, 1, False)   # cross-attn to memory
        n3 = layer_norm(x, 3 * l + 2)
        hdn = jnp.maximum(
            jnp.dot(n3, w1_ref[l], preferred_element_type=jnp.float32) + b1_ref[l],
            0.0)
        x = x + jnp.dot(hdn, w2_ref[l], preferred_element_type=jnp.float32) + b2_ref[l]
        # TODO(synk): dropout inside SublayerConnection is identity (eval mode).

    o_ref[0] = layer_norm(x, 3 * NLAYERS)             # final LayerNorm


def _rep_spec(arr):
    """Full-array spec whose block index never changes -> weight stays VMEM-resident."""
    nd = arr.ndim
    return pl.BlockSpec(arr.shape, lambda b, _nd=nd: (0,) * _nd)


def decoder_forward(x, memory, tgt_bias, src_bias, packed):
    Bn, Tn, Dn = x.shape
    Sn = memory.shape[1]
    weight_args = (packed["ln_a"], packed["ln_b"],
                   packed["w_qkv"], packed["b_qkv"],
                   packed["w_o"], packed["b_o"],
                   packed["w1"], packed["b1"], packed["w2"], packed["b2"])
    tgt_idx = (lambda b: (0, 0, 0)) if tgt_bias.shape[0] == 1 else (lambda b: (b, 0, 0))
    in_specs = [
        pl.BlockSpec((1, Tn, Dn), lambda b: (b, 0, 0)),   # x
        pl.BlockSpec((1, Sn, Dn), lambda b: (b, 0, 0)),   # memory
        pl.BlockSpec((1, Tn, Tn), tgt_idx),               # tgt additive bias (shared)
        pl.BlockSpec((1, Tn, Sn), lambda b: (b, 0, 0)),   # src additive bias (per-batch)
    ] + [_rep_spec(w) for w in weight_args]
    return pl.pallas_call(
        decoder_kernel,
        out_shape=jax.ShapeDtypeStruct((Bn, Tn, Dn), jnp.float32),
        grid=(Bn,),
        in_specs=in_specs,
        out_specs=pl.BlockSpec((1, Tn, Dn), lambda b: (b, 0, 0)),
        compiler_params=_COMPILER_PARAMS,
    )(x, memory, tgt_bias, src_bias, *weight_args)


# ------------------------- host-side weight re-packing -------------------------
def pack_params(params):
    """Stack all per-layer weights and convert attention weights to head-major."""
    def attn_block(p):
        # head-major, transposed so einsum('htd,hkd->htk') == x @ W (per head)
        w_qkv = jnp.concatenate([p["wq"].T.reshape(H, DK, D),
                                 p["wk"].T.reshape(H, DK, D),
                                 p["wv"].T.reshape(H, DK, D)], axis=0)   # (3H, DK, D)
        b_qkv = jnp.concatenate([p["bq"], p["bk"], p["bv"]]).reshape(3 * H, 1, DK)
        w_o = p["wo"].reshape(H, DK, D)                                  # (H, DK, D)
        return w_qkv, b_qkv, w_o, p["bo"]

    w_qkv_l, b_qkv_l, w_o_l, b_o_l = [], [], [], []
    ln_a_l, ln_b_l = [], []
    w1_l, b1_l, w2_l, b2_l = [], [], [], []
    for lp in params["layers"]:
        for key in ("self_attn", "src_attn"):
            wq, bq, wo, bo = attn_block(lp[key])
            w_qkv_l.append(wq); b_qkv_l.append(bq); w_o_l.append(wo); b_o_l.append(bo)
        ln_a_l += [lp["ln0_a"], lp["ln1_a"], lp["ln2_a"]]
        ln_b_l += [lp["ln0_b"], lp["ln1_b"], lp["ln2_b"]]
        w1_l.append(lp["ff"]["w1"]); b1_l.append(lp["ff"]["b1"].reshape(1, DFF))
        w2_l.append(lp["ff"]["w2"]); b2_l.append(lp["ff"]["b2"].reshape(1, D))
    ln_a_l.append(params["norm_a"]); ln_b_l.append(params["norm_b"])
    return dict(
        ln_a=jnp.stack(ln_a_l),                      # (3*NLAYERS+1, D)
        ln_b=jnp.stack(ln_b_l),
        w_qkv=jnp.concatenate(w_qkv_l, axis=0),      # (NLAYERS*2*3H, DK, D)
        b_qkv=jnp.concatenate(b_qkv_l, axis=0),      # (NLAYERS*2*3H, 1, DK)
        w_o=jnp.concatenate(w_o_l, axis=0),          # (NLAYERS*2*H, DK, D)
        b_o=jnp.stack(b_o_l),                        # (NLAYERS*2, D)
        w1=jnp.stack(w1_l), b1=jnp.stack(b1_l),      # (NLAYERS, D, DFF), (NLAYERS, 1, DFF)
        w2=jnp.stack(w2_l), b2=jnp.stack(b2_l),      # (NLAYERS, DFF, D), (NLAYERS, 1, D)
    )


# ------------------------------ Pure-JAX reference ------------------------------
def _ref_layernorm(x, a, b):
    mean = x.mean(-1, keepdims=True)
    var = jnp.sum((x - mean) ** 2, -1, keepdims=True) / (x.shape[-1] - 1)
    return a * (x - mean) / (jnp.sqrt(var) + EPS) + b


def _ref_mha(xq, xkv, mask, p):
    q = xq @ p["wq"] + p["bq"]
    k = xkv @ p["wk"] + p["bk"]
    v = xkv @ p["wv"] + p["bv"]

    def split(t):
        return t.reshape(t.shape[0], t.shape[1], H, DK).transpose(0, 2, 1, 3)

    qh, kh, vh = split(q), split(k), split(v)
    s = jnp.einsum("bhtd,bhsd->bhts", qh, kh) / math.sqrt(DK)
    s = jnp.where(mask[:, None, :, :] > 0, s, NEG_INF)
    pa = jax.nn.softmax(s, axis=-1)
    o = jnp.einsum("bhts,bhsd->bhtd", pa, vh)
    o = o.transpose(0, 2, 1, 3).reshape(xq.shape[0], xq.shape[1], D)
    return o @ p["wo"] + p["bo"]


def _ref_decoder(x, memory, src_mask_b, tgt_mask_b, params):
    for lp in params["layers"]:
        n1 = _ref_layernorm(x, lp["ln0_a"], lp["ln0_b"])
        x = x + _ref_mha(n1, n1, tgt_mask_b, lp["self_attn"])
        n2 = _ref_layernorm(x, lp["ln1_a"], lp["ln1_b"])
        x = x + _ref_mha(n2, memory, src_mask_b, lp["src_attn"])
        n3 = _ref_layernorm(x, lp["ln2_a"], lp["ln2_b"])
        h = jnp.maximum(n3 @ lp["ff"]["w1"] + lp["ff"]["b1"], 0.0)
        x = x + (h @ lp["ff"]["w2"] + lp["ff"]["b2"])
    return _ref_layernorm(x, params["norm_a"], params["norm_b"])


# ------------------------------ Parameter init ----------------------------------
def init_params(key):
    def dense(k, din, dout):
        k1, k2 = jax.random.split(k)
        w = jax.random.normal(k1, (din, dout), jnp.float32) * (1.0 / math.sqrt(din))
        b = jax.random.normal(k2, (dout,), jnp.float32) * 0.01
        return w, b

    def attn_params(k):
        kq, kk, kv, ko = jax.random.split(k, 4)
        wq, bq = dense(kq, D, D)
        wk, bk = dense(kk, D, D)
        wv, bv = dense(kv, D, D)
        wo, bo = dense(ko, D, D)
        return dict(wq=wq, bq=bq, wk=wk, bk=bk, wv=wv, bv=bv, wo=wo, bo=bo)

    keys = jax.random.split(key, NLAYERS)
    layers = []
    for i in range(NLAYERS):
        ks = jax.random.split(keys[i], 4)
        w1, b1 = dense(ks[2], D, DFF)
        w2, b2 = dense(ks[3], DFF, D)
        layers.append(dict(
            self_attn=attn_params(ks[0]),
            src_attn=attn_params(ks[1]),
            ff=dict(w1=w1, b1=b1, w2=w2, b2=b2),
            ln0_a=jnp.ones(D, jnp.float32), ln0_b=jnp.zeros(D, jnp.float32),
            ln1_a=jnp.ones(D, jnp.float32), ln1_b=jnp.zeros(D, jnp.float32),
            ln2_a=jnp.ones(D, jnp.float32), ln2_b=jnp.zeros(D, jnp.float32)))
    return dict(layers=layers,
                norm_a=jnp.ones(D, jnp.float32),
                norm_b=jnp.zeros(D, jnp.float32))


# ---------------------------------- main -----------------------------------------
if __name__ == "__main__":
    key = jax.random.PRNGKey(0)
    kx, km, kp = jax.random.split(key, 3)

    x = jax.random.normal(kx, (B, T, D), jnp.float32)
    memory = jax.random.normal(km, (B, S, D), jnp.float32)

    # tgt_mask: causal subsequent-mask (1, T, T); src_mask: (B, 1, S) padding mask
    tgt_mask = jnp.tril(jnp.ones((T, T), jnp.float32))[None]
    src_mask = jnp.ones((B, 1, S), jnp.float32).at[1, 0, S - 2:].set(0.0)

    # kernel consumes additive biases: 0 where attended, -1e9 where masked
    # (note: a fully-masked row degenerates the same way as the torch reference)
    tgt_bias = jnp.where(tgt_mask > 0, 0.0, NEG_INF).astype(jnp.float32)          # (1, T, T)
    src_bias = jnp.where(jnp.broadcast_to(src_mask, (B, T, S)) > 0,
                         0.0, NEG_INF).astype(jnp.float32)                        # (B, T, S)

    # reference consumes the boolean-style masks (exactly the PyTorch semantics)
    tgt_mask_b = jnp.broadcast_to(tgt_mask, (B, T, T)).astype(jnp.float32)
    src_mask_b = jnp.broadcast_to(src_mask, (B, T, S)).astype(jnp.float32)

    params = init_params(kp)
    packed = pack_params(params)

    out = decoder_forward(x, memory, tgt_bias, src_bias, packed)
    out = jax.block_until_ready(out)

    ref = _ref_decoder(x, memory, src_mask_b, tgt_mask_b, params)
    assert out.shape == (B, T, D)
    assert jnp.allclose(out, ref, atol=1e-3, rtol=1e-3), "Pallas output mismatch vs reference"

    print("KERNEL_OK")
</pallas_src>

<mosaic_0001>
module attributes {stable_mosaic.version = 11 : i64} {
  func.func @decoder_kernel(%arg0: i32, %arg1: memref<1x8x32xf32, #tpu.memory_space<vmem>>, %arg2: memref<1x8x32xf32, #tpu.memory_space<vmem>>, %arg3: memref<1x8x8xf32, #tpu.memory_space<vmem>>, %arg4: memref<1x8x8xf32, #tpu.memory_space<vmem>>, %arg5: memref<7x32xf32, #tpu.memory_space<vmem>>, %arg6: memref<7x32xf32, #tpu.memory_space<vmem>>, %arg7: memref<48x8x32xf32, #tpu.memory_space<vmem>>, %arg8: memref<48x1x8xf32, #tpu.memory_space<vmem>>, %arg9: memref<16x8x32xf32, #tpu.memory_space<vmem>>, %arg10: memref<4x32xf32, #tpu.memory_space<vmem>>, %arg11: memref<2x32x64xf32, #tpu.memory_space<vmem>>, %arg12: memref<2x1x64xf32, #tpu.memory_space<vmem>>, %arg13: memref<2x64x32xf32, #tpu.memory_space<vmem>>, %arg14: memref<2x1x32xf32, #tpu.memory_space<vmem>>, %arg15: memref<1x8x32xf32, #tpu.memory_space<vmem>>) attributes {dimension_semantics = [#tpu.dimension_semantics<parallel>], iteration_bounds = array<i64: 2>, scalar_prefetch = 0 : i64, scratch_operands = 0 : i64, tpu.core_type = #tpu.core_type<tc>, window_params = [{transform_indices = @transform_0, window_bounds = array<i64: 1, 8, 32>}, {transform_indices = @transform_1, window_bounds = array<i64: 1, 8, 32>}, {pipeline_mode = #tpu.pipeline_mode<synchronous>, transform_indices = @transform_2, window_bounds = array<i64: 1, 8, 8>}, {transform_indices = @transform_3, window_bounds = array<i64: 1, 8, 8>}, {pipeline_mode = #tpu.pipeline_mode<synchronous>, transform_indices = @transform_4, window_bounds = array<i64: 7, 32>}, {pipeline_mode = #tpu.pipeline_mode<synchronous>, transform_indices = @transform_5, window_bounds = array<i64: 7, 32>}, {pipeline_mode = #tpu.pipeline_mode<synchronous>, transform_indices = @transform_6, window_bounds = array<i64: 48, 8, 32>}, {pipeline_mode = #tpu.pipeline_mode<synchronous>, transform_indices = @transform_7, window_bounds = array<i64: 48, 1, 8>}, {pipeline_mode = #tpu.pipeline_mode<synchronous>, transform_indices = @transform_8, window_bounds = array<i64: 16, 8, 32>}, {pipeline_mode = #tpu.pipeline_mode<synchronous>, transform_indices = @transform_9, window_bounds = array<i64: 4, 32>}, {pipeline_mode = #tpu.pipeline_mode<synchronous>, transform_indices = @transform_10, window_bounds = array<i64: 2, 32, 64>}, {pipeline_mode = #tpu.pipeline_mode<synchronous>, transform_indices = @transform_11, window_bounds = array<i64: 2, 1, 64>}, {pipeline_mode = #tpu.pipeline_mode<synchronous>, transform_indices = @transform_12, window_bounds = array<i64: 2, 64, 32>}, {pipeline_mode = #tpu.pipeline_mode<synchronous>, transform_indices = @transform_13, window_bounds = array<i64: 2, 1, 32>}, {transform_indices = @transform_14, window_bounds = array<i64: 1, 8, 32>}]} {
    %c0 = arith.constant 0 : index
    %c0_0 = arith.constant 0 : index
    %c0_1 = arith.constant 0 : index
    %0 = vector.load %arg1[%c0, %c0_0, %c0_1] : memref<1x8x32xf32, #tpu.memory_space<vmem>>, vector<1x8x32xf32>
    %1 = vector.shape_cast %0 : vector<1x8x32xf32> to vector<8x32xf32>
    %c0_2 = arith.constant 0 : index
    %c0_3 = arith.constant 0 : index
    %c0_4 = arith.constant 0 : index
    %2 = vector.load %arg2[%c0_2, %c0_3, %c0_4] : memref<1x8x32xf32, #tpu.memory_space<vmem>>, vector<1x8x32xf32>
    %3 = vector.shape_cast %2 : vector<1x8x32xf32> to vector<8x32xf32>
    %c0_5 = arith.constant 0 : index
    %c0_6 = arith.constant 0 : index
    %c0_7 = arith.constant 0 : index
    %4 = vector.load %arg3[%c0_5, %c0_6, %c0_7] : memref<1x8x8xf32, #tpu.memory_space<vmem>>, vector<1x8x8xf32>
    %5 = vector.shape_cast %4 : vector<1x8x8xf32> to vector<8x8xf32>
    %c0_8 = arith.constant 0 : index
    %c0_9 = arith.constant 0 : index
    %c0_10 = arith.constant 0 : index
    %6 = vector.load %arg4[%c0_8, %c0_9, %c0_10] : memref<1x8x8xf32, #tpu.memory_space<vmem>>, vector<1x8x8xf32>
    %7 = vector.shape_cast %6 : vector<1x8x8xf32> to vector<8x8xf32>
    %c0_11 = arith.constant 0 : index
    %c0_12 = arith.constant 0 : index
    %8 = vector.load %arg5[%c0_11, %c0_12] : memref<7x32xf32, #tpu.memory_space<vmem>>, vector<1x32xf32>
    %c0_13 = arith.constant 0 : index
    %c0_14 = arith.constant 0 : index
    %9 = vector.load %arg6[%c0_13, %c0_14] : memref<7x32xf32, #tpu.memory_space<vmem>>, vector<1x32xf32>
    %cst = arith.constant dense<0.000000e+00> : vector<8xf32>
    %10 = vector.multi_reduction <add>, %1, %cst [1] : vector<8x32xf32> to vector<8xf32>
    %11 = vector.shape_cast %10 : vector<8xf32> to vector<8x1xf32>
    %cst_15 = arith.constant 3.200000e+01 : f32
    %12 = vector.broadcast %cst_15 : f32 to vector<8x1xf32>
    %13 = arith.divf %11, %12 : vector<8x1xf32>
    %14 = vector.broadcast %13 : vector<8x1xf32> to vector<8x32xf32>
    %15 = arith.subf %1, %14 : vector<8x32xf32>
    %16 = arith.mulf %15, %15 : vector<8x32xf32>
    %cst_16 = arith.constant dense<0.000000e+00> : vector<8xf32>
    %17 = vector.multi_reduction <add>, %16, %cst_16 [1] : vector<8x32xf32> to vector<8xf32>
    %18 = vector.shape_cast %17 : vector<8xf32> to vector<8x1xf32>
    %cst_17 = arith.constant 0.0322580636 : f32
    %19 = vector.broadcast %cst_17 : f32 to vector<8x1xf32>
    %20 = arith.mulf %18, %19 : vector<8x1xf32>
    %21 = vector.broadcast %13 : vector<8x1xf32> to vector<8x32xf32>
    %22 = arith.subf %1, %21 : vector<8x32xf32>
    %23 = vector.broadcast %8 : vector<1x32xf32> to vector<8x32xf32>
    %24 = arith.mulf %23, %22 : vector<8x32xf32>
    %25 = math.sqrt %20 : vector<8x1xf32>
    %cst_18 = arith.constant 9.99999997E-7 : f32
    %26 = vector.broadcast %cst_18 : f32 to vector<8x1xf32>
    %27 = arith.addf %25, %26 : vector<8x1xf32>
    %28 = vector.broadcast %27 : vector<8x1xf32> to vector<8x32xf32>
    %29 = arith.divf %24, %28 : vector<8x32xf32>
    %30 = vector.broadcast %9 : vector<1x32xf32> to vector<8x32xf32>
    %31 = arith.addf %29, %30 : vector<8x32xf32>
    %32 = vector.shape_cast %31 : vector<8x32xf32> to vector<1x8x32xf32>
    %33 = vector.shape_cast %32 : vector<1x8x32xf32> to vector<1x8x32xf32>
    %34 = vector.broadcast %33 : vector<1x8x32xf32> to vector<12x8x32xf32>
    %c0_19 = arith.constant 0 : index
    %c0_20 = arith.constant 0 : index
    %c0_21 = arith.constant 0 : index
    %35 = vector.load %arg7[%c0_19, %c0_20, %c0_21] : memref<48x8x32xf32, #tpu.memory_space<vmem>>, vector<12x8x32xf32>
    "tpu.trace_start"() <{level = 10 : i32, message = "htd,hkd->htk"}> : () -> ()
    %cst_22 = arith.constant dense<0.000000e+00> : vector<12x8x8xf32>
    %36 = tpu.matmul %34, %35, %cst_22 {dimension_numbers = #tpu.dot_dimension_numbers<[2], [2], [1], [1], [0, 0, 0, 1, 1, 1], [0], [0]>} : vector<12x8x32xf32>, vector<12x8x32xf32>, vector<12x8x8xf32> -> vector<12x8x8xf32>
    "tpu.trace_stop"() : () -> ()
    %c0_23 = arith.constant 0 : index
    %c0_24 = arith.constant 0 : index
    %c0_25 = arith.constant 0 : index
    %37 = vector.load %arg8[%c0_23, %c0_24, %c0_25] : memref<48x1x8xf32, #tpu.memory_space<vmem>>, vector<12x1x8xf32>
    %38 = vector.broadcast %37 : vector<12x1x8xf32> to vector<12x8x8xf32>
    %39 = arith.addf %36, %38 : vector<12x8x8xf32>
    %40 = vector.extract_strided_slice %39 {offsets = [0, 0, 0], sizes = [4, 8, 8], strides = [1, 1, 1]} : vector<12x8x8xf32> to vector<4x8x8xf32>
    %41 = vector.extract_strided_slice %39 {offsets = [4, 0, 0], sizes = [4, 8, 8], strides = [1, 1, 1]} : vector<12x8x8xf32> to vector<4x8x8xf32>
    %42 = vector.extract_strided_slice %39 {offsets = [8, 0, 0], sizes = [4, 8, 8], strides = [1, 1, 1]} : vector<12x8x8xf32> to vector<4x8x8xf32>
    "tpu.trace_start"() <{level = 10 : i32, message = "hqd,hkd->hqk"}> : () -> ()
    %cst_26 = arith.constant dense<0.000000e+00> : vector<4x8x8xf32>
    %43 = tpu.matmul %40, %41, %cst_26 {dimension_numbers = #tpu.dot_dimension_numbers<[2], [2], [1], [1], [0, 0, 0, 1, 1, 1], [0], [0]>} : vector<4x8x8xf32>, vector<4x8x8xf32>, vector<4x8x8xf32> -> vector<4x8x8xf32>
    "tpu.trace_stop"() : () -> ()
    %cst_27 = arith.constant 0.353553385 : f32
    %44 = vector.broadcast %cst_27 : f32 to vector<4x8x8xf32>
    %45 = arith.mulf %43, %44 : vector<4x8x8xf32>
    %46 = vector.shape_cast %5 : vector<8x8xf32> to vector<1x8x8xf32>
    %47 = vector.broadcast %46 : vector<1x8x8xf32> to vector<4x8x8xf32>
    %48 = arith.addf %45, %47 : vector<4x8x8xf32>
    %cst_28 = arith.constant dense<0xFF800000> : vector<4x8xf32>
    %49 = vector.multi_reduction <maximumf>, %48, %cst_28 [2] : vector<4x8x8xf32> to vector<4x8xf32>
    %50 = vector.shape_cast %49 : vector<4x8xf32> to vector<4x8x1xf32>
    %51 = vector.broadcast %50 : vector<4x8x1xf32> to vector<4x8x8xf32>
    %52 = arith.subf %48, %51 : vector<4x8x8xf32>
    %53 = math.exp %52 : vector<4x8x8xf32>
    %cst_29 = arith.constant dense<0.000000e+00> : vector<4x8xf32>
    %54 = vector.multi_reduction <add>, %53, %cst_29 [2] : vector<4x8x8xf32> to vector<4x8xf32>
    %55 = vector.shape_cast %54 : vector<4x8xf32> to vector<4x8x1xf32>
    %56 = vector.broadcast %55 : vector<4x8x1xf32> to vector<4x8x8xf32>
    %57 = arith.divf %53, %56 : vector<4x8x8xf32>
    "tpu.trace_start"() <{level = 10 : i32, message = "hqk,hkd->hqd"}> : () -> ()
    %cst_30 = arith.constant dense<0.000000e+00> : vector<4x8x8xf32>
    %58 = tpu.matmul %57, %42, %cst_30 {dimension_numbers = #tpu.dot_dimension_numbers<[2], [1], [1], [2], [0, 0, 0, 1, 1, 2], [0], [0]>} : vector<4x8x8xf32>, vector<4x8x8xf32>, vector<4x8x8xf32> -> vector<4x8x8xf32>
    %cst_31 = arith.constant 0.000000e+00 : f32
    "tpu.trace_stop"() : () -> ()
    %59 = vector.broadcast %cst_31 : f32 to vector<8x32xf32>
    %60 = vector.extract_strided_slice %58 {offsets = [0, 0, 0], sizes = [1, 8, 8], strides = [1, 1, 1]} : vector<4x8x8xf32> to vector<1x8x8xf32>
    %61 = vector.shape_cast %60 : vector<1x8x8xf32> to vector<8x8xf32>
    %c0_32 = arith.constant 0 : index
    %c0_33 = arith.constant 0 : index
    %c0_34 = arith.constant 0 : index
    %62 = vector.load %arg9[%c0_32, %c0_33, %c0_34] : memref<16x8x32xf32, #tpu.memory_space<vmem>>, vector<1x8x32xf32>
    %63 = vector.shape_cast %62 : vector<1x8x32xf32> to vector<8x32xf32>
    %cst_35 = arith.constant dense<0.000000e+00> : vector<8x32xf32>
    %64 = tpu.matmul %61, %63, %cst_35 {dimension_numbers = #tpu.dot_dimension_numbers<[1], [0], [0], [1], [0, 0, 1, 1], [], []>} : vector<8x8xf32>, vector<8x32xf32>, vector<8x32xf32> -> vector<8x32xf32>
    %65 = arith.addf %59, %64 : vector<8x32xf32>
    %66 = vector.extract_strided_slice %58 {offsets = [1, 0, 0], sizes = [1, 8, 8], strides = [1, 1, 1]} : vector<4x8x8xf32> to vector<1x8x8xf32>
    %67 = vector.shape_cast %66 : vector<1x8x8xf32> to vector<8x8xf32>
    %c1 = arith.constant 1 : index
    %c0_36 = arith.constant 0 : index
    %c0_37 = arith.constant 0 : index
    %68 = vector.load %arg9[%c1, %c0_36, %c0_37] : memref<16x8x32xf32, #tpu.memory_space<vmem>>, vector<1x8x32xf32>
    %69 = vector.shape_cast %68 : vector<1x8x32xf32> to vector<8x32xf32>
    %cst_38 = arith.constant dense<0.000000e+00> : vector<8x32xf32>
    %70 = tpu.matmul %67, %69, %cst_38 {dimension_numbers = #tpu.dot_dimension_numbers<[1], [0], [0], [1], [0, 0, 1, 1], [], []>} : vector<8x8xf32>, vector<8x32xf32>, vector<8x32xf32> -> vector<8x32xf32>
    %71 = arith.addf %65, %70 : vector<8x32xf32>
    %72 = vector.extract_strided_slice %58 {offsets = [2, 0, 0], sizes = [1, 8, 8], strides = [1, 1, 1]} : vector<4x8x8xf32> to vector<1x8x8xf32>
    %73 = vector.shape_cast %72 : vector<1x8x8xf32> to vector<8x8xf32>
    %c2 = arith.constant 2 : index
    %c0_39 = arith.constant 0 : index
    %c0_40 = arith.constant 0 : index
    %74 = vector.load %arg9[%c2, %c0_39, %c0_40] : memref<16x8x32xf32, #tpu.memory_space<vmem>>, vector<1x8x32xf32>
    %75 = vector.shape_cast %74 : vector<1x8x32xf32> to vector<8x32xf32>
    %cst_41 = arith.constant dense<0.000000e+00> : vector<8x32xf32>
    %76 = tpu.matmul %73, %75, %cst_41 {dimension_numbers = #tpu.dot_dimension_numbers<[1], [0], [0], [1], [0, 0, 1, 1], [], []>} : vector<8x8xf32>, vector<8x32xf32>, vector<8x32xf32> -> vector<8x32xf32>
    %77 = arith.addf %71, %76 : vector<8x32xf32>
    %78 = vector.extract_strided_slice %58 {offsets = [3, 0, 0], sizes = [1, 8, 8], strides = [1, 1, 1]} : vector<4x8x8xf32> to vector<1x8x8xf32>
    %79 = vector.shape_cast %78 : vector<1x8x8xf32> to vector<8x8xf32>
    %c3 = arith.constant 3 : index
    %c0_42 = arith.constant 0 : index
    %c0_43 = arith.constant 0 : index
    %80 = vector.load %arg9[%c3, %c0_42, %c0_43] : memref<16x8x32xf32, #tpu.memory_space<vmem>>, vector<1x8x32xf32>
    %81 = vector.shape_cast %80 : vector<1x8x32xf32> to vector<8x32xf32>
    %cst_44 = arith.constant dense<0.000000e+00> : vector<8x32xf32>
    %82 = tpu.matmul %79, %81, %cst_44 {dimension_numbers = #tpu.dot_dimension_numbers<[1], [0], [0], [1], [0, 0, 1, 1], [], []>} : vector<8x8xf32>, vector<8x32xf32>, vector<8x32xf32> -> vector<8x32xf32>
    %83 = arith.addf %77, %82 : vector<8x32xf32>
    %c0_45 = arith.constant 0 : index
    %c0_46 = arith.constant 0 : index
    %84 = vector.load %arg10[%c0_45, %c0_46] : memref<4x32xf32, #tpu.memory_space<vmem>>, vector<1x32xf32>
    %85 = vector.broadcast %84 : vector<1x32xf32> to vector<8x32xf32>
    %86 = arith.addf %83, %85 : vector<8x32xf32>
    %87 = arith.addf %1, %86 : vector<8x32xf32>
    %c1_47 = arith.constant 1 : index
    %c0_48 = arith.constant 0 : index
    %88 = vector.load %arg5[%c1_47, %c0_48] : memref<7x32xf32, #tpu.memory_space<vmem>>, vector<1x32xf32>
    %c1_49 = arith.constant 1 : index
    %c0_50 = arith.constant 0 : index
    %89 = vector.load %arg6[%c1_49, %c0_50] : memref<7x32xf32, #tpu.memory_space<vmem>>, vector<1x32xf32>
    %cst_51 = arith.constant dense<0.000000e+00> : vector<8xf32>
    %90 = vector.multi_reduction <add>, %87, %cst_51 [1] : vector<8x32xf32> to vector<8xf32>
    %91 = vector.shape_cast %90 : vector<8xf32> to vector<8x1xf32>
    %cst_52 = arith.constant 3.200000e+01 : f32
    %92 = vector.broadcast %cst_52 : f32 to vector<8x1xf32>
    %93 = arith.divf %91, %92 : vector<8x1xf32>
    %94 = vector.broadcast %93 : vector<8x1xf32> to vector<8x32xf32>
    %95 = arith.subf %87, %94 : vector<8x32xf32>
    %96 = arith.mulf %95, %95 : vector<8x32xf32>
    %cst_53 = arith.constant dense<0.000000e+00> : vector<8xf32>
    %97 = vector.multi_reduction <add>, %96, %cst_53 [1] : vector<8x32xf32> to vector<8xf32>
    %98 = vector.shape_cast %97 : vector<8xf32> to vector<8x1xf32>
    %cst_54 = arith.constant 0.0322580636 : f32
    %99 = vector.broadcast %cst_54 : f32 to vector<8x1xf32>
    %100 = arith.mulf %98, %99 : vector<8x1xf32>
    %101 = vector.broadcast %93 : vector<8x1xf32> to vector<8x32xf32>
    %102 = arith.subf %87, %101 : vector<8x32xf32>
    %103 = vector.broadcast %88 : vector<1x32xf32> to vector<8x32xf32>
    %104 = arith.mulf %103, %102 : vector<8x32xf32>
    %105 = math.sqrt %100 : vector<8x1xf32>
    %cst_55 = arith.constant 9.99999997E-7 : f32
    %106 = vector.broadcast %cst_55 : f32 to vector<8x1xf32>
    %107 = arith.addf %105, %106 : vector<8x1xf32>
    %108 = vector.broadcast %107 : vector<8x1xf32> to vector<8x32xf32>
    %109 = arith.divf %104, %108 : vector<8x32xf32>
    %110 = vector.broadcast %89 : vector<1x32xf32> to vector<8x32xf32>
    %111 = arith.addf %109, %110 : vector<8x32xf32>
    %112 = vector.shape_cast %111 : vector<8x32xf32> to vector<1x8x32xf32>
    %113 = vector.shape_cast %112 : vector<1x8x32xf32> to vector<1x8x32xf32>
    %114 = vector.broadcast %113 : vector<1x8x32xf32> to vector<4x8x32xf32>
    %115 = vector.shape_cast %3 : vector<8x32xf32> to vector<1x8x32xf32>
    %116 = vector.shape_cast %115 : vector<1x8x32xf32> to vector<1x8x32xf32>
    %117 = vector.broadcast %116 : vector<1x8x32xf32> to vector<8x8x32xf32>
    %c12 = arith.constant 12 : index
    %c0_56 = arith.constant 0 : index
    %c0_57 = arith.constant 0 : index
    %118 = vector.load %arg7[%c12, %c0_56, %c0_57] : memref<48x8x32xf32, #tpu.memory_space<vmem>>, vector<4x8x32xf32>
    "tpu.trace_start"() <{level = 10 : i32, message = "htd,hkd->htk"}> : () -> ()
    %cst_58 = arith.constant dense<0.000000e+00> : vector<4x8x8xf32>
    %119 = tpu.matmul %114, %118, %cst_58 {dimension_numbers = #tpu.dot_dimension_numbers<[2], [2], [1], [1], [0, 0, 0, 1, 1, 1], [0], [0]>} : vector<4x8x32xf32>, vector<4x8x32xf32>, vector<4x8x8xf32> -> vector<4x8x8xf32>
    "tpu.trace_stop"() : () -> ()
    %c12_59 = arith.constant 12 : index
    %c0_60 = arith.constant 0 : index
    %c0_61 = arith.constant 0 : index
    %120 = vector.load %arg8[%c12_59, %c0_60, %c0_61] : memref<48x1x8xf32, #tpu.memory_space<vmem>>, vector<4x1x8xf32>
    %121 = vector.broadcast %120 : vector<4x1x8xf32> to vector<4x8x8xf32>
    %122 = arith.addf %119, %121 : vector<4x8x8xf32>
    %c16 = arith.constant 16 : index
    %c0_62 = arith.constant 0 : index
    %c0_63 = arith.constant 0 : index
    %123 = vector.load %arg7[%c16, %c0_62, %c0_63] : memref<48x8x32xf32, #tpu.memory_space<vmem>>, vector<8x8x32xf32>
    "tpu.trace_start"() <{level = 10 : i32, message = "hsd,hkd->hsk"}> : () -> ()
    %cst_64 = arith.constant dense<0.000000e+00> : vector<8x8x8xf32>
    %124 = tpu.matmul %117, %123, %cst_64 {dimension_numbers = #tpu.dot_dimension_numbers<[2], [2], [1], [1], [0, 0, 0, 1, 1, 1], [0], [0]>} : vector<8x8x32xf32>, vector<8x8x32xf32>, vector<8x8x8xf32> -> vector<8x8x8xf32>
    "tpu.trace_stop"() : () -> ()
    %c16_65 = arith.constant 16 : index
    %c0_66 = arith.constant 0 : index
    %c0_67 = arith.constant 0 : index
    %125 = vector.load %arg8[%c16_65, %c0_66, %c0_67] : memref<48x1x8xf32, #tpu.memory_space<vmem>>, vector<8x1x8xf32>
    %126 = vector.broadcast %125 : vector<8x1x8xf32> to vector<8x8x8xf32>
    %127 = arith.addf %124, %126 : vector<8x8x8xf32>
    %128 = vector.extract_strided_slice %127 {offsets = [0, 0, 0], sizes = [4, 8, 8], strides = [1, 1, 1]} : vector<8x8x8xf32> to vector<4x8x8xf32>
    %129 = vector.extract_strided_slice %127 {offsets = [4, 0, 0], sizes = [4, 8, 8], strides = [1, 1, 1]} : vector<8x8x8xf32> to vector<4x8x8xf32>
    "tpu.trace_start"() <{level = 10 : i32, message = "hqd,hkd->hqk"}> : () -> ()
    %cst_68 = arith.constant dense<0.000000e+00> : vector<4x8x8xf32>
    %130 = tpu.matmul %122, %128, %cst_68 {dimension_numbers = #tpu.dot_dimension_numbers<[2], [2], [1], [1], [0, 0, 0, 1, 1, 1], [0], [0]>} : vector<4x8x8xf32>, vector<4x8x8xf32>, vector<4x8x8xf32> -> vector<4x8x8xf32>
    "tpu.trace_stop"() : () -> ()
    %cst_69 = arith.constant 0.353553385 : f32
    %131 = vector.broadcast %cst_69 : f32 to vector<4x8x8xf32>
    %132 = arith.mulf %130, %131 : vector<4x8x8xf32>
    %133 = vector.shape_cast %7 : vector<8x8xf32> to vector<1x8x8xf32>
    %134 = vector.broadcast %133 : vector<1x8x8xf32> to vector<4x8x8xf32>
    %135 = arith.addf %132, %134 : vector<4x8x8xf32>
    %cst_70 = arith.constant dense<0xFF800000> : vector<4x8xf32>
    %136 = vector.multi_reduction <maximumf>, %135, %cst_70 [2] : vector<4x8x8xf32> to vector<4x8xf32>
    %137 = vector.shape_cast %136 : vector<4x8xf32> to vector<4x8x1xf32>
    %138 = vector.broadcast %137 : vector<4x8x1xf32> to vector<4x8x8xf32>
    %139 = arith.subf %135, %138 : vector<4x8x8xf32>
    %140 = math.exp %139 : vector<4x8x8xf32>
    %cst_71 = arith.constant dense<0.000000e+00> : vector<4x8xf32>
    %141 = vector.multi_reduction <add>, %140, %cst_71 [2] : vector<4x8x8xf32> to vector<4x8xf32>
    %142 = vector.shape_cast %141 : vector<4x8xf32> to vector<4x8x1xf32>
    %143 = vector.broadcast %142 : vector<4x8x1xf32> to vector<4x8x8xf32>
    %144 = arith.divf %140, %143 : vector<4x8x8xf32>
    "tpu.trace_start"() <{level = 10 : i32, message = "hqk,hkd->hqd"}> : () -> ()
    %cst_72 = arith.constant dense<0.000000e+00> : vector<4x8x8xf32>
    %145 = tpu.matmul %144, %129, %cst_72 {dimension_numbers = #tpu.dot_dimension_numbers<[2], [1], [1], [2], [0, 0, 0, 1, 1, 2], [0], [0]>} : vector<4x8x8xf32>, vector<4x8x8xf32>, vector<4x8x8xf32> -> vector<4x8x8xf32>
    %cst_73 = arith.constant 0.000000e+00 : f32
    "tpu.trace_stop"() : () -> ()
    %146 = vector.broadcast %cst_73 : f32 to vector<8x32xf32>
    %147 = vector.extract_strided_slice %145 {offsets = [0, 0, 0], sizes = [1, 8, 8], strides = [1, 1, 1]} : vector<4x8x8xf32> to vector<1x8x8xf32>
    %148 = vector.shape_cast %147 : vector<1x8x8xf32> to vector<8x8xf32>
    %c4 = arith.constant 4 : index
    %c0_74 = arith.constant 0 : index
    %c0_75 = arith.constant 0 : index
    %149 = vector.load %arg9[%c4, %c0_74, %c0_75] : memref<16x8x32xf32, #tpu.memory_space<vmem>>, vector<1x8x32xf32>
    %150 = vector.shape_cast %149 : vector<1x8x32xf32> to vector<8x32xf32>
    %cst_76 = arith.constant dense<0.000000e+00> : vector<8x32xf32>
    %151 = tpu.matmul %148, %150, %cst_76 {dimension_numbers = #tpu.dot_dimension_numbers<[1], [0], [0], [1], [0, 0, 1, 1], [], []>} : vector<8x8xf32>, vector<8x32xf32>, vector<8x32xf32> -> vector<8x32xf32>
    %152 = arith.addf %146, %151 : vector<8x32xf32>
    %153 = vector.extract_strided_slice %145 {offsets = [1, 0, 0], sizes = [1, 8, 8], strides = [1, 1, 1]} : vector<4x8x8xf32> to vector<1x8x8xf32>
    %154 = vector.shape_cast %153 : vector<1x8x8xf32> to vector<8x8xf32>
    %c5 = arith.constant 5 : index
    %c0_77 = arith.constant 0 : index
    %c0_78 = arith.constant 0 : index
    %155 = vector.load %arg9[%c5, %c0_77, %c0_78] : memref<16x8x32xf32, #tpu.memory_space<vmem>>, vector<1x8x32xf32>
    %156 = vector.shape_cast %155 : vector<1x8x32xf32> to vector<8x32xf32>
    %cst_79 = arith.constant dense<0.000000e+00> : vector<8x32xf32>
    %157 = tpu.matmul %154, %156, %cst_79 {dimension_numbers = #tpu.dot_dimension_numbers<[1], [0], [0], [1], [0, 0, 1, 1], [], []>} : vector<8x8xf32>, vector<8x32xf32>, vector<8x32xf32> -> vector<8x32xf32>
    %158 = arith.addf %152, %157 : vector<8x32xf32>
    %159 = vector.extract_strided_slice %145 {offsets = [2, 0, 0], sizes = [1, 8, 8], strides = [1, 1, 1]} : vector<4x8x8xf32> to vector<1x8x8xf32>
    %160 = vector.shape_cast %159 : vector<1x8x8xf32> to vector<8x8xf32>
    %c6 = arith.constant 6 : index
    %c0_80 = arith.constant 0 : index
    %c0_81 = arith.constant 0 : index
    %161 = vector.load %arg9[%c6, %c0_80, %c0_81] : memref<16x8x32xf32, #tpu.memory_space<vmem>>, vector<1x8x32xf32>
    %162 = vector.shape_cast %161 : vector<1x8x32xf32> to vector<8x32xf32>
    %cst_82 = arith.constant dense<0.000000e+00> : vector<8x32xf32>
    %163 = tpu.matmul %160, %162, %cst_82 {dimension_numbers = #tpu.dot_dimension_numbers<[1], [0], [0], [1], [0, 0, 1, 1], [], []>} : vector<8x8xf32>, vector<8x32xf32>, vector<8x32xf32> -> vector<8x32xf32>
    %164 = arith.addf %158, %163 : vector<8x32xf32>
    %165 = vector.extract_strided_slice %145 {offsets = [3, 0, 0], sizes = [1, 8, 8], strides = [1, 1, 1]} : vector<4x8x8xf32> to vector<1x8x8xf32>
    %166 = vector.shape_cast %165 : vector<1x8x8xf32> to vector<8x8xf32>
    %c7 = arith.constant 7 : index
    %c0_83 = arith.constant 0 : index
    %c0_84 = arith.constant 0 : index
    %167 = vector.load %arg9[%c7, %c0_83, %c0_84] : memref<16x8x32xf32, #tpu.memory_space<vmem>>, vector<1x8x32xf32>
    %168 = vector.shape_cast %167 : vector<1x8x32xf32> to vector<8x32xf32>
    %cst_85 = arith.constant dense<0.000000e+00> : vector<8x32xf32>
    %169 = tpu.matmul %166, %168, %cst_85 {dimension_numbers = #tpu.dot_dimension_numbers<[1], [0], [0], [1], [0, 0, 1, 1], [], []>} : vector<8x8xf32>, vector<8x32xf32>, vector<8x32xf32> -> vector<8x32xf32>
    %170 = arith.addf %164, %169 : vector<8x32xf32>
    %c1_86 = arith.constant 1 : index
    %c0_87 = arith.constant 0 : index
    %171 = vector.load %arg10[%c1_86, %c0_87] : memref<4x32xf32, #tpu.memory_space<vmem>>, vector<1x32xf32>
    %172 = vector.broadcast %171 : vector<1x32xf32> to vector<8x32xf32>
    %173 = arith.addf %170, %172 : vector<8x32xf32>
    %174 = arith.addf %87, %173 : vector<8x32xf32>
    %c2_88 = arith.constant 2 : index
    %c0_89 = arith.constant 0 : index
    %175 = vector.load %arg5[%c2_88, %c0_89] : memref<7x32xf32, #tpu.memory_space<vmem>>, vector<1x32xf32>
    %c2_90 = arith.constant 2 : index
    %c0_91 = arith.constant 0 : index
    %176 = vector.load %arg6[%c2_90, %c0_91] : memref<7x32xf32, #tpu.memory_space<vmem>>, vector<1x32xf32>
    %cst_92 = arith.constant dense<0.000000e+00> : vector<8xf32>
    %177 = vector.multi_reduction <add>, %174, %cst_92 [1] : vector<8x32xf32> to vector<8xf32>
    %178 = vector.shape_cast %177 : vector<8xf32> to vector<8x1xf32>
    %cst_93 = arith.constant 3.200000e+01 : f32
    %179 = vector.broadcast %cst_93 : f32 to vector<8x1xf32>
    %180 = arith.divf %178, %179 : vector<8x1xf32>
    %181 = vector.broadcast %180 : vector<8x1xf32> to vector<8x32xf32>
    %182 = arith.subf %174, %181 : vector<8x32xf32>
    %183 = arith.mulf %182, %182 : vector<8x32xf32>
    %cst_94 = arith.constant dense<0.000000e+00> : vector<8xf32>
    %184 = vector.multi_reduction <add>, %183, %cst_94 [1] : vector<8x32xf32> to vector<8xf32>
    %185 = vector.shape_cast %184 : vector<8xf32> to vector<8x1xf32>
    %cst_95 = arith.constant 0.0322580636 : f32
    %186 = vector.broadcast %cst_95 : f32 to vector<8x1xf32>
    %187 = arith.mulf %185, %186 : vector<8x1xf32>
    %188 = vector.broadcast %180 : vector<8x1xf32> to vector<8x32xf32>
    %189 = arith.subf %174, %188 : vector<8x32xf32>
    %190 = vector.broadcast %175 : vector<1x32xf32> to vector<8x32xf32>
    %191 = arith.mulf %190, %189 : vector<8x32xf32>
    %192 = math.sqrt %187 : vector<8x1xf32>
    %cst_96 = arith.constant 9.99999997E-7 : f32
    %193 = vector.broadcast %cst_96 : f32 to vector<8x1xf32>
    %194 = arith.addf %192, %193 : vector<8x1xf32>
    %195 = vector.broadcast %194 : vector<8x1xf32> to vector<8x32xf32>
    %196 = arith.divf %191, %195 : vector<8x32xf32>
    %197 = vector.broadcast %176 : vector<1x32xf32> to vector<8x32xf32>
    %198 = arith.addf %196, %197 : vector<8x32xf32>
    %c0_97 = arith.constant 0 : index
    %c0_98 = arith.constant 0 : index
    %c0_99 = arith.constant 0 : index
    %199 = vector.load %arg11[%c0_97, %c0_98, %c0_99] : memref<2x32x64xf32, #tpu.memory_space<vmem>>, vector<1x32x64xf32>
    %200 = vector.shape_cast %199 : vector<1x32x64xf32> to vector<32x64xf32>
    %cst_100 = arith.constant dense<0.000000e+00> : vector<8x64xf32>
    %201 = tpu.matmul %198, %200, %cst_100 {dimension_numbers = #tpu.dot_dimension_numbers<[1], [0], [0], [1], [0, 0, 1, 1], [], []>} : vector<8x32xf32>, vector<32x64xf32>, vector<8x64xf32> -> vector<8x64xf32>
    %c0_101 = arith.constant 0 : index
    %c0_102 = arith.constant 0 : index
    %c0_103 = arith.constant 0 : index
    %202 = vector.load %arg12[%c0_101, %c0_102, %c0_103] : memref<2x1x64xf32, #tpu.memory_space<vmem>>, vector<1x1x64xf32>
    %203 = vector.shape_cast %202 : vector<1x1x64xf32> to vector<1x64xf32>
    %204 = vector.broadcast %203 : vector<1x64xf32> to vector<8x64xf32>
    %205 = arith.addf %201, %204 : vector<8x64xf32>
    %cst_104 = arith.constant 0.000000e+00 : f32
    %206 = vector.broadcast %cst_104 : f32 to vector<8x64xf32>
    %207 = arith.maximumf %205, %206 : vector<8x64xf32>
    %c0_105 = arith.constant 0 : index
    %c0_106 = arith.constant 0 : index
    %c0_107 = arith.constant 0 : index
    %208 = vector.load %arg13[%c0_105, %c0_106, %c0_107] : memref<2x64x32xf32, #tpu.memory_space<vmem>>, vector<1x64x32xf32>
    %209 = vector.shape_cast %208 : vector<1x64x32xf32> to vector<64x32xf32>
    %cst_108 = arith.constant dense<0.000000e+00> : vector<8x32xf32>
    %210 = tpu.matmul %207, %209, %cst_108 {dimension_numbers = #tpu.dot_dimension_numbers<[1], [0], [0], [1], [0, 0, 1, 1], [], []>} : vector<8x64xf32>, vector<64x32xf32>, vector<8x32xf32> -> vector<8x32xf32>
    %211 = arith.addf %174, %210 : vector<8x32xf32>
    %c0_109 = arith.constant 0 : index
    %c0_110 = arith.constant 0 : index
    %c0_111 = arith.constant 0 : index
    %212 = vector.load %arg14[%c0_109, %c0_110, %c0_111] : memref<2x1x32xf32, #tpu.memory_space<vmem>>, vector<1x1x32xf32>
    %213 = vector.shape_cast %212 : vector<1x1x32xf32> to vector<1x32xf32>
    %214 = vector.broadcast %213 : vector<1x32xf32> to vector<8x32xf32>
    %215 = arith.addf %211, %214 : vector<8x32xf32>
    %c3_112 = arith.constant 3 : index
    %c0_113 = arith.constant 0 : index
    %216 = vector.load %arg5[%c3_112, %c0_113] : memref<7x32xf32, #tpu.memory_space<vmem>>, vector<1x32xf32>
    %c3_114 = arith.constant 3 : index
    %c0_115 = arith.constant 0 : index
    %217 = vector.load %arg6[%c3_114, %c0_115] : memref<7x32xf32, #tpu.memory_space<vmem>>, vector<1x32xf32>
    %cst_116 = arith.constant dense<0.000000e+00> : vector<8xf32>
    %218 = vector.multi_reduction <add>, %215, %cst_116 [1] : vector<8x32xf32> to vector<8xf32>
    %219 = vector.shape_cast %218 : vector<8xf32> to vector<8x1xf32>
    %cst_117 = arith.constant 3.200000e+01 : f32
    %220 = vector.broadcast %cst_117 : f32 to vector<8x1xf32>
    %221 = arith.divf %219, %220 : vector<8x1xf32>
    %222 = vector.broadcast %221 : vector<8x1xf32> to vector<8x32xf32>
    %223 = arith.subf %215, %222 : vector<8x32xf32>
    %224 = arith.mulf %223, %223 : vector<8x32xf32>
    %cst_118 = arith.constant dense<0.000000e+00> : vector<8xf32>
    %225 = vector.multi_reduction <add>, %224, %cst_118 [1] : vector<8x32xf32> to vector<8xf32>
    %226 = vector.shape_cast %225 : vector<8xf32> to vector<8x1xf32>
    %cst_119 = arith.constant 0.0322580636 : f32
    %227 = vector.broadcast %cst_119 : f32 to vector<8x1xf32>
    %228 = arith.mulf %226, %227 : vector<8x1xf32>
    %229 = vector.broadcast %221 : vector<8x1xf32> to vector<8x32xf32>
    %230 = arith.subf %215, %229 : vector<8x32xf32>
    %231 = vector.broadcast %216 : vector<1x32xf32> to vector<8x32xf32>
    %232 = arith.mulf %231, %230 : vector<8x32xf32>
    %233 = math.sqrt %228 : vector<8x1xf32>
    %cst_120 = arith.constant 9.99999997E-7 : f32
    %234 = vector.broadcast %cst_120 : f32 to vector<8x1xf32>
    %235 = arith.addf %233, %234 : vector<8x1xf32>
    %236 = vector.broadcast %235 : vector<8x1xf32> to vector<8x32xf32>
    %237 = arith.divf %232, %236 : vector<8x32xf32>
    %238 = vector.broadcast %217 : vector<1x32xf32> to vector<8x32xf32>
    %239 = arith.addf %237, %238 : vector<8x32xf32>
    %240 = vector.shape_cast %239 : vector<8x32xf32> to vector<1x8x32xf32>
    %241 = vector.shape_cast %240 : vector<1x8x32xf32> to vector<1x8x32xf32>
    %242 = vector.broadcast %241 : vector<1x8x32xf32> to vector<12x8x32xf32>
    %c24 = arith.constant 24 : index
    %c0_121 = arith.constant 0 : index
    %c0_122 = arith.constant 0 : index
    %243 = vector.load %arg7[%c24, %c0_121, %c0_122] : memref<48x8x32xf32, #tpu.memory_space<vmem>>, vector<12x8x32xf32>
    "tpu.trace_start"() <{level = 10 : i32, message = "htd,hkd->htk"}> : () -> ()
    %cst_123 = arith.constant dense<0.000000e+00> : vector<12x8x8xf32>
    %244 = tpu.matmul %242, %243, %cst_123 {dimension_numbers = #tpu.dot_dimension_numbers<[2], [2], [1], [1], [0, 0, 0, 1, 1, 1], [0], [0]>} : vector<12x8x32xf32>, vector<12x8x32xf32>, vector<12x8x8xf32> -> vector<12x8x8xf32>
    "tpu.trace_stop"() : () -> ()
    %c24_124 = arith.constant 24 : index
    %c0_125 = arith.constant 0 : index
    %c0_126 = arith.constant 0 : index
    %245 = vector.load %arg8[%c24_124, %c0_125, %c0_126] : memref<48x1x8xf32, #tpu.memory_space<vmem>>, vector<12x1x8xf32>
    %246 = vector.broadcast %245 : vector<12x1x8xf32> to vector<12x8x8xf32>
    %247 = arith.addf %244, %246 : vector<12x8x8xf32>
    %248 = vector.extract_strided_slice %247 {offsets = [0, 0, 0], sizes = [4, 8, 8], strides = [1, 1, 1]} : vector<12x8x8xf32> to vector<4x8x8xf32>
    %249 = vector.extract_strided_slice %247 {offsets = [4, 0, 0], sizes = [4, 8, 8], strides = [1, 1, 1]} : vector<12x8x8xf32> to vector<4x8x8xf32>
    %250 = vector.extract_strided_slice %247 {offsets = [8, 0, 0], sizes = [4, 8, 8], strides = [1, 1, 1]} : vector<12x8x8xf32> to vector<4x8x8xf32>
    "tpu.trace_start"() <{level = 10 : i32, message = "hqd,hkd->hqk"}> : () -> ()
    %cst_127 = arith.constant dense<0.000000e+00> : vector<4x8x8xf32>
    %251 = tpu.matmul %248, %249, %cst_127 {dimension_numbers = #tpu.dot_dimension_numbers<[2], [2], [1], [1], [0, 0, 0, 1, 1, 1], [0], [0]>} : vector<4x8x8xf32>, vector<4x8x8xf32>, vector<4x8x8xf32> -> vector<4x8x8xf32>
    "tpu.trace_stop"() : () -> ()
    %cst_128 = arith.constant 0.353553385 : f32
    %252 = vector.broadcast %cst_128 : f32 to vector<4x8x8xf32>
    %253 = arith.mulf %251, %252 : vector<4x8x8xf32>
    %254 = vector.shape_cast %5 : vector<8x8xf32> to vector<1x8x8xf32>
    %255 = vector.broadcast %254 : vector<1x8x8xf32> to vector<4x8x8xf32>
    %256 = arith.addf %253, %255 : vector<4x8x8xf32>
    %cst_129 = arith.constant dense<0xFF800000> : vector<4x8xf32>
    %257 = vector.multi_reduction <maximumf>, %256, %cst_129 [2] : vector<4x8x8xf32> to vector<4x8xf32>
    %258 = vector.shape_cast %257 : vector<4x8xf32> to vector<4x8x1xf32>
    %259 = vector.broadcast %258 : vector<4x8x1xf32> to vector<4x8x8xf32>
    %260 = arith.subf %256, %259 : vector<4x8x8xf32>
    %261 = math.exp %260 : vector<4x8x8xf32>
    %cst_130 = arith.constant dense<0.000000e+00> : vector<4x8xf32>
    %262 = vector.multi_reduction <add>, %261, %cst_130 [2] : vector<4x8x8xf32> to vector<4x8xf32>
    %263 = vector.shape_cast %262 : vector<4x8xf32> to vector<4x8x1xf32>
    %264 = vector.broadcast %263 : vector<4x8x1xf32> to vector<4x8x8xf32>
    %265 = arith.divf %261, %264 : vector<4x8x8xf32>
    "tpu.trace_start"() <{level = 10 : i32, message = "hqk,hkd->hqd"}> : () -> ()
    %cst_131 = arith.constant dense<0.000000e+00> : vector<4x8x8xf32>
    %266 = tpu.matmul %265, %250, %cst_131 {dimension_numbers = #tpu.dot_dimension_numbers<[2], [1], [1], [2], [0, 0, 0, 1, 1, 2], [0], [0]>} : vector<4x8x8xf32>, vector<4x8x8xf32>, vector<4x8x8xf32> -> vector<4x8x8xf32>
    %cst_132 = arith.constant 0.000000e+00 : f32
    "tpu.trace_stop"() : () -> ()
    %267 = vector.broadcast %cst_132 : f32 to vector<8x32xf32>
    %268 = vector.extract_strided_slice %266 {offsets = [0, 0, 0], sizes = [1, 8, 8], strides = [1, 1, 1]} : vector<4x8x8xf32> to vector<1x8x8xf32>
    %269 = vector.shape_cast %268 : vector<1x8x8xf32> to vector<8x8xf32>
    %c8 = arith.constant 8 : index
    %c0_133 = arith.constant 0 : index
    %c0_134 = arith.constant 0 : index
    %270 = vector.load %arg9[%c8, %c0_133, %c0_134] : memref<16x8x32xf32, #tpu.memory_space<vmem>>, vector<1x8x32xf32>
    %271 = vector.shape_cast %270 : vector<1x8x32xf32> to vector<8x32xf32>
    %cst_135 = arith.constant dense<0.000000e+00> : vector<8x32xf32>
    %272 = tpu.matmul %269, %271, %cst_135 {dimension_numbers = #tpu.dot_dimension_numbers<[1], [0], [0], [1], [0, 0, 1, 1], [], []>} : vector<8x8xf32>, vector<8x32xf32>, vector<8x32xf32> -> vector<8x32xf32>
    %273 = arith.addf %267, %272 : vector<8x32xf32>
    %274 = vector.extract_strided_slice %266 {offsets = [1, 0, 0], sizes = [1, 8, 8], strides = [1, 1, 1]} : vector<4x8x8xf32> to vector<1x8x8xf32>
    %275 = vector.shape_cast %274 : vector<1x8x8xf32> to vector<8x8xf32>
    %c9 = arith.constant 9 : index
    %c0_136 = arith.constant 0 : index
    %c0_137 = arith.constant 0 : index
    %276 = vector.load %arg9[%c9, %c0_136, %c0_137] : memref<16x8x32xf32, #tpu.memory_space<vmem>>, vector<1x8x32xf32>
    %277 = vector.shape_cast %276 : vector<1x8x32xf32> to vector<8x32xf32>
    %cst_138 = arith.constant dense<0.000000e+00> : vector<8x32xf32>
    %278 = tpu.matmul %275, %277, %cst_138 {dimension_numbers = #tpu.dot_dimension_numbers<[1], [0], [0], [1], [0, 0, 1, 1], [], []>} : vector<8x8xf32>, vector<8x32xf32>, vector<8x32xf32> -> vector<8x32xf32>
    %279 = arith.addf %273, %278 : vector<8x32xf32>
    %280 = vector.extract_strided_slice %266 {offsets = [2, 0, 0], sizes = [1, 8, 8], strides = [1, 1, 1]} : vector<4x8x8xf32> to vector<1x8x8xf32>
    %281 = vector.shape_cast %280 : vector<1x8x8xf32> to vector<8x8xf32>
    %c10 = arith.constant 10 : index
    %c0_139 = arith.constant 0 : index
    %c0_140 = arith.constant 0 : index
    %282 = vector.load %arg9[%c10, %c0_139, %c0_140] : memref<16x8x32xf32, #tpu.memory_space<vmem>>, vector<1x8x32xf32>
    %283 = vector.shape_cast %282 : vector<1x8x32xf32> to vector<8x32xf32>
    %cst_141 = arith.constant dense<0.000000e+00> : vector<8x32xf32>
    %284 = tpu.matmul %281, %283, %cst_141 {dimension_numbers = #tpu.dot_dimension_numbers<[1], [0], [0], [1], [0, 0, 1, 1], [], []>} : vector<8x8xf32>, vector<8x32xf32>, vector<8x32xf32> -> vector<8x32xf32>
    %285 = arith.addf %279, %284 : vector<8x32xf32>
    %286 = vector.extract_strided_slice %266 {offsets = [3, 0, 0], sizes = [1, 8, 8], strides = [1, 1, 1]} : vector<4x8x8xf32> to vector<1x8x8xf32>
    %287 = vector.shape_cast %286 : vector<1x8x8xf32> to vector<8x8xf32>
    %c11 = arith.constant 11 : index
    %c0_142 = arith.constant 0 : index
    %c0_143 = arith.constant 0 : index
    %288 = vector.load %arg9[%c11, %c0_142, %c0_143] : memref<16x8x32xf32, #tpu.memory_space<vmem>>, vector<1x8x32xf32>
    %289 = vector.shape_cast %288 : vector<1x8x32xf32> to vector<8x32xf32>
    %cst_144 = arith.constant dense<0.000000e+00> : vector<8x32xf32>
    %290 = tpu.matmul %287, %289, %cst_144 {dimension_numbers = #tpu.dot_dimension_numbers<[1], [0], [0], [1], [0, 0, 1, 1], [], []>} : vector<8x8xf32>, vector<8x32xf32>, vector<8x32xf32> -> vector<8x32xf32>
    %291 = arith.addf %285, %290 : vector<8x32xf32>
    %c2_145 = arith.constant 2 : index
    %c0_146 = arith.constant 0 : index
    %292 = vector.load %arg10[%c2_145, %c0_146] : memref<4x32xf32, #tpu.memory_space<vmem>>, vector<1x32xf32>
    %293 = vector.broadcast %292 : vector<1x32xf32> to vector<8x32xf32>
    %294 = arith.addf %291, %293 : vector<8x32xf32>
    %295 = arith.addf %215, %294 : vector<8x32xf32>
    %c4_147 = arith.constant 4 : index
    %c0_148 = arith.constant 0 : index
    %296 = vector.load %arg5[%c4_147, %c0_148] : memref<7x32xf32, #tpu.memory_space<vmem>>, vector<1x32xf32>
    %c4_149 = arith.constant 4 : index
    %c0_150 = arith.constant 0 : index
    %297 = vector.load %arg6[%c4_149, %c0_150] : memref<7x32xf32, #tpu.memory_space<vmem>>, vector<1x32xf32>
    %cst_151 = arith.constant dense<0.000000e+00> : vector<8xf32>
    %298 = vector.multi_reduction <add>, %295, %cst_151 [1] : vector<8x32xf32> to vector<8xf32>
    %299 = vector.shape_cast %298 : vector<8xf32> to vector<8x1xf32>
    %cst_152 = arith.constant 3.200000e+01 : f32
    %300 = vector.broadcast %cst_152 : f32 to vector<8x1xf32>
    %301 = arith.divf %299, %300 : vector<8x1xf32>
    %302 = vector.broadcast %301 : vector<8x1xf32> to vector<8x32xf32>
    %303 = arith.subf %295, %302 : vector<8x32xf32>
    %304 = arith.mulf %303, %303 : vector<8x32xf32>
    %cst_153 = arith.constant dense<0.000000e+00> : vector<8xf32>
    %305 = vector.multi_reduction <add>, %304, %cst_153 [1] : vector<8x32xf32> to vector<8xf32>
    %306 = vector.shape_cast %305 : vector<8xf32> to vector<8x1xf32>
    %cst_154 = arith.constant 0.0322580636 : f32
    %307 = vector.broadcast %cst_154 : f32 to vector<8x1xf32>
    %308 = arith.mulf %306, %307 : vector<8x1xf32>
    %309 = vector.broadcast %301 : vector<8x1xf32> to vector<8x32xf32>
    %310 = arith.subf %295, %309 : vector<8x32xf32>
    %311 = vector.broadcast %296 : vector<1x32xf32> to vector<8x32xf32>
    %312 = arith.mulf %311, %310 : vector<8x32xf32>
    %313 = math.sqrt %308 : vector<8x1xf32>
    %cst_155 = arith.constant 9.99999997E-7 : f32
    %314 = vector.broadcast %cst_155 : f32 to vector<8x1xf32>
    %315 = arith.addf %313, %314 : vector<8x1xf32>
    %316 = vector.broadcast %315 : vector<8x1xf32> to vector<8x32xf32>
    %317 = arith.divf %312, %316 : vector<8x32xf32>
    %318 = vector.broadcast %297 : vector<1x32xf32> to vector<8x32xf32>
    %319 = arith.addf %317, %318 : vector<8x32xf32>
    %320 = vector.shape_cast %319 : vector<8x32xf32> to vector<1x8x32xf32>
    %321 = vector.shape_cast %320 : vector<1x8x32xf32> to vector<1x8x32xf32>
    %322 = vector.broadcast %321 : vector<1x8x32xf32> to vector<4x8x32xf32>
    %323 = vector.shape_cast %3 : vector<8x32xf32> to vector<1x8x32xf32>
    %324 = vector.shape_cast %323 : vector<1x8x32xf32> to vector<1x8x32xf32>
    %325 = vector.broadcast %324 : vector<1x8x32xf32> to vector<8x8x32xf32>
    %c36 = arith.constant 36 : index
    %c0_156 = arith.constant 0 : index
    %c0_157 = arith.constant 0 : index
    %326 = vector.load %arg7[%c36, %c0_156, %c0_157] : memref<48x8x32xf32, #tpu.memory_space<vmem>>, vector<4x8x32xf32>
    "tpu.trace_start"() <{level = 10 : i32, message = "htd,hkd->htk"}> : () -> ()
    %cst_158 = arith.constant dense<0.000000e+00> : vector<4x8x8xf32>
    %327 = tpu.matmul %322, %326, %cst_158 {dimension_numbers = #tpu.dot_dimension_numbers<[2], [2], [1], [1], [0, 0, 0, 1, 1, 1], [0], [0]>} : vector<4x8x32xf32>, vector<4x8x32xf32>, vector<4x8x8xf32> -> vector<4x8x8xf32>
    "tpu.trace_stop"() : () -> ()
    %c36_159 = arith.constant 36 : index
    %c0_160 = arith.constant 0 : index
    %c0_161 = arith.constant 0 : index
    %328 = vector.load %arg8[%c36_159, %c0_160, %c0_161] : memref<48x1x8xf32, #tpu.memory_space<vmem>>, vector<4x1x8xf32>
    %329 = vector.broadcast %328 : vector<4x1x8xf32> to vector<4x8x8xf32>
    %330 = arith.addf %327, %329 : vector<4x8x8xf32>
    %c40 = arith.constant 40 : index
    %c0_162 = arith.constant 0 : index
    %c0_163 = arith.constant 0 : index
    %331 = vector.load %arg7[%c40, %c0_162, %c0_163] : memref<48x8x32xf32, #tpu.memory_space<vmem>>, vector<8x8x32xf32>
    "tpu.trace_start"() <{level = 10 : i32, message = "hsd,hkd->hsk"}> : () -> ()
    %cst_164 = arith.constant dense<0.000000e+00> : vector<8x8x8xf32>
    %332 = tpu.matmul %325, %331, %cst_164 {dimension_numbers = #tpu.dot_dimension_numbers<[2], [2], [1], [1], [0, 0, 0, 1, 1, 1], [0], [0]>} : vector<8x8x32xf32>, vector<8x8x32xf32>, vector<8x8x8xf32> -> vector<8x8x8xf32>
    "tpu.trace_stop"() : () -> ()
    %c40_165 = arith.constant 40 : index
    %c0_166 = arith.constant 0 : index
    %c0_167 = arith.constant 0 : index
    %333 = vector.load %arg8[%c40_165, %c0_166, %c0_167] : memref<48x1x8xf32, #tpu.memory_space<vmem>>, vector<8x1x8xf32>
    %334 = vector.broadcast %333 : vector<8x1x8xf32> to vector<8x8x8xf32>
    %335 = arith.addf %332, %334 : vector<8x8x8xf32>
    %336 = vector.extract_strided_slice %335 {offsets = [0, 0, 0], sizes = [4, 8, 8], strides = [1, 1, 1]} : vector<8x8x8xf32> to vector<4x8x8xf32>
    %337 = vector.extract_strided_slice %335 {offsets = [4, 0, 0], sizes = [4, 8, 8], strides = [1, 1, 1]} : vector<8x8x8xf32> to vector<4x8x8xf32>
    "tpu.trace_start"() <{level = 10 : i32, message = "hqd,hkd->hqk"}> : () -> ()
    %cst_168 = arith.constant dense<0.000000e+00> : vector<4x8x8xf32>
    %338 = tpu.matmul %330, %336, %cst_168 {dimension_numbers = #tpu.dot_dimension_numbers<[2], [2], [1], [1], [0, 0, 0, 1, 1, 1], [0], [0]>} : vector<4x8x8xf32>, vector<4x8x8xf32>, vector<4x8x8xf32> -> vector<4x8x8xf32>
    "tpu.trace_stop"() : () -> ()
    %cst_169 = arith.constant 0.353553385 : f32
    %339 = vector.broadcast %cst_169 : f32 to vector<4x8x8xf32>
    %340 = arith.mulf %338, %339 : vector<4x8x8xf32>
    %341 = vector.shape_cast %7 : vector<8x8xf32> to vector<1x8x8xf32>
    %342 = vector.broadcast %341 : vector<1x8x8xf32> to vector<4x8x8xf32>
    %343 = arith.addf %340, %342 : vector<4x8x8xf32>
    %cst_170 = arith.constant dense<0xFF800000> : vector<4x8xf32>
    %344 = vector.multi_reduction <maximumf>, %343, %cst_170 [2] : vector<4x8x8xf32> to vector<4x8xf32>
    %345 = vector.shape_cast %344 : vector<4x8xf32> to vector<4x8x1xf32>
    %346 = vector.broadcast %345 : vector<4x8x1xf32> to vector<4x8x8xf32>
    %347 = arith.subf %343, %346 : vector<4x8x8xf32>
    %348 = math.exp %347 : vector<4x8x8xf32>
    %cst_171 = arith.constant dense<0.000000e+00> : vector<4x8xf32>
    %349 = vector.multi_reduction <add>, %348, %cst_171 [2] : vector<4x8x8xf32> to vector<4x8xf32>
    %350 = vector.shape_cast %349 : vector<4x8xf32> to vector<4x8x1xf32>
    %351 = vector.broadcast %350 : vector<4x8x1xf32> to vector<4x8x8xf32>
    %352 = arith.divf %348, %351 : vector<4x8x8xf32>
    "tpu.trace_start"() <{level = 10 : i32, message = "hqk,hkd->hqd"}> : () -> ()
    %cst_172 = arith.constant dense<0.000000e+00> : vector<4x8x8xf32>
    %353 = tpu.matmul %352, %337, %cst_172 {dimension_numbers = #tpu.dot_dimension_numbers<[2], [1], [1], [2], [0, 0, 0, 1, 1, 2], [0], [0]>} : vector<4x8x8xf32>, vector<4x8x8xf32>, vector<4x8x8xf32> -> vector<4x8x8xf32>
    %cst_173 = arith.constant 0.000000e+00 : f32
    "tpu.trace_stop"() : () -> ()
    %354 = vector.broadcast %cst_173 : f32 to vector<8x32xf32>
    %355 = vector.extract_strided_slice %353 {offsets = [0, 0, 0], sizes = [1, 8, 8], strides = [1, 1, 1]} : vector<4x8x8xf32> to vector<1x8x8xf32>
    %356 = vector.shape_cast %355 : vector<1x8x8xf32> to vector<8x8xf32>
    %c12_174 = arith.constant 12 : index
    %c0_175 = arith.constant 0 : index
    %c0_176 = arith.constant 0 : index
    %357 = vector.load %arg9[%c12_174, %c0_175, %c0_176] : memref<16x8x32xf32, #tpu.memory_space<vmem>>, vector<1x8x32xf32>
    %358 = vector.shape_cast %357 : vector<1x8x32xf32> to vector<8x32xf32>
    %cst_177 = arith.constant dense<0.000000e+00> : vector<8x32xf32>
    %359 = tpu.matmul %356, %358, %cst_177 {dimension_numbers = #tpu.dot_dimension_numbers<[1], [0], [0], [1], [0, 0, 1, 1], [], []>} : vector<8x8xf32>, vector<8x32xf32>, vector<8x32xf32> -> vector<8x32xf32>
    %360 = arith.addf %354, %359 : vector<8x32xf32>
    %361 = vector.extract_strided_slice %353 {offsets = [1, 0, 0], sizes = [1, 8, 8], strides = [1, 1, 1]} : vector<4x8x8xf32> to vector<1x8x8xf32>
    %362 = vector.shape_cast %361 : vector<1x8x8xf32> to vector<8x8xf32>
    %c13 = arith.constant 13 : index
    %c0_178 = arith.constant 0 : index
    %c0_179 = arith.constant 0 : index
    %363 = vector.load %arg9[%c13, %c0_178, %c0_179] : memref<16x8x32xf32, #tpu.memory_space<vmem>>, vector<1x8x32xf32>
    %364 = vector.shape_cast %363 : vector<1x8x32xf32> to vector<8x32xf32>
    %cst_180 = arith.constant dense<0.000000e+00> : vector<8x32xf32>
    %365 = tpu.matmul %362, %364, %cst_180 {dimension_numbers = #tpu.dot_dimension_numbers<[1], [0], [0], [1], [0, 0, 1, 1], [], []>} : vector<8x8xf32>, vector<8x32xf32>, vector<8x32xf32> -> vector<8x32xf32>
    %366 = arith.addf %360, %365 : vector<8x32xf32>
    %367 = vector.extract_strided_slice %353 {offsets = [2, 0, 0], sizes = [1, 8, 8], strides = [1, 1, 1]} : vector<4x8x8xf32> to vector<1x8x8xf32>
    %368 = vector.shape_cast %367 : vector<1x8x8xf32> to vector<8x8xf32>
    %c14 = arith.constant 14 : index
    %c0_181 = arith.constant 0 : index
    %c0_182 = arith.constant 0 : index
    %369 = vector.load %arg9[%c14, %c0_181, %c0_182] : memref<16x8x32xf32, #tpu.memory_space<vmem>>, vector<1x8x32xf32>
    %370 = vector.shape_cast %369 : vector<1x8x32xf32> to vector<8x32xf32>
    %cst_183 = arith.constant dense<0.000000e+00> : vector<8x32xf32>
    %371 = tpu.matmul %368, %370, %cst_183 {dimension_numbers = #tpu.dot_dimension_numbers<[1], [0], [0], [1], [0, 0, 1, 1], [], []>} : vector<8x8xf32>, vector<8x32xf32>, vector<8x32xf32> -> vector<8x32xf32>
    %372 = arith.addf %366, %371 : vector<8x32xf32>
    %373 = vector.extract_strided_slice %353 {offsets = [3, 0, 0], sizes = [1, 8, 8], strides = [1, 1, 1]} : vector<4x8x8xf32> to vector<1x8x8xf32>
    %374 = vector.shape_cast %373 : vector<1x8x8xf32> to vector<8x8xf32>
    %c15 = arith.constant 15 : index
    %c0_184 = arith.constant 0 : index
    %c0_185 = arith.constant 0 : index
    %375 = vector.load %arg9[%c15, %c0_184, %c0_185] : memref<16x8x32xf32, #tpu.memory_space<vmem>>, vector<1x8x32xf32>
    %376 = vector.shape_cast %375 : vector<1x8x32xf32> to vector<8x32xf32>
    %cst_186 = arith.constant dense<0.000000e+00> : vector<8x32xf32>
    %377 = tpu.matmul %374, %376, %cst_186 {dimension_numbers = #tpu.dot_dimension_numbers<[1], [0], [0], [1], [0, 0, 1, 1], [], []>} : vector<8x8xf32>, vector<8x32xf32>, vector<8x32xf32> -> vector<8x32xf32>
    %378 = arith.addf %372, %377 : vector<8x32xf32>
    %c3_187 = arith.constant 3 : index
    %c0_188 = arith.constant 0 : index
    %379 = vector.load %arg10[%c3_187, %c0_188] : memref<4x32xf32, #tpu.memory_space<vmem>>, vector<1x32xf32>
    %380 = vector.broadcast %379 : vector<1x32xf32> to vector<8x32xf32>
    %381 = arith.addf %378, %380 : vector<8x32xf32>
    %382 = arith.addf %295, %381 : vector<8x32xf32>
    %c5_189 = arith.constant 5 : index
    %c0_190 = arith.constant 0 : index
    %383 = vector.load %arg5[%c5_189, %c0_190] : memref<7x32xf32, #tpu.memory_space<vmem>>, vector<1x32xf32>
    %c5_191 = arith.constant 5 : index
    %c0_192 = arith.constant 0 : index
    %384 = vector.load %arg6[%c5_191, %c0_192] : memref<7x32xf32, #tpu.memory_space<vmem>>, vector<1x32xf32>
    %cst_193 = arith.constant dense<0.000000e+00> : vector<8xf32>
    %385 = vector.multi_reduction <add>, %382, %cst_193 [1] : vector<8x32xf32> to vector<8xf32>
    %386 = vector.shape_cast %385 : vector<8xf32> to vector<8x1xf32>
    %cst_194 = arith.constant 3.200000e+01 : f32
    %387 = vector.broadcast %cst_194 : f32 to vector<8x1xf32>
    %388 = arith.divf %386, %387 : vector<8x1xf32>
    %389 = vector.broadcast %388 : vector<8x1xf32> to vector<8x32xf32>
    %390 = arith.subf %382, %389 : vector<8x32xf32>
    %391 = arith.mulf %390, %390 : vector<8x32xf32>
    %cst_195 = arith.constant dense<0.000000e+00> : vector<8xf32>
    %392 = vector.multi_reduction <add>, %391, %cst_195 [1] : vector<8x32xf32> to vector<8xf32>
    %393 = vector.shape_cast %392 : vector<8xf32> to vector<8x1xf32>
    %cst_196 = arith.constant 0.0322580636 : f32
    %394 = vector.broadcast %cst_196 : f32 to vector<8x1xf32>
    %395 = arith.mulf %393, %394 : vector<8x1xf32>
    %396 = vector.broadcast %388 : vector<8x1xf32> to vector<8x32xf32>
    %397 = arith.subf %382, %396 : vector<8x32xf32>
    %398 = vector.broadcast %383 : vector<1x32xf32> to vector<8x32xf32>
    %399 = arith.mulf %398, %397 : vector<8x32xf32>
    %400 = math.sqrt %395 : vector<8x1xf32>
    %cst_197 = arith.constant 9.99999997E-7 : f32
    %401 = vector.broadcast %cst_197 : f32 to vector<8x1xf32>
    %402 = arith.addf %400, %401 : vector<8x1xf32>
    %403 = vector.broadcast %402 : vector<8x1xf32> to vector<8x32xf32>
    %404 = arith.divf %399, %403 : vector<8x32xf32>
    %405 = vector.broadcast %384 : vector<1x32xf32> to vector<8x32xf32>
    %406 = arith.addf %404, %405 : vector<8x32xf32>
    %c1_198 = arith.constant 1 : index
    %c0_199 = arith.constant 0 : index
    %c0_200 = arith.constant 0 : index
    %407 = vector.load %arg11[%c1_198, %c0_199, %c0_200] : memref<2x32x64xf32, #tpu.memory_space<vmem>>, vector<1x32x64xf32>
    %408 = vector.shape_cast %407 : vector<1x32x64xf32> to vector<32x64xf32>
    %cst_201 = arith.constant dense<0.000000e+00> : vector<8x64xf32>
    %409 = tpu.matmul %406, %408, %cst_201 {dimension_numbers = #tpu.dot_dimension_numbers<[1], [0], [0], [1], [0, 0, 1, 1], [], []>} : vector<8x32xf32>, vector<32x64xf32>, vector<8x64xf32> -> vector<8x64xf32>
    %c1_202 = arith.constant 1 : index
    %c0_203 = arith.constant 0 : index
    %c0_204 = arith.constant 0 : index
    %410 = vector.load %arg12[%c1_202, %c0_203, %c0_204] : memref<2x1x64xf32, #tpu.memory_space<vmem>>, vector<1x1x64xf32>
    %411 = vector.shape_cast %410 : vector<1x1x64xf32> to vector<1x64xf32>
    %412 = vector.broadcast %411 : vector<1x64xf32> to vector<8x64xf32>
    %413 = arith.addf %409, %412 : vector<8x64xf32>
    %cst_205 = arith.constant 0.000000e+00 : f32
    %414 = vector.broadcast %cst_205 : f32 to vector<8x64xf32>
    %415 = arith.maximumf %413, %414 : vector<8x64xf32>
    %c1_206 = arith.constant 1 : index
    %c0_207 = arith.constant 0 : index
    %c0_208 = arith.constant 0 : index
    %416 = vector.load %arg13[%c1_206, %c0_207, %c0_208] : memref<2x64x32xf32, #tpu.memory_space<vmem>>, vector<1x64x32xf32>
    %417 = vector.shape_cast %416 : vector<1x64x32xf32> to vector<64x32xf32>
    %cst_209 = arith.constant dense<0.000000e+00> : vector<8x32xf32>
    %418 = tpu.matmul %415, %417, %cst_209 {dimension_numbers = #tpu.dot_dimension_numbers<[1], [0], [0], [1], [0, 0, 1, 1], [], []>} : vector<8x64xf32>, vector<64x32xf32>, vector<8x32xf32> -> vector<8x32xf32>
    %419 = arith.addf %382, %418 : vector<8x32xf32>
    %c1_210 = arith.constant 1 : index
    %c0_211 = arith.constant 0 : index
    %c0_212 = arith.constant 0 : index
    %420 = vector.load %arg14[%c1_210, %c0_211, %c0_212] : memref<2x1x32xf32, #tpu.memory_space<vmem>>, vector<1x1x32xf32>
    %421 = vector.shape_cast %420 : vector<1x1x32xf32> to vector<1x32xf32>
    %422 = vector.broadcast %421 : vector<1x32xf32> to vector<8x32xf32>
    %423 = arith.addf %419, %422 : vector<8x32xf32>
    %c6_213 = arith.constant 6 : index
    %c0_214 = arith.constant 0 : index
    %424 = vector.load %arg5[%c6_213, %c0_214] : memref<7x32xf32, #tpu.memory_space<vmem>>, vector<1x32xf32>
    %c6_215 = arith.constant 6 : index
    %c0_216 = arith.constant 0 : index
    %425 = vector.load %arg6[%c6_215, %c0_216] : memref<7x32xf32, #tpu.memory_space<vmem>>, vector<1x32xf32>
    %cst_217 = arith.constant dense<0.000000e+00> : vector<8xf32>
    %426 = vector.multi_reduction <add>, %423, %cst_217 [1] : vector<8x32xf32> to vector<8xf32>
    %427 = vector.shape_cast %426 : vector<8xf32> to vector<8x1xf32>
    %cst_218 = arith.constant 3.200000e+01 : f32
    %428 = vector.broadcast %cst_218 : f32 to vector<8x1xf32>
    %429 = arith.divf %427, %428 : vector<8x1xf32>
    %430 = vector.broadcast %429 : vector<8x1xf32> to vector<8x32xf32>
    %431 = arith.subf %423, %430 : vector<8x32xf32>
    %432 = arith.mulf %431, %431 : vector<8x32xf32>
    %cst_219 = arith.constant dense<0.000000e+00> : vector<8xf32>
    %433 = vector.multi_reduction <add>, %432, %cst_219 [1] : vector<8x32xf32> to vector<8xf32>
    %434 = vector.shape_cast %433 : vector<8xf32> to vector<8x1xf32>
    %cst_220 = arith.constant 0.0322580636 : f32
    %435 = vector.broadcast %cst_220 : f32 to vector<8x1xf32>
    %436 = arith.mulf %434, %435 : vector<8x1xf32>
    %437 = vector.broadcast %429 : vector<8x1xf32> to vector<8x32xf32>
    %438 = arith.subf %423, %437 : vector<8x32xf32>
    %439 = vector.broadcast %424 : vector<1x32xf32> to vector<8x32xf32>
    %440 = arith.mulf %439, %438 : vector<8x32xf32>
    %441 = math.sqrt %436 : vector<8x1xf32>
    %cst_221 = arith.constant 9.99999997E-7 : f32
    %442 = vector.broadcast %cst_221 : f32 to vector<8x1xf32>
    %443 = arith.addf %441, %442 : vector<8x1xf32>
    %444 = vector.broadcast %443 : vector<8x1xf32> to vector<8x32xf32>
    %445 = arith.divf %440, %444 : vector<8x32xf32>
    %446 = vector.broadcast %425 : vector<1x32xf32> to vector<8x32xf32>
    %447 = arith.addf %445, %446 : vector<8x32xf32>
    %c0_222 = arith.constant 0 : index
    %c0_223 = arith.constant 0 : index
    %c0_224 = arith.constant 0 : index
    %448 = vector.load %arg15[%c0_222, %c0_223, %c0_224] : memref<1x8x32xf32, #tpu.memory_space<vmem>>, vector<1x8x32xf32>
    %449 = vector.shape_cast %448 : vector<1x8x32xf32> to vector<8x32xf32>
    %450 = vector.shape_cast %447 : vector<8x32xf32> to vector<1x8x32xf32>
    tpu.vector_store %arg15[%c0_222, %c0_223, %c0_224], %450 {strides = array<i32>} : memref<1x8x32xf32, #tpu.memory_space<vmem>>, vector<1x8x32xf32>,
    return
  }
  func.func @transform_0(%arg0: i32) -> (i32, i32, i32) {
    %c0_i32 = arith.constant 0 : i32
    %c0_i32_0 = arith.constant 0 : i32
    %c0_i32_1 = arith.constant 0 : i32
    return %arg0, %c0_i32, %c0_i32_0 : i32, i32, i32
  }
  func.func @transform_1(%arg0: i32) -> (i32, i32, i32) {
    %c0_i32 = arith.constant 0 : i32
    %c0_i32_0 = arith.constant 0 : i32
    %c0_i32_1 = arith.constant 0 : i32
    return %arg0, %c0_i32, %c0_i32_0 : i32, i32, i32
  }
  func.func @transform_2(%arg0: i32) -> (i32, i32, i32) {
    %c0_i32 = arith.constant 0 : i32
    %c0_i32_0 = arith.constant 0 : i32
    %c0_i32_1 = arith.constant 0 : i32
    %c0_i32_2 = arith.constant 0 : i32
    return %c0_i32, %c0_i32_0, %c0_i32_1 : i32, i32, i32
  }
  func.func @transform_3(%arg0: i32) -> (i32, i32, i32) {
    %c0_i32 = arith.constant 0 : i32
    %c0_i32_0 = arith.constant 0 : i32
    %c0_i32_1 = arith.constant 0 : i32
    return %arg0, %c0_i32, %c0_i32_0 : i32, i32, i32
  }
  func.func @transform_4(%arg0: i32) -> (i32, i32) {
    %c0_i32 = arith.constant 0 : i32
    %c0_i32_0 = arith.constant 0 : i32
    %c0_i32_1 = arith.constant 0 : i32
    return %c0_i32, %c0_i32_0 : i32, i32
  }
  func.func @transform_5(%arg0: i32) -> (i32, i32) {
    %c0_i32 = arith.constant 0 : i32
    %c0_i32_0 = arith.constant 0 : i32
    %c0_i32_1 = arith.constant 0 : i32
    return %c0_i32, %c0_i32_0 : i32, i32
  }
  func.func @transform_6(%arg0: i32) -> (i32, i32, i32) {
    %c0_i32 = arith.constant 0 : i32
    %c0_i32_0 = arith.constant 0 : i32
    %c0_i32_1 = arith.constant 0 : i32
    %c0_i32_2 = arith.constant 0 : i32
    return %c0_i32, %c0_i32_0, %c0_i32_1 : i32, i32, i32
  }
  func.func @transform_7(%arg0: i32) -> (i32, i32, i32) {
    %c0_i32 = arith.constant 0 : i32
    %c0_i32_0 = arith.constant 0 : i32
    %c0_i32_1 = arith.constant 0 : i32
    %c0_i32_2 = arith.constant 0 : i32
    return %c0_i32, %c0_i32_0, %c0_i32_1 : i32, i32, i32
  }
  func.func @transform_8(%arg0: i32) -> (i32, i32, i32) {
    %c0_i32 = arith.constant 0 : i32
    %c0_i32_0 = arith.constant 0 : i32
    %c0_i32_1 = arith.constant 0 : i32
    %c0_i32_2 = arith.constant 0 : i32
    return %c0_i32, %c0_i32_0, %c0_i32_1 : i32, i32, i32
  }
  func.func @transform_9(%arg0: i32) -> (i32, i32) {
    %c0_i32 = arith.constant 0 : i32
    %c0_i32_0 = arith.constant 0 : i32
    %c0_i32_1 = arith.constant 0 : i32
    return %c0_i32, %c0_i32_0 : i32, i32
  }
  func.func @transform_10(%arg0: i32) -> (i32, i32, i32) {
    %c0_i32 = arith.constant 0 : i32
    %c0_i32_0 = arith.constant 0 : i32
    %c0_i32_1 = arith.constant 0 : i32
    %c0_i32_2 = arith.constant 0 : i32
    return %c0_i32, %c0_i32_0, %c0_i32_1 : i32, i32, i32
  }
  func.func @transform_11(%arg0: i32) -> (i32, i32, i32) {
    %c0_i32 = arith.constant 0 : i32
    %c0_i32_0 = arith.constant 0 : i32
    %c0_i32_1 = arith.constant 0 : i32
    %c0_i32_2 = arith.constant 0 : i32
    return %c0_i32, %c0_i32_0, %c0_i32_1 : i32, i32, i32
  }
  func.func @transform_12(%arg0: i32) -> (i32, i32, i32) {
    %c0_i32 = arith.constant 0 : i32
    %c0_i32_0 = arith.constant 0 : i32
    %c0_i32_1 = arith.constant 0 : i32
    %c0_i32_2 = arith.constant 0 : i32
    return %c0_i32, %c0_i32_0, %c0_i32_1 : i32, i32, i32
  }
  func.func @transform_13(%arg0: i32) -> (i32, i32, i32) {
    %c0_i32 = arith.constant 0 : i32
    %c0_i32_0 = arith.constant 0 : i32
    %c0_i32_1 = arith.constant 0 : i32
    %c0_i32_2 = arith.constant 0 : i32
    return %c0_i32, %c0_i32_0, %c0_i32_1 : i32, i32, i32
  }
  func.func @transform_14(%arg0: i32) -> (i32, i32, i32) {
    %c0_i32 = arith.constant 0 : i32
    %c0_i32_0 = arith.constant 0 : i32
    %c0_i32_1 = arith.constant 0 : i32
    return %arg0, %c0_i32, %c0_i32_0 : i32, i32, i32
  }
}

</mosaic_0001>

<bundles_post_ra>
// kernel: tpu_custom_call.1
= control target key start
LH: loop header
LB: loop body
LE: loop exit
PB: predicated region body
PF: predicated region fallthrough
CT: control target
= control target key end

     0   :  { %s11516_s0 = inlined_call_operand.vmem [shape: f32[2,8,32], index: 0, kind: input, shape index: {}]   ;;  %s11517_s1 = inlined_call_operand.vmem [shape: f32[2,8,32], index: 1, kind: input, shape index: {}]   ;;  %s11518_s2 = inlined_call_operand.vmem [shape: f32[1,8,8], index: 2, kind: input, shape index: {}]   ;;  %s11519_s3 = inlined_call_operand.vmem [shape: f32[2,8,8], index: 3, kind: input, shape index: {}]   ;;  %s11520_s4 = inlined_call_operand.vmem [shape: f32[7,32], index: 4, kind: input, shape index: {}]   ;;  %s11521_s5 = inlined_call_operand.vmem [shape: f32[7,32], index: 5, kind: input, shape index: {}]   ;;  %s11522_s6 = inlined_call_operand.vmem [shape: f32[48,8,32], index: 6, kind: input, shape index: {}]   ;;  %s11523_s7 = inlined_call_operand.vmem [shape: f32[48,1,8], index: 7, kind: input, shape index: {}]   ;;  %s11524_s8 = inlined_call_operand.vmem [shape: f32[16,8,32], index: 8, kind: input, shape index: {}]   ;;  %s11525_s9 = inlined_call_operand.vmem [shape: f32[4,32], index: 9, kind: input, shape index: {}]   ;;  %s11526_s10 = inlined_call_operand.vmem [shape: f32[2,32,64], index: 10, kind: input, shape index: {}]   ;;  %s11527_s11 = inlined_call_operand.vmem [shape: f32[2,1,64], index: 11, kind: input, shape index: {}]   ;;  %s11528_s12 = inlined_call_operand.vmem [shape: f32[2,64,32], index: 12, kind: input, shape index: {}]   ;;  %s11529_s13 = inlined_call_operand.vmem [shape: f32[2,1,32], index: 13, kind: input, shape index: {}]   ;;  %s11530_s14 = inlined_call_operand.hbm [shape: f32[2,8,32], index: 14, kind: output, shape index: {}]  }
   0x1   :  { %11531 = sst [smem:[#allocation6_spill]] %s11516_s0 }
   0x2   :  { %11532 = sst [smem:[#allocation7_spill]] %s11517_s1 }
   0x3   :  { %11533 = sst [smem:[#allocation8_spill]] %s11518_s2 }
   0x4   :  { %11534 = sst [smem:[#allocation9_spill]] %s11519_s3 }
   0x5   :  { %19 = vsyncpa [#allocation3], 0 }
   0x6   :  { %21 = vsyncpa [#allocation3 + $0x1], 0  ;;  %s10344_s29 = smov 0   ;;  %s10346_s30 = smov 0  }
   0x7   :  { %s10348_s15 = smov 0   ;;  %s10350_s16 = smov 0  }
   0x8 LB: > { %s10365_s17 = sadd.s32 4294967295, %s10263_s16   ;;  %s8921_s18 = sadd.s32 4294967294, %s10263_s16   ;;  %s10263_s16 = sphi %s10350_s16, %s11546_s16   ;;  %s10259_s15 = sphi %s10348_s15, %s11545_s15   ;;  %s10255_s30 = sphi %s10346_s30, %s11544_s30   ;;  %s10251_s29 = sphi %s10344_s29, %s11543_s29  }
   0x9   : > { %s10369_s19 = sadd.s32 1, %s10263_s16   ;;  %s343_s20 = sadd.s32 1, %s10259_s15 }
   0xa   : > { %s340_s21 = ssub.s32 %s10263_s16, %s10369_s19  ;;  %p353_p0 = scmp.ne.s32.totalorder %s10259_s15, %s10255_s30 }
   0xb   : > { %p341_p1 = scmp.eq.s32.totalorder %s340_s21, 0  ;;  %p354_p2 = scmp.eq.s32.totalorder %s10365_s17, 1 }
   0xc   : > { %p359_p3 = scmp.ne.s32.totalorder %s10255_s30, %s10251_s29  ;;  %p360_p4 = scmp.eq.s32.totalorder %s8921_s18, 1 }
   0xd   : > { %s10380_s22 = scalar_select %p341_p1, %s10259_s15, %s343_s20  }
   0xe   : > { %p10382_p5 = por %p354_p2, %p353_p0  ;;  %p10386_p6 = por %p360_p4, %p359_p3 }
   0xf   : > { %11535 = sst [smem:[#allocation5_spill]] %s10380_s22  ;;  %p8924_p7 = scmp.ge.s32.totalorder %s10263_s16, 1 }
  0x10   : > { %p432_p8 = scmp.lt.s32.totalorder %s10263_s16, 3 }
  0x12   : > { %p433_p9 = pnand %p8924_p7, %p432_p8 }
  0x13   : > { %p485_p10 = scmp.lt.s32.totalorder (!%p433_p9), %s10365_s17, 1  ;;  %vm503_vm0 = vcmask (!%p433_p9), 261120   ;;  %s11538_s0 = sld [smem:[#allocation6_spill]] (!%p433_p9)  ;;  %v10265_v7 = vmov (!%p433_p9), 0.0   ;;  %v535_v8 = vld [vmem:[%s11522_s6] sm:$0xff] (!%p433_p9)  ;;  %v538_v9 = vld [vmem:[%s11522_s6 + $0x18] sm:$0xff] (!%p433_p9) }
  0x14   : > { %436 = sbr.rel (%p433_p9) target bundleno = 7972 (0x1f24), region = 76  ;;  %9488 = vmatprep.subr.mxu0 (!%p433_p9), %v10265_v7  ;;  %9503 = vmatprep.subr.mxu1 (!%p433_p9), %v10265_v7  ;;  %vm10266_vm1 = vmmov (!%p433_p9), 0   ;;  %v8929_v18 = vld [vmem:[%s11520_s4] ss:$0 sm:$0xff] (!%p433_p9)  ;;  %v536_v24 = vld [vmem:[%s11522_s6 + $0x8] sm:$0xff] (!%p433_p9)  ;;  %v537_v26 = vld [vmem:[%s11522_s6 + $0x10] sm:$0xff] (!%p433_p9) }
  0x15   : > { %9489 = vmatpush3.xpose.msk.msra.mxu0 (!%p433_p9), %vm503_vm0, %v535_v8  ;;  %9504 = vmatpush3.xpose.msk.msra.mxu1 (!%p433_p9), %vm503_vm0, %v538_v9  ;;  %v8930_v21 = vld [vmem:[%s11521_s5] ss:$0 sm:$0xff] (!%p433_p9)  ;;  %v540_v25 = vld [vmem:[%s11522_s6 + $0x28] sm:$0xff] (!%p433_p9)  ;;  %v542_v27 = vld [vmem:[%s11522_s6 + $0x38] sm:$0xff] (!%p433_p9)  ;;  %vm1510_vm4 = vcmask (!%p433_p9), 64512   ;;  %s11539_s2 = sld [smem:[#allocation8_spill]] (!%p433_p9) }
  0x16   : > { %9493 = vmatprep.subr.mxu0 (!%p433_p9), %v10265_v7  ;;  %9513 = vmatprep.subr.mxu1 (!%p433_p9), %v10265_v7  ;;  %v539_v28 = vld [vmem:[%s11522_s6 + $0x20] sm:$0xff] (!%p433_p9)  ;;  %v544_v29 = vld [vmem:[%s11522_s6 + $0x48] sm:$0xff] (!%p433_p9)  ;;  %v541_v30 = vld [vmem:[%s11522_s6 + $0x30] sm:$0xff] (!%p433_p9)  ;;  %s11540_s1 = sld [smem:[#allocation7_spill]] (!%p433_p9)  ;;  %s11541_s3 = sld [smem:[#allocation9_spill]] (!%p433_p9)  ;;  %vm4563_vm9 = vcmask (!%p433_p9), 523264  }
  0x17   : > { %9490 = vmatprep.mubr.msk.f32.mxu0 (!%p433_p9), %vm10266_vm1, %v10265_v7  ;;  %9505 = vmatprep.mubr.msk.f32.mxu1 (!%p433_p9), %vm10266_vm1, %v10265_v7  ;;  %v546_v31 = vld [vmem:[%s11522_s6 + $0x58] sm:$0xff] (!%p433_p9)  ;;  %v543_v32 = vld [vmem:[%s11522_s6 + $0x40] sm:$0xff] (!%p433_p9)  ;;  %v545_v33 = vld [vmem:[%s11522_s6 + $0x50] sm:$0xff] (!%p433_p9)  ;;  %s482_s28 = sand.u32 (!%p433_p9), 1, %s10255_s30   ;;  %s9265_s20 = sshll.u32 (!%p433_p9), %s10365_s17, 7 }
  0x18   : > { %v8936_v38 = vld [vmem:[%s11523_s7 + $0x5] ss:$0 sm:$0xff] (!%p433_p9)  ;;  %v8932_v41 = vld [vmem:[%s11523_s7 + $0x1] ss:$0 sm:$0xff] (!%p433_p9)  ;;  %v8938_v45 = vld [vmem:[%s11523_s7 + $0x7] ss:$0 sm:$0xff] (!%p433_p9) }
  0x19   : > { %v8934_v49 = vld [vmem:[%s11523_s7 + $0x3] ss:$0 sm:$0xff] (!%p433_p9)  ;;  %v8935_v53 = vld [vmem:[%s11523_s7 + $0x4] ss:$0 sm:$0xff] (!%p433_p9)  ;;  %v8940_v54 = vld [vmem:[%s11523_s7 + $0x9] ss:$0 sm:$0xff] (!%p433_p9) }
  0x1a   : > { %v8931_v58 = vld [vmem:[%s11523_s7] ss:$0 sm:$0xff] (!%p433_p9)  ;;  %v8937_v63 = vld [vmem:[%s11523_s7 + $0x6] ss:$0 sm:$0xff] (!%p433_p9)  ;;  %v8939_v9 = vld [vmem:[%s11523_s7 + $0x8] ss:$0 sm:$0xff] (!%p433_p9) }
  0x1b   : > { %s486_s25 = scalar_select %p485_p10, %s10365_s17, 1 }
  0x1c   : > { %s10268_s17 = smov [#allocation2]  }
  0x1d   : > { %s10394_s26 = sshll.u32 %s486_s25, 3 }
  0x1e   : > { %s488_s18 = scalar_lea.vmem %s11538_s0, %s10394_s26  ;;  %s10671_s0 = scalar_lea.vmem %s11540_s1, %s10394_s26 }
  0x1f   : > { %v10400_v0 = vld [vmem:[%s488_s18] sm:$0xff]  ;;  %s10810_s22 = scalar_lea.vmem %s11541_s3, %s10394_s26  ;;  %s8825_s1 = scalar_lea.sflag [#allocation3], %s482_s28 }
  0x20   : > { %v504_v1 = vsel %vm503_vm0, %v10400_v0, 0.0 }
  0x21   : > { %505 = vadd.xlane.f32.xlu0 %v504_v1 }
  0xae   : > { %v506_v2 = vpop.xlane.xlu0 %505 }
  0xaf   : > { %v508_v3 = vmul.f32 0.03125, %v506_v2 }
  0xb1   : > { %v509_v4 = vsub.f32 %v10400_v0, %v508_v3 }
  0xb3   : > { %v510_v5 = vmul.f32 %v509_v4, %v509_v4  ;;  %v519_v19 = vmul.f32 %v8929_v18, %v509_v4  ;;  %v8933_v4 = vld [vmem:[%s11523_s7 + $0x2] ss:$0 sm:$0xff] }
  0xb5   : > { %v511_v6 = vsel %vm503_vm0, %v510_v5, 0.0 }
  0xb6   : > { %512 = vadd.xlane.f32.xlu0 %v511_v6 }
 0x143   : > { %v513_v10 = vpop.xlane.xlu0 %512 }
 0x144   : > { %v514_v11 = vmul.f32 0.032258064, %v513_v10 }
 0x146   : > { %10106 = vrsqrt.f32 %v514_v11  ;;  %vm522_vm2 = vcmp.eq.f32.partialorder %v514_v11, inf  ;;  %v525_v14 = vand.u32 2147483648, %v514_v11  ;;  %vm524_vm3 = vcmp.eq.f32.partialorder %v514_v11, 0.0 }
 0x150   : > { %v10107_v12 = vpop.eup %10106 }
 0x151   : > { %v521_v13 = vmul.f32 %v10107_v12, %v514_v11 }
 0x153   : > { %v523_v15 = vsel %vm522_vm2, %v514_v11, %v521_v13 }
 0x154   : > { %v526_v16 = vsel %vm524_vm3, %v525_v14, %v523_v15 }
 0x155   : > { %v527_v17 = vadd.f32 1e-06, %v526_v16 }
 0x157   : > { %10108 = vrcp.f32 %v527_v17 }
 0x161   : > { %v10109_v20 = vpop.eup %10108 }
 0x162   : > { %v529_v22 = vmul.f32 %v10109_v20, %v519_v19 }
 0x164   : > { %v534_v23 = vadd.f32 %v8930_v21, %v529_v22 }
 0x166   : > { %9491 = vmatmul.mubr.msk.f32.vlgmr.msra.gmra.mrb[0].mxu0 %vm503_vm0, %v534_v23  ;;  %9506 = vmatmul.mubr.msk.f32.vlgmr.msra.gmra.mrb[0].mxu1 %vm503_vm0, %v534_v23 }
 0x167   : > { %9494 = vmatpush3.xpose.msk.msra.mxu0 %vm503_vm0, %v536_v24  ;;  %9514 = vmatpush3.xpose.msk.msra.mxu1 %vm503_vm0, %v540_v25  ;;  %v499_v24 = vld [vmem:[%s11539_s2] sm:$0xff] }
 0x168   : > { %9495 = vmatprep.mubr.msk.f32.mxu0 %vm10266_vm1, %v10265_v7  ;;  %9515 = vmatprep.mubr.msk.f32.mxu1 %vm10266_vm1, %v10265_v7 }
 0x169   : > { %9498 = vmatprep.subr.mxu0 %v10265_v7  ;;  %9523 = vmatprep.subr.mxu1 %v10265_v7 }
 0x16a   : > { %9496 = vmatmul.mubr.msk.f32.vlgmr.msra.gmra.mrb[2].mxu0 %vm503_vm0, %v534_v23  ;;  %9516 = vmatmul.mubr.msk.f32.vlgmr.msra.gmra.mrb[2].mxu1 %vm503_vm0, %v534_v23 }
 0x16b   : > { %9499 = vmatpush3.xpose.msk.msra.mxu0 %vm503_vm0, %v537_v26  ;;  %9524 = vmatpush3.xpose.msk.msra.mxu1 %vm503_vm0, %v542_v27 }
 0x16c   : > { %9500 = vmatprep.mubr.msk.f32.mxu0 %vm10266_vm1, %v10265_v7  ;;  %9525 = vmatprep.mubr.msk.f32.mxu1 %vm10266_vm1, %v10265_v7 }
 0x16d   : > { %9508 = vmatprep.subr.mxu0 %v10265_v7  ;;  %9533 = vmatprep.subr.mxu1 %v10265_v7 }
 0x16e   : > { %9501 = vmatmul.mubr.msk.f32.vlgmr.msra.gmra.mrb[4].mxu0 %vm503_vm0, %v534_v23  ;;  %9526 = vmatmul.mubr.msk.f32.vlgmr.msra.gmra.mrb[4].mxu1 %vm503_vm0, %v534_v23 }
 0x16f   : > { %9509 = vmatpush3.xpose.msk.msra.mxu0 %vm503_vm0, %v539_v28  ;;  %9534 = vmatpush3.xpose.msk.msra.mxu1 %vm503_vm0, %v544_v29 }
 0x170   : > { %9510 = vmatprep.mubr.msk.f32.mxu0 %vm10266_vm1, %v10265_v7  ;;  %9535 = vmatprep.mubr.msk.f32.mxu1 %vm10266_vm1, %v10265_v7 }
 0x171   : > { %9518 = vmatprep.subr.mxu0 %v10265_v7  ;;  %9543 = vmatprep.subr.mxu1 %v10265_v7 }
 0x172   : > { %9511 = vmatmul.mubr.msk.f32.vlgmr.msra.gmra.mrb[6].mxu0 %vm503_vm0, %v534_v23  ;;  %9536 = vmatmul.mubr.msk.f32.vlgmr.msra.gmra.mrb[6].mxu1 %vm503_vm0, %v534_v23 }
 0x173   : > { %9519 = vmatpush3.xpose.msk.msra.mxu0 %vm503_vm0, %v541_v30  ;;  %9544 = vmatpush3.xpose.msk.msra.mxu1 %vm503_vm0, %v546_v31 }
 0x174   : > { %9520 = vmatprep.mubr.msk.f32.mxu0 %vm10266_vm1, %v10265_v7  ;;  %9545 = vmatprep.mubr.msk.f32.mxu1 %vm10266_vm1, %v10265_v7 }
 0x175   : > { %9528 = vmatprep.subr.mxu0 %v10265_v7  ;;  %9553 = vmatprep.subr.mxu1 %v10265_v7 }
 0x176   : > { %9521 = vmatmul.mubr.msk.f32.vlgmr.msra.gmra.mrb[8].mxu0 %vm503_vm0, %v534_v23  ;;  %9546 = vmatmul.mubr.msk.f32.vlgmr.msra.gmra.mrb[8].mxu1 %vm503_vm0, %v534_v23 }
 0x177   : > { %9529 = vmatpush3.xpose.msk.msra.mxu0 %vm503_vm0, %v543_v32  ;;  %9530 = vmatprep.mubr.msk.f32.mxu0 %vm10266_vm1, %v10265_v7 }
 0x178   : > { %9538 = vmatprep.subr.mxu0 %v10265_v7  ;;  %9555 = vmatprep.mubr.msk.f32.mxu1 %vm10266_vm1, %v10265_v7 }
 0x17a   : > { %9531 = vmatmul.mubr.msk.f32.vlgmr.msra.gmra.mrb[10].mxu0 %vm503_vm0, %v534_v23 }
 0x17b   : > { %9539 = vmatpush3.xpose.msk.msra.mxu0 %vm503_vm0, %v545_v33  ;;  %9540 = vmatprep.mubr.msk.f32.mxu0 %vm10266_vm1, %v10265_v7 }
 0x17c   : > { %9548 = vmatprep.subr.mxu0 %v10265_v7 }
 0x17e   : > { %9541 = vmatmul.mubr.msk.f32.vlgmr.msra.gmra.mrb[12].mxu0 %vm503_vm0, %v534_v23 }
 0x17f   : > { %9550 = vmatprep.mubr.msk.f32.mxu0 %vm10266_vm1, %v10265_v7 }
 0x239   : > { %v703_v34 = vpop.f32.mrb[0].mxu0  ;;  %v922_v35 = vpop.f32.mrb[0].mxu1 }
 0x23a   : > { %v9492_v36 = vpop.f32.mrb[1].mxu0  ;;  %v9507_v37 = vpop.f32.mrb[1].mxu1  ;;  %v923_v55 = vadd.f32 %v8934_v49, %v922_v35  ;;  %v704_v1 = vadd.f32 %v8931_v58, %v703_v34 }
 0x23d   : > { %v776_v39 = vpop.f32.mrb[2].mxu0  ;;  %v1068_v40 = vpop.f32.mrb[2].mxu1 }
 0x23e   : > { %v1069_v42 = vadd.f32 %v8936_v38, %v1068_v40  ;;  %v9497_v43 = vpop.f32.mrb[3].mxu0  ;;  %v9517_v44 = vpop.f32.mrb[3].mxu1  ;;  %v777_v46 = vadd.f32 %v8932_v41, %v776_v39 }
 0x240   : > { %9554 = vmatpush3.xpose.msk.msra.mxu1 %vm1510_vm4, %v1069_v42 }
 0x241   : > { %v849_v47 = vpop.f32.mrb[4].mxu0  ;;  %v1214_v48 = vpop.f32.mrb[4].mxu1  ;;  %9563 = vmatprep.subr.mxu1 %v10265_v7 }
 0x242   : > { %v1215_v50 = vadd.f32 %v8938_v45, %v1214_v48  ;;  %v9502_v51 = vpop.f32.mrb[5].mxu0  ;;  %v9527_v52 = vpop.f32.mrb[5].mxu1  ;;  %v850_v10 = vadd.f32 %v8933_v4, %v849_v47 }
 0x243   : > { %9556 = vmatmul.mubr.msk.f32.vlgmr.msra.gmra.mrb[10].mxu1 %vm1510_vm4, %v777_v46 }
 0x244   : > { %9564 = vmatpush3.xpose.msk.msra.mxu1 %vm1510_vm4, %v1215_v50  ;;  %9565 = vmatprep.mubr.msk.f32.mxu1 %vm10266_vm1, %v10265_v7 }
 0x245   : > { %v995_v56 = vpop.f32.mrb[6].mxu0  ;;  %v1360_v57 = vpop.f32.mrb[6].mxu1  ;;  %9573 = vmatprep.subr.mxu1 %v10265_v7 }
 0x246   : > { %v996_v59 = vadd.f32 %v8935_v53, %v995_v56  ;;  %v1361_v60 = vadd.f32 %v8940_v54, %v1360_v57  ;;  %v9512_v61 = vpop.f32.mrb[7].mxu0  ;;  %v9537_v62 = vpop.f32.mrb[7].mxu1 }
 0x247   : > { %9566 = vmatmul.mubr.msk.f32.vlgmr.msra.gmra.mrb[12].mxu1 %vm1510_vm4, %v923_v55  ;;  %v8941_v61 = vld [vmem:[%s11523_s7 + $0xa] ss:$0 sm:$0xff] }
 0x248   : > { %9549 = vmatpush3.xpose.msk.msra.mxu0 %vm1510_vm4, %v996_v59  ;;  %9574 = vmatpush3.msra.mxu1 %v1361_v60 }
 0x249   : > { %v1141_v2 = vpop.f32.mrb[8].mxu0  ;;  %v10547_v3 = vpop.f32.mrb[8].mxu1  ;;  %9558 = vmatprep.subr.mxu0 %v10265_v7  ;;  %9575 = vmatprep.mubr.msk.f32.mxu1 %vm10266_vm1, %v10265_v7 }
 0x24a   : > { %v1142_v5 = vadd.f32 %v8937_v63, %v1141_v2  ;;  %v9522_v6 = vpop.f32.mrb[9].mxu0  ;;  %v9547_v8 = vpop.f32.mrb[9].mxu1  ;;  %9583 = vmatprep.subr.mxu1 %v10265_v7  ;;  %v8942_v2 = vld [vmem:[%s11523_s7 + $0xb] ss:$0 sm:$0xff] }
 0x24b   : > { %9551 = vmatmul.mubr.msk.f32.vlgmr.msra.gmra.mrb[14].mxu0 %vm1510_vm4, %v704_v1  ;;  %v1507_v8 = vadd.f32 %v8942_v2, %v10547_v3  ;;  %v2159_v3 = vld [vmem:[%s11524_s8] sm:$0xff] }
 0x24c   : > { %9559 = vmatpush3.xpose.msk.msra.mxu0 %vm1510_vm4, %v1142_v5  ;;  %9560 = vmatprep.mubr.msk.f32.mxu0 %vm10266_vm1, %v10265_v7  ;;  %v9013_v2 = vld [vmem:[%s11522_s6 + $0xa0] sm:$0xff] }
 0x24d   : > { %v1287_v11 = vpop.f32.mrb[10].mxu0  ;;  %9568 = vmatprep.subr.mxu0 %v10265_v7 }
 0x24e   : > { %v1288_v12 = vadd.f32 %v8939_v9, %v1287_v11  ;;  %v9532_v13 = vpop.f32.mrb[11].mxu0 }
 0x24f   : > { %9561 = vmatmul.mubr.msk.f32.vlgmr.msra.gmra.mrb[16].mxu0 %vm1510_vm4, %v850_v10  ;;  %v8984_v13 = vld [vmem:[%s11524_s8 + $0x18] sm:$0xff] }
 0x250   : > { %9569 = vmatpush3.msra.mxu0 %v1288_v12  ;;  %9570 = vmatprep.mubr.msk.f32.mxu0 %vm10266_vm1, %v10265_v7  ;;  %v8979_v12 = vld [vmem:[%s11524_s8 + $0x8] sm:$0xff] }
 0x251   : > { %v10567_v14 = vpop.f32.mrb[12].mxu0  ;;  %9578 = vmatprep.subr.mxu0 %v10265_v7 }
 0x252   : > { %v9542_v15 = vpop.f32.mrb[13].mxu0  ;;  %v1434_v1 = vadd.f32 %v8941_v61, %v10567_v14  ;;  %v9010_v61 = vld [vmem:[%s11522_s6 + $0x88] sm:$0xff] }
 0x316   : > { %v1659_v16 = vpop.f32.mrb[10].mxu1 }
 0x317   : > { %v9557_v17 = vpop.f32.mrb[11].mxu1  ;;  %v1816_v21 = vmul.f32 0.35355338, %v1659_v16  ;;  %v8982_v16 = vld [vmem:[%s11524_s8 + $0x10] sm:$0xff] }
 0x319   : > { %v1820_v31 = vadd.f32 %v1816_v21, %v499_v24 }
 0x31a   : > { %v1811_v18 = vpop.f32.mrb[12].mxu1 }
 0x31b   : > { %v9567_v19 = vpop.f32.mrb[13].mxu1  ;;  %v1818_v27 = vmul.f32 0.35355338, %v1811_v18  ;;  %v1826_v33 = vsel %vm1510_vm4, %v1820_v31, -inf }
 0x31d   : > { %v1822_v35 = vadd.f32 %v1818_v27, %v499_v24 }
 0x31e   : > { %v1583_v20 = vpop.f32.mrb[14].mxu0 }
 0x31f   : > { %v1815_v22 = vmul.f32 0.35355338, %v1583_v20  ;;  %v9552_v23 = vpop.f32.mrb[15].mxu0  ;;  %v1832_v36 = vsel %vm1510_vm4, %v1822_v35, -inf }
 0x321   : > { %v1819_v25 = vadd.f32 %v1815_v22, %v499_v24 }
 0x322   : > { %v1735_v26 = vpop.f32.mrb[16].mxu0 }
 0x323   : > { %v1817_v28 = vmul.f32 0.35355338, %v1735_v26  ;;  %v9562_v29 = vpop.f32.mrb[17].mxu0  ;;  %v1823_v30 = vsel %vm1510_vm4, %v1819_v25, -inf }
 0x324   : > { %1824 = vmax.xlane.f32.xlu1 %v1823_v30 }
 0x325   : > { %v1821_v32 = vadd.f32 %v1817_v28, %v499_v24 }
 0x327   : > { %v1829_v34 = vsel %vm1510_vm4, %v1821_v32, -inf }
 0x328   : > { %1827 = vmax.xlane.f32.xlu1 %v1826_v33  ;;  %1830 = vmax.xlane.f32.xlu0 %v1829_v34  ;;  %v8986_v33 = vld [vmem:[%s11525_s9] ss:$0 sm:$0xff] }
 0x32c   : > { %1833 = vmax.xlane.f32.xlu1 %v1832_v36 }
 0x3b1   : > { %v1825_v37 = vpop.xlane.xlu1 %1824 }
 0x3b2   : > { %v1835_v38 = vsub.f32 %v1819_v25, %v1825_v37 }
 0x3b4   : > { %v1839_v39 = vmul.f32 1.442695, %v1835_v38 }
 0x3b5   : > { %v1828_v40 = vpop.xlane.xlu1 %1827  ;;  %v1831_v41 = vpop.xlane.xlu0 %1830 }
 0x3b6   : > { %10110 = vpow2.f32 %v1839_v39  ;;  %v1836_v42 = vsub.f32 %v1820_v31, %v1828_v40  ;;  %v1837_v43 = vsub.f32 %v1821_v32, %v1831_v41 }
 0x3b8   : > { %v1841_v44 = vmul.f32 1.442695, %v1836_v42  ;;  %v1843_v45 = vmul.f32 1.442695, %v1837_v43  ;;  %v8989_v43 = vld [vmem:[%s11522_s6 + $0x60] sm:$0xff] }
 0x3b9   : > { %v1834_v46 = vpop.xlane.xlu1 %1833 }
 0x3ba   : > { %10112 = vpow2.f32 %v1841_v44  ;;  %v1838_v47 = vsub.f32 %v1822_v35, %v1834_v46 }
 0x3bb   : > { %10114 = vpow2.f32 %v1843_v45 }
 0x3bc   : > { %v1845_v48 = vmul.f32 1.442695, %v1838_v47 }
 0x3be   : > { %10116 = vpow2.f32 %v1845_v48 }
 0x3c0   : > { %v10111_v49 = vpop.eup %10110 }
 0x3c1   : > { %v1847_v50 = vsel %vm1510_vm4, %v10111_v49, 0.0 }
 0x3c2   : > { %1848 = vadd.xlane.f32.xlu0 %v1847_v50 }
 0x3c4   : > { %v10113_v51 = vpop.eup %10112 }
 0x3c5   : > { %v10115_v52 = vpop.eup %10114  ;;  %v1850_v53 = vsel %vm1510_vm4, %v10113_v51, 0.0 }
 0x3c6   : > { %1851 = vadd.xlane.f32.xlu1 %v1850_v53  ;;  %v1853_v54 = vsel %vm1510_vm4, %v10115_v52, 0.0 }
 0x3c7   : > { %1854 = vadd.xlane.f32.xlu0 %v1853_v54 }
 0x3c8   : > { %v10117_v55 = vpop.eup %10116 }
 0x3c9   : > { %v1856_v56 = vsel %vm1510_vm4, %v10117_v55, 0.0 }
 0x3ca   : > { %1857 = vadd.xlane.f32.xlu1 %v1856_v56 }
 0x44f   : > { %v1849_v57 = vpop.xlane.xlu0 %1848 }
 0x450   : > { %10118 = vrcp.f32 %v1849_v57 }
 0x453   : > { %v1852_v58 = vpop.xlane.xlu1 %1851 }
 0x454   : > { %10120 = vrcp.f32 %v1852_v58  ;;  %v1855_v59 = vpop.xlane.xlu0 %1854  ;;  %v8991_v58 = vld [vmem:[%s11522_s6 + $0x70] sm:$0xff] }
 0x455   : > { %10122 = vrcp.f32 %v1855_v59  ;;  %v8992_v59 = vld [vmem:[%s11522_s6 + $0x78] sm:$0xff] }
 0x457   : > { %v1858_v60 = vpop.xlane.xlu1 %1857 }
 0x458   : > { %10124 = vrcp.f32 %v1858_v60  ;;  %v9009_v60 = vld [vmem:[%s11522_s6 + $0x80] sm:$0xff] }
 0x45a   : > { %v10119_v62 = vpop.eup %10118 }
 0x45b   : > { %v1860_v63 = vmul.f32 %v10119_v62, %v10111_v49  ;;  %v498_v62 = vld [vmem:[%s10671_s0] sm:$0xff] }
 0x45d   : > { %9571 = vmatmul.mubr.msk.f32.vlgmr.msra.gmra.mrb[18].mxu0 %vm1510_vm4, %v1860_v63  ;;  %v9011_v63 = vld [vmem:[%s11522_s6 + $0x90] sm:$0xff] }
 0x45e   : > { %v10121_v4 = vpop.eup %10120  ;;  %9579 = vmatpush3.msra.mxu0 %v1434_v1  ;;  %9580 = vmatprep.mubr.msk.f32.mxu0 %vm10266_vm1, %v10265_v7  ;;  %v9012_v1 = vld [vmem:[%s11522_s6 + $0x98] sm:$0xff] }
 0x45f   : > { %v10123_v5 = vpop.eup %10122  ;;  %v1862_v6 = vmul.f32 %v10121_v4, %v10113_v51  ;;  %9588 = vmatprep.subr.mxu0 %v10265_v7  ;;  %v9014_v4 = vld [vmem:[%s11522_s6 + $0xa8] sm:$0xff] }
 0x460   : > { %v1864_v9 = vmul.f32 %v10123_v5, %v10115_v52  ;;  %v8987_v52 = vld [vmem:[%s11520_s4 + $0x1] ss:$0 sm:$0xff]  ;;  %v9015_v5 = vld [vmem:[%s11522_s6 + $0xb0] sm:$0xff] }
 0x461   : > { %9576 = vmatmul.mubr.msk.f32.vlgmr.msra.gmra.mrb[14].mxu1 %vm1510_vm4, %v1862_v6  ;;  %v9016_v6 = vld [vmem:[%s11522_s6 + $0xb8] sm:$0xff] }
 0x462   : > { %v10125_v10 = vpop.eup %10124  ;;  %9581 = vmatmul.mubr.msk.f32.vlgmr.msra.gmra.mrb[20].mxu0 %vm1510_vm4, %v1864_v9  ;;  %9584 = vmatpush3.msra.mxu1 %v1507_v8 }
 0x463   : > { %v1866_v11 = vmul.f32 %v10125_v10, %v10117_v55  ;;  %9585 = vmatprep.mubr.msk.f32.mxu1 %vm10266_vm1, %v10265_v7  ;;  %9593 = vmatprep.subr.mxu1 %v10265_v7  ;;  %v8988_v55 = vld [vmem:[%s11521_s5 + $0x1] ss:$0 sm:$0xff] }
 0x464   : > { %9590 = vmatprep.mubr.msk.f32.mxu0 %vm10266_vm1, %v10265_v7  ;;  %9589 = vmatpush3.msra.mxu0 %v8979_v12 }
 0x465   : > { %9586 = vmatmul.mubr.msk.f32.vlgmr.msra.gmra.mrb[16].mxu1 %vm1510_vm4, %v1866_v11  ;;  %9598 = vmatprep.subr.mxu0 %v10265_v7 }
 0x466   : > { %9595 = vmatprep.mubr.msk.f32.mxu1 %vm10266_vm1, %v10265_v7  ;;  %9594 = vmatpush3.msra.mxu1 %v2159_v3 }
 0x467   : > { %9603 = vmatprep.subr.mxu1 %v10265_v7 }
 0x530   : > { %v1936_v14 = vpop.f32.mrb[18].mxu0 }
 0x531   : > { %v9572_v15 = vpop.f32.mrb[19].mxu0  ;;  %9596 = vmatmul.mubr.msk.f32.vlgmr.msra.gmra.mrb[18].mxu1 %vm1510_vm4, %v1936_v14 }
 0x532   : > { %9604 = vmatpush3.msra.mxu1 %v8984_v13  ;;  %9605 = vmatprep.mubr.msk.f32.mxu1 %vm10266_vm1, %v10265_v7  ;;  %v9025_v15 = vld [vmem:[%s11523_s7 + $0x10] ss:$0 sm:$0xff] }
 0x533   : > { %9613 = vmatprep.subr.mxu1 %v10265_v7 }
 0x534   : > { %v2009_v17 = vpop.f32.mrb[14].mxu1 }
 0x535   : > { %v2082_v18 = vpop.f32.mrb[20].mxu0  ;;  %v9577_v19 = vpop.f32.mrb[15].mxu1  ;;  %9591 = vmatmul.mubr.msk.f32.vlgmr.msra.gmra.mrb[22].mxu0 %vm1510_vm4, %v2009_v17 }
 0x536   : > { %v9582_v20 = vpop.f32.mrb[21].mxu0  ;;  %9599 = vmatpush3.msra.mxu0 %v8982_v16  ;;  %9600 = vmatprep.mubr.msk.f32.mxu0 %vm10266_vm1, %v10265_v7  ;;  %v9026_v16 = vld [vmem:[%s11523_s7 + $0x11] ss:$0 sm:$0xff]  ;;  %v8997_v19 = vld [vmem:[%s11523_s7 + $0xc] ss:$0 sm:$0xff] }
 0x537   : > { %9608 = vmatprep.subr.mxu0 %v10265_v7  ;;  %v8998_v20 = vld [vmem:[%s11523_s7 + $0xd] ss:$0 sm:$0xff] }
 0x538   : > { %v2155_v21 = vpop.f32.mrb[16].mxu1 }
 0x539   : > { %v9587_v22 = vpop.f32.mrb[17].mxu1  ;;  %9601 = vmatmul.mubr.msk.f32.vlgmr.msra.gmra.mrb[24].mxu0 %vm1510_vm4, %v2082_v18  ;;  %9606 = vmatmul.mubr.msk.f32.vlgmr.msra.gmra.mrb[20].mxu1 %vm1510_vm4, %v2155_v21 }
 0x53a   : > { %9610 = vmatprep.mubr.msk.f32.mxu0 %vm10266_vm1, %v10265_v7  ;;  %9615 = vmatprep.mubr.msk.f32.mxu1 %vm10266_vm1, %v10265_v7 }
 0x53d   : > { %9609 = vmatpush3.xpose.msk.msra.mxu0 %vm503_vm0, %v8989_v43 }
 0x53e   : > { %9618 = vmatprep.subr.mxu0 %v10265_v7 }
 0x604   : > { %v2304_v23 = vpop.f32.mrb[18].mxu1 }
 0x605   : > { %v9597_v24 = vpop.f32.mrb[19].mxu1 }
 0x608   : > { %v2231_v25 = vpop.f32.mrb[22].mxu0 }
 0x609   : > { %v2305_v26 = vadd.f32 %v2304_v23, %v2231_v25  ;;  %v9592_v27 = vpop.f32.mrb[23].mxu0  ;;  %v9027_v25 = vld [vmem:[%s11523_s7 + $0x12] ss:$0 sm:$0xff] }
 0x60c   : > { %v2379_v28 = vpop.f32.mrb[24].mxu0  ;;  %v2455_v29 = vpop.f32.mrb[20].mxu1 }
 0x60d   : > { %v2383_v30 = vadd.f32 %v2379_v28, %v2305_v26  ;;  %v9602_v31 = vpop.f32.mrb[25].mxu0  ;;  %v9607_v32 = vpop.f32.mrb[21].mxu1  ;;  %v9028_v26 = vld [vmem:[%s11523_s7 + $0x13] ss:$0 sm:$0xff] }
 0x60e   : > { %v8999_v31 = vld [vmem:[%s11523_s7 + $0xe] ss:$0 sm:$0xff]  ;;  %v9000_v32 = vld [vmem:[%s11523_s7 + $0xf] ss:$0 sm:$0xff] }
 0x60f   : > { %v2459_v34 = vadd.f32 %v2455_v29, %v2383_v30 }
 0x611   : > { %v2465_v35 = vadd.f32 %v8986_v33, %v2459_v34 }
 0x613   : > { %v10635_v36 = vadd.f32 %v2465_v35, %v10400_v0  ;;  %v8990_v0 = vld [vmem:[%s11522_s6 + $0x68] sm:$0xff] }
 0x614   : > { %9614 = vmatpush3.xpose.msk.msra.mxu1 %vm503_vm0, %v8990_v0 }
 0x615   : > { %v2469_v37 = vsel %vm503_vm0, %v10635_v36, 0.0  ;;  %9623 = vmatprep.subr.mxu1 %v10265_v7 }
 0x616   : > { %2470 = vadd.xlane.f32.xlu0 %v2469_v37 }
 0x6a3   : > { %v2471_v38 = vpop.xlane.xlu0 %2470 }
 0x6a4   : > { %v2472_v39 = vmul.f32 0.03125, %v2471_v38 }
 0x6a6   : > { %v2473_v40 = vsub.f32 %v10635_v36, %v2472_v39 }
 0x6a8   : > { %v2474_v41 = vmul.f32 %v2473_v40, %v2473_v40  ;;  %v2483_v53 = vmul.f32 %v8987_v52, %v2473_v40  ;;  %v9029_v40 = vld [vmem:[%s11523_s7 + $0x14] ss:$0 sm:$0xff] }
 0x6aa   : > { %v2475_v42 = vsel %vm503_vm0, %v2474_v41, 0.0  ;;  %v9030_v41 = vld [vmem:[%s11523_s7 + $0x15] ss:$0 sm:$0xff] }
 0x6ab   : > { %2476 = vadd.xlane.f32.xlu1 %v2475_v42 }
 0x738   : > { %v2477_v44 = vpop.xlane.xlu1 %2476 }
 0x739   : > { %v2478_v45 = vmul.f32 0.032258064, %v2477_v44 }
 0x73b   : > { %10126 = vrsqrt.f32 %v2478_v45  ;;  %vm2486_vm5 = vcmp.eq.f32.partialorder %v2478_v45, inf  ;;  %v2489_v48 = vand.u32 2147483648, %v2478_v45  ;;  %vm2488_vm6 = vcmp.eq.f32.partialorder %v2478_v45, 0.0 }
 0x745   : > { %v10127_v46 = vpop.eup %10126 }
 0x746   : > { %v2485_v47 = vmul.f32 %v10127_v46, %v2478_v45 }
 0x748   : > { %v2487_v49 = vsel %vm2486_vm5, %v2478_v45, %v2485_v47 }
 0x749   : > { %v2490_v50 = vsel %vm2488_vm6, %v2489_v48, %v2487_v49 }
 0x74a   : > { %v2491_v51 = vadd.f32 1e-06, %v2490_v50 }
 0x74c   : > { %10128 = vrcp.f32 %v2491_v51  ;;  %v500_v51 = vld [vmem:[%s10810_s22] sm:$0xff] }
 0x756   : > { %v10129_v54 = vpop.eup %10128 }
 0x757   : > { %v2493_v56 = vmul.f32 %v10129_v54, %v2483_v53 }
 0x759   : > { %v2498_v57 = vadd.f32 %v8988_v55, %v2493_v56 }
 0x75b   : > { %9611 = vmatmul.mubr.msk.f32.vlgmr.msra.gmra.mrb[26].mxu0 %vm503_vm0, %v2498_v57  ;;  %9616 = vmatmul.mubr.msk.f32.vlgmr.msra.gmra.mrb[22].mxu1 %vm503_vm0, %v2498_v57 }
 0x75c   : > { %9619 = vmatpush3.xpose.msk.msra.mxu0 %vm503_vm0, %v8991_v58  ;;  %9624 = vmatpush3.xpose.msk.msra.mxu1 %vm503_vm0, %v8992_v59 }
 0x75d   : > { %9620 = vmatprep.mubr.msk.f32.mxu0 %vm10266_vm1, %v10265_v7  ;;  %9625 = vmatprep.mubr.msk.f32.mxu1 %vm10266_vm1, %v10265_v7 }
 0x75e   : > { %9628 = vmatprep.subr.mxu0 %v10265_v7  ;;  %9633 = vmatprep.subr.mxu1 %v10265_v7 }
 0x75f   : > { %9621 = vmatmul.mubr.msk.f32.vlgmr.msra.gmra.mrb[28].mxu0 %vm503_vm0, %v2498_v57  ;;  %9626 = vmatmul.mubr.msk.f32.vlgmr.msra.gmra.mrb[24].mxu1 %vm503_vm0, %v2498_v57 }
 0x760   : > { %9629 = vmatpush3.xpose.msk.msra.mxu0 %vm503_vm0, %v9009_v60  ;;  %9634 = vmatpush3.xpose.msk.msra.mxu1 %vm503_vm0, %v9010_v61 }
 0x761   : > { %9630 = vmatprep.mubr.msk.f32.mxu0 %vm10266_vm1, %v10265_v7  ;;  %9635 = vmatprep.mubr.msk.f32.mxu1 %vm10266_vm1, %v10265_v7 }
 0x762   : > { %9638 = vmatprep.subr.mxu0 %v10265_v7  ;;  %9643 = vmatprep.subr.mxu1 %v10265_v7 }
 0x763   : > { %9631 = vmatmul.mubr.msk.f32.vlgmr.msra.gmra.mrb[30].mxu0 %vm503_vm0, %v498_v62  ;;  %9636 = vmatmul.mubr.msk.f32.vlgmr.msra.gmra.mrb[26].mxu1 %vm503_vm0, %v498_v62 }
 0x764   : > { %9639 = vmatpush3.xpose.msk.msra.mxu0 %vm503_vm0, %v9011_v63  ;;  %9644 = vmatpush3.xpose.msk.msra.mxu1 %vm503_vm0, %v9012_v1 }
 0x765   : > { %9640 = vmatprep.mubr.msk.f32.mxu0 %vm10266_vm1, %v10265_v7  ;;  %9645 = vmatprep.mubr.msk.f32.mxu1 %vm10266_vm1, %v10265_v7 }
 0x766   : > { %9648 = vmatprep.subr.mxu0 %v10265_v7  ;;  %9653 = vmatprep.subr.mxu1 %v10265_v7 }
 0x767   : > { %9641 = vmatmul.mubr.msk.f32.vlgmr.msra.gmra.mrb[32].mxu0 %vm503_vm0, %v498_v62  ;;  %9646 = vmatmul.mubr.msk.f32.vlgmr.msra.gmra.mrb[28].mxu1 %vm503_vm0, %v498_v62 }
 0x768   : > { %9650 = vmatprep.mubr.msk.f32.mxu0 %vm10266_vm1, %v10265_v7  ;;  %9655 = vmatprep.mubr.msk.f32.mxu1 %vm10266_vm1, %v10265_v7 }
 0x769   : > { %9649 = vmatpush3.xpose.msk.msra.mxu0 %vm503_vm0, %v9013_v2  ;;  %9654 = vmatpush3.xpose.msk.msra.mxu1 %vm503_vm0, %v9014_v4 }
 0x76a   : > { %9658 = vmatprep.subr.mxu0 %v10265_v7  ;;  %9663 = vmatprep.subr.mxu1 %v10265_v7 }
 0x76c   : > { %9651 = vmatmul.mubr.msk.f32.vlgmr.msra.gmra.mrb[34].mxu0 %vm503_vm0, %v498_v62  ;;  %9656 = vmatmul.mubr.msk.f32.vlgmr.msra.gmra.mrb[30].mxu1 %vm503_vm0, %v498_v62 }
 0x76d   : > { %9659 = vmatpush3.xpose.msk.msra.mxu0 %vm503_vm0, %v9015_v5  ;;  %9664 = vmatpush3.xpose.msk.msra.mxu1 %vm503_vm0, %v9016_v6 }
 0x76e   : > { %9660 = vmatprep.mubr.msk.f32.mxu0 %vm10266_vm1, %v10265_v7  ;;  %9665 = vmatprep.mubr.msk.f32.mxu1 %vm10266_vm1, %v10265_v7 }
 0x76f   : > { %9668 = vmatprep.subr.mxu0 %v10265_v7  ;;  %9673 = vmatprep.subr.mxu1 %v10265_v7 }
 0x770   : > { %9661 = vmatmul.mubr.msk.f32.vlgmr.msra.gmra.mrb[36].mxu0 %vm503_vm0, %v498_v62  ;;  %9666 = vmatmul.mubr.msk.f32.vlgmr.msra.gmra.mrb[32].mxu1 %vm503_vm0, %v498_v62 }
 0x771   : > { %9670 = vmatprep.mubr.msk.f32.mxu0 %vm10266_vm1, %v10265_v7  ;;  %9675 = vmatprep.mubr.msk.f32.mxu1 %vm10266_vm1, %v10265_v7 }
 0x82e   : > { %v2605_v8 = vpop.f32.mrb[26].mxu0  ;;  %v2678_v9 = vpop.f32.mrb[22].mxu1 }
 0x82f   : > { %v9612_v10 = vpop.f32.mrb[27].mxu0  ;;  %v9617_v11 = vpop.f32.mrb[23].mxu1  ;;  %v2606_v27 = vadd.f32 %v8997_v19, %v2605_v8  ;;  %v2679_v28 = vadd.f32 %v8998_v20, %v2678_v9 }
 0x832   : > { %v2751_v3 = vpop.f32.mrb[28].mxu0  ;;  %v2824_v12 = vpop.f32.mrb[24].mxu1 }
 0x833   : > { %v9622_v13 = vpop.f32.mrb[29].mxu0  ;;  %v9627_v14 = vpop.f32.mrb[25].mxu1  ;;  %v2752_v38 = vadd.f32 %v8999_v31, %v2751_v3  ;;  %v2825_v39 = vadd.f32 %v9000_v32, %v2824_v12 }
 0x836   : > { %v2966_v17 = vpop.f32.mrb[30].mxu0  ;;  %v3039_v18 = vpop.f32.mrb[26].mxu1 }
 0x837   : > { %v2967_v21 = vadd.f32 %v9025_v15, %v2966_v17  ;;  %v3040_v22 = vadd.f32 %v9026_v16, %v3039_v18  ;;  %v9632_v23 = vpop.f32.mrb[31].mxu0  ;;  %v9637_v24 = vpop.f32.mrb[27].mxu1 }
 0x839   : > { %9669 = vmatpush3.xpose.msk.msra.mxu0 %vm1510_vm4, %v2967_v21  ;;  %9674 = vmatpush3.xpose.msk.msra.mxu1 %vm1510_vm4, %v3040_v22 }
 0x83a   : > { %v3112_v29 = vpop.f32.mrb[32].mxu0  ;;  %v3185_v30 = vpop.f32.mrb[28].mxu1  ;;  %9678 = vmatprep.subr.mxu0 %v10265_v7  ;;  %9683 = vmatprep.subr.mxu1 %v10265_v7 }
 0x83b   : > { %v3113_v33 = vadd.f32 %v9027_v25, %v3112_v29  ;;  %v3186_v34 = vadd.f32 %v9028_v26, %v3185_v30  ;;  %v9642_v35 = vpop.f32.mrb[33].mxu0  ;;  %v9647_v37 = vpop.f32.mrb[29].mxu1 }
 0x83c   : > { %9671 = vmatmul.mubr.msk.f32.vlgmr.msra.gmra.mrb[38].mxu0 %vm1510_vm4, %v2606_v27  ;;  %9676 = vmatmul.mubr.msk.f32.vlgmr.msra.gmra.mrb[34].mxu1 %vm1510_vm4, %v2679_v28  ;;  %v9031_v37 = vld [vmem:[%s11523_s7 + $0x16] ss:$0 sm:$0xff] }
 0x83d   : > { %9679 = vmatpush3.xpose.msk.msra.mxu0 %vm1510_vm4, %v3113_v33  ;;  %9684 = vmatpush3.xpose.msk.msra.mxu1 %vm1510_vm4, %v3186_v34  ;;  %v9032_v34 = vld [vmem:[%s11523_s7 + $0x17] ss:$0 sm:$0xff] }
 0x83e   : > { %9680 = vmatprep.mubr.msk.f32.mxu0 %vm10266_vm1, %v10265_v7  ;;  %9685 = vmatprep.mubr.msk.f32.mxu1 %vm10266_vm1, %v10265_v7 }
 0x83f   : > { %9688 = vmatprep.subr.mxu0 %v10265_v7  ;;  %9693 = vmatprep.subr.mxu1 %v10265_v7  ;;  %v3258_v42 = vpop.f32.mrb[34].mxu0  ;;  %v3331_v43 = vpop.f32.mrb[30].mxu1 }
 0x840   : > { %9681 = vmatmul.mubr.msk.f32.vlgmr.msra.gmra.mrb[40].mxu0 %vm1510_vm4, %v2752_v38  ;;  %9686 = vmatmul.mubr.msk.f32.vlgmr.msra.gmra.mrb[36].mxu1 %vm1510_vm4, %v2825_v39  ;;  %v3259_v0 = vadd.f32 %v9029_v40, %v3258_v42  ;;  %v3332_v44 = vadd.f32 %v9030_v41, %v3331_v43  ;;  %v9652_v45 = vpop.f32.mrb[35].mxu0  ;;  %v9657_v46 = vpop.f32.mrb[31].mxu1 }
 0x841   : > { %9690 = vmatprep.mubr.msk.f32.mxu0 %vm10266_vm1, %v10265_v7  ;;  %9695 = vmatprep.mubr.msk.f32.mxu1 %vm10266_vm1, %v10265_v7  ;;  %v9062_v46 = vld [vmem:[%s11524_s8 + $0x28] sm:$0xff] }
 0x842   : > { %9689 = vmatpush3.msra.mxu0 %v3259_v0  ;;  %9694 = vmatpush3.msra.mxu1 %v3332_v44 }
 0x843   : > { %v10800_v47 = vpop.f32.mrb[36].mxu0  ;;  %v10802_v48 = vpop.f32.mrb[32].mxu1  ;;  %9698 = vmatprep.subr.mxu0 %v10265_v7  ;;  %9703 = vmatprep.subr.mxu1 %v10265_v7 }
 0x844   : > { %v9662_v49 = vpop.f32.mrb[37].mxu0  ;;  %v9667_v50 = vpop.f32.mrb[33].mxu1  ;;  %v3478_v40 = vadd.f32 %v9032_v34, %v10802_v48  ;;  %v3405_v42 = vadd.f32 %v9031_v37, %v10800_v47  ;;  %v9061_v47 = vld [vmem:[%s11524_s8 + $0x20] sm:$0xff]  ;;  %v9065_v48 = vld [vmem:[%s11524_s8 + $0x30] sm:$0xff] }
 0x845   : > { %v9067_v50 = vld [vmem:[%s11524_s8 + $0x38] sm:$0xff] }
 0x90f   : > { %v3553_v52 = vpop.f32.mrb[38].mxu0  ;;  %v3629_v53 = vpop.f32.mrb[34].mxu1 }
 0x910   : > { %v3785_v54 = vmul.f32 0.35355338, %v3553_v52  ;;  %v3786_v55 = vmul.f32 0.35355338, %v3629_v53  ;;  %v9672_v56 = vpop.f32.mrb[39].mxu0  ;;  %v9677_v57 = vpop.f32.mrb[35].mxu1 }
 0x912   : > { %v3790_v58 = vadd.f32 %v3786_v55, %v500_v51  ;;  %v3789_v59 = vadd.f32 %v3785_v54, %v500_v51 }
 0x913   : > { %v3705_v60 = vpop.f32.mrb[40].mxu0  ;;  %v3781_v61 = vpop.f32.mrb[36].mxu1 }
 0x914   : > { %v3787_v62 = vmul.f32 0.35355338, %v3705_v60  ;;  %v3788_v63 = vmul.f32 0.35355338, %v3781_v61  ;;  %v9682_v1 = vpop.f32.mrb[41].mxu0  ;;  %v9687_v2 = vpop.f32.mrb[37].mxu1 }
 0x915   : > { %v3796_v4 = vsel %vm1510_vm4, %v3790_v58, -inf  ;;  %v3793_v5 = vsel %vm1510_vm4, %v3789_v59, -inf }
 0x916   : > { %3797 = vmax.xlane.f32.xlu1 %v3796_v4  ;;  %3794 = vmax.xlane.f32.xlu0 %v3793_v5  ;;  %v3792_v6 = vadd.f32 %v3788_v63, %v500_v51  ;;  %v3791_v8 = vadd.f32 %v3787_v62, %v500_v51 }
 0x918   : > { %v3802_v9 = vsel %vm1510_vm4, %v3792_v6, -inf  ;;  %v3799_v10 = vsel %vm1510_vm4, %v3791_v8, -inf }
 0x91a   : > { %3803 = vmax.xlane.f32.xlu1 %v3802_v9  ;;  %3800 = vmax.xlane.f32.xlu0 %v3799_v10 }
 0x9a3   : > { %v3798_v11 = vpop.xlane.xlu1 %3797  ;;  %v3795_v3 = vpop.xlane.xlu0 %3794 }
 0x9a4   : > { %v3806_v12 = vsub.f32 %v3790_v58, %v3798_v11  ;;  %v3805_v13 = vsub.f32 %v3789_v59, %v3795_v3 }
 0x9a6   : > { %v3811_v14 = vmul.f32 1.442695, %v3806_v12  ;;  %v3809_v15 = vmul.f32 1.442695, %v3805_v13 }
 0x9a7   : > { %v3804_v16 = vpop.xlane.xlu1 %3803  ;;  %v3801_v17 = vpop.xlane.xlu0 %3800 }
 0x9a8   : > { %10130 = vpow2.f32 %v3811_v14  ;;  %v3808_v18 = vsub.f32 %v3792_v6, %v3804_v16  ;;  %v3807_v19 = vsub.f32 %v3791_v8, %v3801_v17  ;;  %v9069_v6 = vld [vmem:[%s11525_s9 + $0x1] ss:$0 sm:$0xff]  ;;  %v4472_v17 = vld [vmem:[%s11526_s10 + $0x10] sm:$0xff] }
 0x9a9   : > { %10132 = vpow2.f32 %v3809_v15  ;;  %v4470_v16 = vld [vmem:[%s11526_s10] sm:$0xff] }
 0x9aa   : > { %v3815_v20 = vmul.f32 1.442695, %v3808_v18  ;;  %v3813_v21 = vmul.f32 1.442695, %v3807_v19  ;;  %v10267_v18 = vmov 0.0|0.0  }
 0x9ac   : > { %10134 = vpow2.f32 %v3815_v20  ;;  %v4473_v20 = vld [vmem:[%s11526_s10 + $0x18] sm:$0xff] }
 0x9ad   : > { %10136 = vpow2.f32 %v3813_v21  ;;  %v10032_v21 = vpack.c.bf16 %v4473_v20, %v4472_v17  ;;  %v9079_v17 = vld [vmem:[%s11522_s6 + $0xc8] sm:$0xff]  ;;  %v9080_v20 = vld [vmem:[%s11522_s6 + $0xd0] sm:$0xff] }
 0x9b2   : > { %v10131_v22 = vpop.eup %10130 }
 0x9b3   : > { %v10133_v23 = vpop.eup %10132  ;;  %v3820_v24 = vsel %vm1510_vm4, %v10131_v22, 0.0 }
 0x9b4   : > { %3821 = vadd.xlane.f32.xlu1 %v3820_v24  ;;  %v3817_v25 = vsel %vm1510_vm4, %v10133_v23, 0.0  ;;  %v4557_v24 = vld [vmem:[%s11528_s12 + $0x10] sm:$0xff] }
 0x9b5   : > { %3818 = vadd.xlane.f32.xlu0 %v3817_v25 }
 0x9b6   : > { %v10135_v26 = vpop.eup %10134 }
 0x9b7   : > { %v10137_v27 = vpop.eup %10136  ;;  %v3826_v28 = vsel %vm1510_vm4, %v10135_v26, 0.0 }
 0x9b8   : > { %3827 = vadd.xlane.f32.xlu1 %v3826_v28  ;;  %v3823_v29 = vsel %vm1510_vm4, %v10137_v27, 0.0  ;;  %v4559_v28 = vld [vmem:[%s11528_s12 + $0x20] sm:$0xff] }
 0x9b9   : > { %3824 = vadd.xlane.f32.xlu0 %v3823_v29  ;;  %v4560_v29 = vld [vmem:[%s11528_s12 + $0x28] sm:$0xff] }
 0xa41   : > { %v3822_v30 = vpop.xlane.xlu1 %3821 }
 0xa42   : > { %10138 = vrcp.f32 %v3822_v30  ;;  %v3819_v31 = vpop.xlane.xlu0 %3818  ;;  %v10041_v30 = vpack.c.bf16 %v4560_v29, %v4559_v28 }
 0xa43   : > { %10140 = vrcp.f32 %v3819_v31 }
 0xa45   : > { %v3828_v32 = vpop.xlane.xlu1 %3827 }
 0xa46   : > { %10142 = vrcp.f32 %v3828_v32  ;;  %v3825_v33 = vpop.xlane.xlu0 %3824 }
 0xa47   : > { %10144 = vrcp.f32 %v3825_v33 }
 0xa4c   : > { %v10139_v35 = vpop.eup %10138 }
 0xa4d   : > { %v10141_v38 = vpop.eup %10140  ;;  %v3832_v39 = vmul.f32 %v10139_v35, %v10131_v22  ;;  %v4555_v22 = vld [vmem:[%s11528_s12] sm:$0xff] }
 0xa4e   : > { %v3830_v41 = vmul.f32 %v10141_v38, %v10133_v23  ;;  %v4556_v23 = vld [vmem:[%s11528_s12 + $0x8] sm:$0xff] }
 0xa4f   : > { %9696 = vmatmul.mubr.msk.f32.vlgmr.msra.gmra.mrb[38].mxu1 %vm1510_vm4, %v3832_v39  ;;  %v10035_v25 = vpack.c.bf16 %v4556_v23, %v4555_v22  ;;  %v9082_v22 = vld [vmem:[%s11522_s6 + $0xe0] sm:$0xff]  ;;  %v9087_v23 = vld [vmem:[%s11522_s6 + $0x108] sm:$0xff] }
 0xa50   : > { %v10143_v43 = vpop.eup %10142  ;;  %9691 = vmatmul.mubr.msk.f32.vlgmr.msra.gmra.mrb[42].mxu0 %vm1510_vm4, %v3830_v41  ;;  %9704 = vmatpush3.msra.mxu1 %v3478_v40  ;;  %v9070_v40 = vld [vmem:[%s11520_s4 + $0x2] ss:$0 sm:$0xff] }
 0xa51   : > { %v10145_v0 = vpop.eup %10144  ;;  %v3836_v44 = vmul.f32 %v10143_v43, %v10135_v26  ;;  %9699 = vmatpush3.msra.mxu0 %v3405_v42  ;;  %9700 = vmatprep.mubr.msk.f32.mxu0 %vm10266_vm1, %v10265_v7  ;;  %v4558_v26 = vld [vmem:[%s11528_s12 + $0x18] sm:$0xff]  ;;  %v9071_v43 = vld [vmem:[%s11521_s5 + $0x2] ss:$0 sm:$0xff] }
 0xa52   : > { %v3834_v45 = vmul.f32 %v10145_v0, %v10137_v27  ;;  %9705 = vmatprep.mubr.msk.f32.mxu1 %vm10266_vm1, %v10265_v7  ;;  %9708 = vmatprep.subr.mxu0 %v10265_v7  ;;  %v10038_v27 = vpack.c.bf16 %v4558_v26, %v4557_v24  ;;  %v9084_v24 = vld [vmem:[%s11522_s6 + $0xf0] sm:$0xff]  ;;  %v9086_v26 = vld [vmem:[%s11522_s6 + $0x100] sm:$0xff] }
 0xa53   : > { %9706 = vmatmul.mubr.msk.f32.vlgmr.msra.gmra.mrb[40].mxu1 %vm1510_vm4, %v3836_v44  ;;  %9713 = vmatprep.subr.mxu1 %v10265_v7 }
 0xa54   : > { %9701 = vmatmul.mubr.msk.f32.vlgmr.msra.gmra.mrb[44].mxu0 %vm1510_vm4, %v3834_v45  ;;  %9715 = vmatprep.mubr.msk.f32.mxu1 %vm10266_vm1, %v10265_v7  ;;  %v4561_v45 = vld [vmem:[%s11528_s12 + $0x30] sm:$0xff] }
 0xa55   : > { %9709 = vmatpush3.msra.mxu0 %v9062_v46  ;;  %9710 = vmatprep.mubr.msk.f32.mxu0 %vm10266_vm1, %v10265_v7  ;;  %v4562_v46 = vld [vmem:[%s11528_s12 + $0x38] sm:$0xff] }
 0xa56   : > { %9718 = vmatprep.subr.mxu0 %v10265_v7  ;;  %9714 = vmatpush3.msra.mxu1 %v9061_v47  ;;  %v10044_v47 = vpack.c.bf16 %v4562_v46, %v4561_v45 }
 0xa57   : > { %9723 = vmatprep.subr.mxu1 %v10265_v7 }
 0xb22   : > { %v3979_v49 = vpop.f32.mrb[38].mxu1 }
 0xb23   : > { %v3906_v51 = vpop.f32.mrb[42].mxu0  ;;  %v9697_v52 = vpop.f32.mrb[39].mxu1  ;;  %9711 = vmatmul.mubr.msk.f32.vlgmr.msra.gmra.mrb[46].mxu0 %vm1510_vm4, %v3979_v49 }
 0xb24   : > { %v9692_v53 = vpop.f32.mrb[43].mxu0  ;;  %9716 = vmatmul.mubr.msk.f32.vlgmr.msra.gmra.mrb[42].mxu1 %vm1510_vm4, %v3906_v51  ;;  %9719 = vmatpush3.msra.mxu0 %v9065_v48  ;;  %v9072_v48 = vld [vmem:[%s11527_s11] ss:$0 sm:$0xff] }
 0xb25   : > { %9720 = vmatprep.mubr.msk.f32.mxu0 %vm10266_vm1, %v10265_v7  ;;  %9724 = vmatpush3.msra.mxu1 %v9067_v50 }
 0xb26   : > { %v4125_v54 = vpop.f32.mrb[40].mxu1  ;;  %9725 = vmatprep.mubr.msk.f32.mxu1 %vm10266_vm1, %v10265_v7  ;;  %10028 = vmatprep.subr.bf16.mxu0 %v10267_v18 }
 0xb27   : > { %v4052_v55 = vpop.f32.mrb[44].mxu0  ;;  %v9707_v56 = vpop.f32.mrb[41].mxu1  ;;  %10034 = vmatprep.subr.bf16.mxu1 %v10267_v18 }
 0xb28   : > { %v9702_v57 = vpop.f32.mrb[45].mxu0  ;;  %9721 = vmatmul.mubr.msk.f32.vlgmr.msra.gmra.mrb[48].mxu0 %vm1510_vm4, %v4052_v55  ;;  %9726 = vmatmul.mubr.msk.f32.vlgmr.msra.gmra.mrb[44].mxu1 %vm1510_vm4, %v4125_v54  ;;  %v9075_v54 = vld [vmem:[%s11529_s13] ss:$0 sm:$0xff] }
 0xb29   : > { %9736 = vmatprep.mubr.msk.f32.mxu0 %vm10266_vm1, %v10265_v7  ;;  %9755 = vmatprep.mubr.msk.f32.mxu1 %vm10266_vm1, %v10265_v7 }
 0xb2a   : > { %10036 = vmatpush3.bf16.msra.mxu1 %v10035_v25  ;;  %v9089_v25 = vld [vmem:[%s11522_s6 + $0x118] sm:$0xff] }
 0xb2b   : > { %10037 = vmatprep.subr.bf16.mxu1 %v10267_v18 }
 0xb2e   : > { %10039 = vmatpush3.bf16.msra.mxu1 %v10038_v27  ;;  %v9088_v27 = vld [vmem:[%s11522_s6 + $0x110] sm:$0xff] }
 0xb2f   : > { %10040 = vmatprep.subr.bf16.mxu1 %v10267_v18 }
 0xb32   : > { %10042 = vmatpush3.bf16.msra.mxu1 %v10041_v30 }
 0xb33   : > { %10043 = vmatprep.subr.bf16.mxu1 %v10267_v18 }
 0xb36   : > { %10045 = vmatpush3.bf16.msra.mxu1 %v10044_v47  ;;  %v9106_v47 = vld [vmem:[%s11523_s7 + $0x1c] ss:$0 sm:$0xff] }
 0xb37   : > { %9773 = vmatprep.subr.mxu1 %v10265_v7 }
 0xbf6   : > { %v4202_v58 = vpop.f32.mrb[46].mxu0 }
 0xbf7   : > { %v4275_v59 = vpop.f32.mrb[42].mxu1  ;;  %v9712_v60 = vpop.f32.mrb[47].mxu0 }
 0xbf8   : > { %v4276_v61 = vadd.f32 %v4275_v59, %v4202_v58  ;;  %v9717_v62 = vpop.f32.mrb[43].mxu1 }
 0xbfb   : > { %v4350_v63 = vpop.f32.mrb[48].mxu0  ;;  %v4426_v1 = vpop.f32.mrb[44].mxu1 }
 0xbfc   : > { %v4354_v2 = vadd.f32 %v4350_v63, %v4276_v61  ;;  %v9722_v4 = vpop.f32.mrb[49].mxu0  ;;  %v9727_v5 = vpop.f32.mrb[45].mxu1 }
 0xbfe   : > { %v4430_v8 = vadd.f32 %v4426_v1, %v4354_v2  ;;  %v9078_v1 = vld [vmem:[%s11522_s6 + $0xc0] sm:$0xff]  ;;  %v9081_v2 = vld [vmem:[%s11522_s6 + $0xd8] sm:$0xff] }
 0xc00   : > { %v4436_v9 = vadd.f32 %v9069_v6, %v4430_v8 }
 0xc02   : > { %v10873_v10 = vadd.f32 %v4436_v9, %v10635_v36  ;;  %v4471_v36 = vld [vmem:[%s11526_s10 + $0x8] sm:$0xff] }
 0xc03   : > { %v10029_v19 = vpack.c.bf16 %v4471_v36, %v4470_v16 }
 0xc04   : > { %v4440_v11 = vsel %vm503_vm0, %v10873_v10, 0.0 }
 0xc05   : > { %4441 = vadd.xlane.f32.xlu0 %v4440_v11  ;;  %10030 = vmatpush3.bf16.msra.mxu0 %v10029_v19  ;;  %v9083_v19 = vld [vmem:[%s11522_s6 + $0xe8] sm:$0xff] }
 0xc06   : > { %10031 = vmatprep.subr.bf16.mxu0 %v10267_v18 }
 0xc09   : > { %10033 = vmatpush3.bf16.msra.mxu0 %v10032_v21  ;;  %v9085_v21 = vld [vmem:[%s11522_s6 + $0xf8] sm:$0xff] }
 0xc0a   : > { %9758 = vmatprep.subr.mxu0 %v10265_v7 }
 0xc92   : > { %v4442_v3 = vpop.xlane.xlu0 %4441 }
 0xc93   : > { %v4443_v12 = vmul.f32 0.03125, %v4442_v3 }
 0xc95   : > { %v4444_v13 = vsub.f32 %v10873_v10, %v4443_v12  ;;  %v9076_v12 = vld [vmem:[%s11520_s4 + $0x3] ss:$0 sm:$0xff] }
 0xc97   : > { %v4445_v14 = vmul.f32 %v4444_v13, %v4444_v13  ;;  %v4454_v41 = vmul.f32 %v9070_v40, %v4444_v13  ;;  %v9109_v40 = vld [vmem:[%s11523_s7 + $0x1f] ss:$0 sm:$0xff] }
 0xc99   : > { %v4446_v15 = vsel %vm503_vm0, %v4445_v14, 0.0 }
 0xc9a   : > { %4447 = vadd.xlane.f32.xlu1 %v4446_v15  ;;  %v9077_v15 = vld [vmem:[%s11521_s5 + $0x3] ss:$0 sm:$0xff] }
 0xd27   : > { %v4448_v31 = vpop.xlane.xlu1 %4447 }
 0xd28   : > { %v4449_v32 = vmul.f32 0.032258064, %v4448_v31 }
 0xd2a   : > { %10146 = vrsqrt.f32 %v4449_v32  ;;  %vm4457_vm7 = vcmp.eq.f32.partialorder %v4449_v32, inf  ;;  %v4460_v35 = vand.u32 2147483648, %v4449_v32  ;;  %vm4459_vm8 = vcmp.eq.f32.partialorder %v4449_v32, 0.0 }
 0xd34   : > { %v10147_v33 = vpop.eup %10146 }
 0xd35   : > { %v4456_v34 = vmul.f32 %v10147_v33, %v4449_v32 }
 0xd37   : > { %v4458_v37 = vsel %vm4457_vm7, %v4449_v32, %v4456_v34  ;;  %v9107_v32 = vld [vmem:[%s11523_s7 + $0x1d] ss:$0 sm:$0xff] }
 0xd38   : > { %v4461_v38 = vsel %vm4459_vm8, %v4460_v35, %v4458_v37  ;;  %v9103_v35 = vld [vmem:[%s11523_s7 + $0x19] ss:$0 sm:$0xff] }
 0xd39   : > { %v4462_v39 = vadd.f32 1e-06, %v4461_v38 }
 0xd3b   : > { %10148 = vrcp.f32 %v4462_v39 }
 0xd45   : > { %v10149_v42 = vpop.eup %10148 }
 0xd46   : > { %v4464_v0 = vmul.f32 %v10149_v42, %v4454_v41 }
 0xd48   : > { %v4469_v44 = vadd.f32 %v9071_v43, %v4464_v0  ;;  %v9105_v0 = vld [vmem:[%s11523_s7 + $0x1b] ss:$0 sm:$0xff] }
 0xd4a   : > { %9737 = vmatmul.mubr.msk.f32.vlgmr.msra.gmra.mrb[50].mxu0 %vm503_vm0, %v4469_v44 }
 0xd4b   : > { %9760 = vmatprep.mubr.msk.f32.mxu0 %vm10266_vm1, %v10265_v7  ;;  %9759 = vmatpush3.xpose.msk.msra.mxu0 %vm503_vm0, %v9078_v1 }
 0xd4c   : > { %9763 = vmatprep.subr.mxu0 %v10265_v7 }
 0xe1d   : > { %v4550_v49 = vpop.f32.mrb[50].mxu0 }
 0xe1e   : > { %v4551_v50 = vadd.f32 %v9072_v48, %v4550_v49  ;;  %v9738_v51 = vpop.f32.mrb[51].mxu0  ;;  %v9111_v48 = vld [vmem:[%s11523_s7 + $0x21] ss:$0 sm:$0xff] }
 0xe20   : > { %v4554_v52 = vmax.f32 %v4551_v50, 0.0 }
 0xe22   : > { %9756 = vmatmul.mubr.msk.f32.vlgmr.msra.gmra.mrb[46].mxu1 %vm4563_vm9, %v4554_v52  ;;  %v9102_v52 = vld [vmem:[%s11523_s7 + $0x18] ss:$0 sm:$0xff] }
 0xe23   : > { %9775 = vmatprep.mubr.msk.f32.mxu1 %vm10266_vm1, %v10265_v7  ;;  %9774 = vmatpush3.xpose.msk.msra.mxu1 %vm503_vm0, %v9081_v2 }
 0xe24   : > { %9783 = vmatprep.subr.mxu1 %v10265_v7 }
 0xef5   : > { %v4633_v53 = vpop.f32.mrb[46].mxu1 }
 0xef6   : > { %v4637_v55 = vadd.f32 %v4633_v53, %v10873_v10  ;;  %v9757_v56 = vpop.f32.mrb[47].mxu1 }
 0xef8   : > { %v10942_v57 = vadd.f32 %v9075_v54, %v4637_v55 }
 0xefa   : > { %v4648_v58 = vsel %vm503_vm0, %v10942_v57, 0.0 }
 0xefb   : > { %4649 = vadd.xlane.f32.xlu0 %v4648_v58  ;;  %v9108_v58 = vld [vmem:[%s11523_s7 + $0x1e] ss:$0 sm:$0xff] }
 0xf88   : > { %v4650_v59 = vpop.xlane.xlu0 %4649 }
 0xf89   : > { %v4651_v60 = vmul.f32 0.03125, %v4650_v59 }
 0xf8b   : > { %v4652_v61 = vsub.f32 %v10942_v57, %v4651_v60 }
 0xf8d   : > { %v4653_v62 = vmul.f32 %v4652_v61, %v4652_v61  ;;  %v4662_v13 = vmul.f32 %v9076_v12, %v4652_v61 }
 0xf8f   : > { %v4654_v63 = vsel %vm503_vm0, %v4653_v62, 0.0  ;;  %v9104_v62 = vld [vmem:[%s11523_s7 + $0x1a] ss:$0 sm:$0xff] }
 0xf90   : > { %4655 = vadd.xlane.f32.xlu1 %v4654_v63 }
0x101d   : > { %v4656_v4 = vpop.xlane.xlu1 %4655 }
0x101e   : > { %v4657_v5 = vmul.f32 0.032258064, %v4656_v4  ;;  %v9110_v4 = vld [vmem:[%s11523_s7 + $0x20] ss:$0 sm:$0xff] }
0x1020   : > { %10150 = vrsqrt.f32 %v4657_v5  ;;  %vm4665_vm10 = vcmp.eq.f32.partialorder %v4657_v5, inf  ;;  %v4668_v9 = vand.u32 2147483648, %v4657_v5  ;;  %vm4667_vm11 = vcmp.eq.f32.partialorder %v4657_v5, 0.0 }
0x102a   : > { %v10151_v6 = vpop.eup %10150 }
0x102b   : > { %v4664_v8 = vmul.f32 %v10151_v6, %v4657_v5 }
0x102d   : > { %v4666_v10 = vsel %vm4665_vm10, %v4657_v5, %v4664_v8 }
0x102e   : > { %v4669_v11 = vsel %vm4667_vm11, %v4668_v9, %v4666_v10 }
0x102f   : > { %v4670_v3 = vadd.f32 1e-06, %v4669_v11 }
0x1031   : > { %10152 = vrcp.f32 %v4670_v3 }
0x103b   : > { %v10153_v14 = vpop.eup %10152 }
0x103c   : > { %v4672_v16 = vmul.f32 %v10153_v14, %v4662_v13  ;;  %v10198_v14 = vld [vmem:[%s11539_s2] sm:$0xff]  ;;  %s11473_s2 = scalar_lea.hbm %s11530_s14, %s9265_s20 }
0x103e   : > { %v4677_v36 = vadd.f32 %v9077_v15, %v4672_v16 }
0x1040   : > { %9761 = vmatmul.mubr.msk.f32.vlgmr.msra.gmra.mrb[52].mxu0 %vm503_vm0, %v4677_v36  ;;  %9776 = vmatmul.mubr.msk.f32.vlgmr.msra.gmra.mrb[48].mxu1 %vm503_vm0, %v4677_v36 }
0x1041   : > { %9764 = vmatpush3.xpose.msk.msra.mxu0 %vm503_vm0, %v9079_v17  ;;  %9784 = vmatpush3.xpose.msk.msra.mxu1 %vm503_vm0, %v9083_v19 }
0x1042   : > { %9765 = vmatprep.mubr.msk.f32.mxu0 %vm10266_vm1, %v10265_v7  ;;  %9785 = vmatprep.mubr.msk.f32.mxu1 %vm10266_vm1, %v10265_v7 }
0x1043   : > { %9768 = vmatprep.subr.mxu0 %v10265_v7  ;;  %9793 = vmatprep.subr.mxu1 %v10265_v7 }
0x1044   : > { %9766 = vmatmul.mubr.msk.f32.vlgmr.msra.gmra.mrb[54].mxu0 %vm503_vm0, %v4677_v36  ;;  %9786 = vmatmul.mubr.msk.f32.vlgmr.msra.gmra.mrb[50].mxu1 %vm503_vm0, %v4677_v36 }
0x1045   : > { %9769 = vmatpush3.xpose.msk.msra.mxu0 %vm503_vm0, %v9080_v20  ;;  %9794 = vmatpush3.xpose.msk.msra.mxu1 %vm503_vm0, %v9085_v21 }
0x1046   : > { %9770 = vmatprep.mubr.msk.f32.mxu0 %vm10266_vm1, %v10265_v7  ;;  %9795 = vmatprep.mubr.msk.f32.mxu1 %vm10266_vm1, %v10265_v7 }
0x1047   : > { %9778 = vmatprep.subr.mxu0 %v10265_v7  ;;  %9803 = vmatprep.subr.mxu1 %v10265_v7 }
0x1048   : > { %9771 = vmatmul.mubr.msk.f32.vlgmr.msra.gmra.mrb[56].mxu0 %vm503_vm0, %v4677_v36  ;;  %9796 = vmatmul.mubr.msk.f32.vlgmr.msra.gmra.mrb[52].mxu1 %vm503_vm0, %v4677_v36 }
0x1049   : > { %9779 = vmatpush3.xpose.msk.msra.mxu0 %vm503_vm0, %v9082_v22  ;;  %9804 = vmatpush3.xpose.msk.msra.mxu1 %vm503_vm0, %v9087_v23 }
0x104a   : > { %9780 = vmatprep.mubr.msk.f32.mxu0 %vm10266_vm1, %v10265_v7  ;;  %9805 = vmatprep.mubr.msk.f32.mxu1 %vm10266_vm1, %v10265_v7 }
0x104b   : > { %9788 = vmatprep.subr.mxu0 %v10265_v7  ;;  %9813 = vmatprep.subr.mxu1 %v10265_v7 }
0x104c   : > { %9781 = vmatmul.mubr.msk.f32.vlgmr.msra.gmra.mrb[58].mxu0 %vm503_vm0, %v4677_v36  ;;  %9806 = vmatmul.mubr.msk.f32.vlgmr.msra.gmra.mrb[54].mxu1 %vm503_vm0, %v4677_v36 }
0x104d   : > { %9789 = vmatpush3.xpose.msk.msra.mxu0 %vm503_vm0, %v9084_v24  ;;  %9814 = vmatpush3.xpose.msk.msra.mxu1 %vm503_vm0, %v9089_v25 }
0x104e   : > { %9790 = vmatprep.mubr.msk.f32.mxu0 %vm10266_vm1, %v10265_v7  ;;  %9815 = vmatprep.mubr.msk.f32.mxu1 %vm10266_vm1, %v10265_v7 }
0x104f   : > { %9798 = vmatprep.subr.mxu0 %v10265_v7  ;;  %9823 = vmatprep.subr.mxu1 %v10265_v7 }
0x1050   : > { %9791 = vmatmul.mubr.msk.f32.vlgmr.msra.gmra.mrb[60].mxu0 %vm503_vm0, %v4677_v36  ;;  %9816 = vmatmul.mubr.msk.f32.vlgmr.msra.gmra.mrb[56].mxu1 %vm503_vm0, %v4677_v36 }
0x1051   : > { %9799 = vmatpush3.xpose.msk.msra.mxu0 %vm503_vm0, %v9086_v26  ;;  %9800 = vmatprep.mubr.msk.f32.mxu0 %vm10266_vm1, %v10265_v7 }
0x1052   : > { %9808 = vmatprep.subr.mxu0 %v10265_v7  ;;  %9825 = vmatprep.mubr.msk.f32.mxu1 %vm10266_vm1, %v10265_v7 }
0x1054   : > { %9801 = vmatmul.mubr.msk.f32.vlgmr.msra.gmra.mrb[62].mxu0 %vm503_vm0, %v4677_v36 }
0x1055   : > { %9809 = vmatpush3.xpose.msk.msra.mxu0 %vm503_vm0, %v9088_v27  ;;  %9810 = vmatprep.mubr.msk.f32.mxu0 %vm10266_vm1, %v10265_v7 }
0x1056   : > { %9818 = vmatprep.subr.mxu0 %v10265_v7 }
0x1058   : > { %9811 = vmatmul.mubr.msk.f32.vlgmr.msra.gmra.mrb[64].mxu0 %vm503_vm0, %v4677_v36 }
0x1059   : > { %9820 = vmatprep.mubr.msk.f32.mxu0 %vm10266_vm1, %v10265_v7 }
0x1113   : > { %v4848_v28 = vpop.f32.mrb[52].mxu0  ;;  %v5067_v29 = vpop.f32.mrb[48].mxu1 }
0x1114   : > { %v9762_v30 = vpop.f32.mrb[53].mxu0  ;;  %v9777_v31 = vpop.f32.mrb[49].mxu1  ;;  %v5068_v49 = vadd.f32 %v9105_v0, %v5067_v29  ;;  %v4849_v59 = vadd.f32 %v9102_v52, %v4848_v28 }
0x1117   : > { %v4921_v33 = vpop.f32.mrb[54].mxu0  ;;  %v5213_v34 = vpop.f32.mrb[50].mxu1 }
0x1118   : > { %v5214_v37 = vadd.f32 %v9107_v32, %v5213_v34  ;;  %v9767_v38 = vpop.f32.mrb[55].mxu0  ;;  %v9787_v39 = vpop.f32.mrb[51].mxu1  ;;  %v4922_v41 = vadd.f32 %v9103_v35, %v4921_v33 }
0x111a   : > { %9824 = vmatpush3.xpose.msk.msra.mxu1 %vm1510_vm4, %v5214_v37 }
0x111b   : > { %v4994_v42 = vpop.f32.mrb[56].mxu0  ;;  %v5359_v43 = vpop.f32.mrb[52].mxu1  ;;  %9833 = vmatprep.subr.mxu1 %v10265_v7 }
0x111c   : > { %v5360_v44 = vadd.f32 %v9109_v40, %v5359_v43  ;;  %v9772_v45 = vpop.f32.mrb[57].mxu0  ;;  %v9797_v46 = vpop.f32.mrb[53].mxu1  ;;  %v4995_v5 = vadd.f32 %v9104_v62, %v4994_v42 }
0x111d   : > { %9826 = vmatmul.mubr.msk.f32.vlgmr.msra.gmra.mrb[58].mxu1 %vm1510_vm4, %v4922_v41 }
0x111e   : > { %9834 = vmatpush3.xpose.msk.msra.mxu1 %vm1510_vm4, %v5360_v44  ;;  %9835 = vmatprep.mubr.msk.f32.mxu1 %vm10266_vm1, %v10265_v7 }
0x111f   : > { %v5140_v50 = vpop.f32.mrb[58].mxu0  ;;  %v5505_v51 = vpop.f32.mrb[54].mxu1  ;;  %9843 = vmatprep.subr.mxu1 %v10265_v7 }
0x1120   : > { %v5141_v53 = vadd.f32 %v9106_v47, %v5140_v50  ;;  %v5506_v54 = vadd.f32 %v9111_v48, %v5505_v51  ;;  %v9782_v55 = vpop.f32.mrb[59].mxu0  ;;  %v9807_v56 = vpop.f32.mrb[55].mxu1 }
0x1121   : > { %9836 = vmatmul.mubr.msk.f32.vlgmr.msra.gmra.mrb[60].mxu1 %vm1510_vm4, %v5068_v49  ;;  %v9113_v55 = vld [vmem:[%s11523_s7 + $0x23] ss:$0 sm:$0xff] }
0x1122   : > { %9819 = vmatpush3.xpose.msk.msra.mxu0 %vm1510_vm4, %v5141_v53  ;;  %9844 = vmatpush3.msra.mxu1 %v5506_v54 }
0x1123   : > { %v5286_v60 = vpop.f32.mrb[60].mxu0  ;;  %v11083_v61 = vpop.f32.mrb[56].mxu1  ;;  %9828 = vmatprep.subr.mxu0 %v10265_v7  ;;  %9845 = vmatprep.mubr.msk.f32.mxu1 %vm10266_vm1, %v10265_v7 }
0x1124   : > { %v5287_v63 = vadd.f32 %v9108_v58, %v5286_v60  ;;  %v9792_v1 = vpop.f32.mrb[61].mxu0  ;;  %v9817_v2 = vpop.f32.mrb[57].mxu1  ;;  %9853 = vmatprep.subr.mxu1 %v10265_v7  ;;  %v5652_v60 = vadd.f32 %v9113_v55, %v11083_v61  ;;  %v9164_v55 = vld [vmem:[%s11522_s6 + $0x138] sm:$0xff] }
0x1125   : > { %9821 = vmatmul.mubr.msk.f32.vlgmr.msra.gmra.mrb[66].mxu0 %vm1510_vm4, %v4849_v59  ;;  %v9112_v1 = vld [vmem:[%s11523_s7 + $0x22] ss:$0 sm:$0xff] }
0x1126   : > { %9829 = vmatpush3.xpose.msk.msra.mxu0 %vm1510_vm4, %v5287_v63  ;;  %9830 = vmatprep.mubr.msk.f32.mxu0 %vm10266_vm1, %v10265_v7 }
0x1127   : > { %v5432_v6 = vpop.f32.mrb[62].mxu0  ;;  %9838 = vmatprep.subr.mxu0 %v10265_v7 }
0x1128   : > { %v5433_v8 = vadd.f32 %v9110_v4, %v5432_v6  ;;  %v9802_v9 = vpop.f32.mrb[63].mxu0 }
0x1129   : > { %9831 = vmatmul.mubr.msk.f32.vlgmr.msra.gmra.mrb[68].mxu0 %vm1510_vm4, %v4995_v5  ;;  %v9150_v9 = vld [vmem:[%s11524_s8 + $0x40] sm:$0xff] }
0x112a   : > { %9839 = vmatpush3.msra.mxu0 %v5433_v8  ;;  %9840 = vmatprep.mubr.msk.f32.mxu0 %vm10266_vm1, %v10265_v7  ;;  %v9151_v8 = vld [vmem:[%s11524_s8 + $0x48] sm:$0xff] }
0x112b   : > { %v11103_v10 = vpop.f32.mrb[64].mxu0  ;;  %9848 = vmatprep.subr.mxu0 %v10265_v7 }
0x112c   : > { %v9812_v11 = vpop.f32.mrb[65].mxu0  ;;  %v5579_v4 = vadd.f32 %v9112_v1, %v11103_v10  ;;  %v9154_v10 = vld [vmem:[%s11524_s8 + $0x50] sm:$0xff]  ;;  %v9186_v1 = vld [vmem:[%s11522_s6 + $0x168] sm:$0xff] }
0x11f0   : > { %v5803_v3 = vpop.f32.mrb[58].mxu1 }
0x11f1   : > { %v5960_v12 = vmul.f32 0.35355338, %v5803_v3  ;;  %v9827_v13 = vpop.f32.mrb[59].mxu1 }
0x11f3   : > { %v5964_v15 = vadd.f32 %v10198_v14, %v5960_v12 }
0x11f4   : > { %v5955_v16 = vpop.f32.mrb[60].mxu1 }
0x11f5   : > { %v5962_v36 = vmul.f32 0.35355338, %v5955_v16  ;;  %v9837_v17 = vpop.f32.mrb[61].mxu1  ;;  %v5970_v19 = vsel %vm1510_vm4, %v5964_v15, -inf }
0x11f6   : > { %5971 = vmax.xlane.f32.xlu1 %v5970_v19 }
0x11f7   : > { %v5966_v20 = vadd.f32 %v10198_v14, %v5962_v36 }
0x11f8   : > { %v5727_v21 = vpop.f32.mrb[66].mxu0 }
0x11f9   : > { %v5959_v22 = vmul.f32 0.35355338, %v5727_v21  ;;  %v9822_v23 = vpop.f32.mrb[67].mxu0  ;;  %v5976_v24 = vsel %vm1510_vm4, %v5966_v20, -inf }
0x11fa   : > { %5977 = vmax.xlane.f32.xlu1 %v5976_v24 }
0x11fb   : > { %v5963_v25 = vadd.f32 %v10198_v14, %v5959_v22 }
0x11fc   : > { %v5879_v26 = vpop.f32.mrb[68].mxu0 }
0x11fd   : > { %v5961_v27 = vmul.f32 0.35355338, %v5879_v26  ;;  %v9832_v28 = vpop.f32.mrb[69].mxu0  ;;  %v5967_v29 = vsel %vm1510_vm4, %v5963_v25, -inf }
0x11fe   : > { %5968 = vmax.xlane.f32.xlu0 %v5967_v29  ;;  %v9158_v29 = vld [vmem:[%s11525_s9 + $0x2] ss:$0 sm:$0xff] }
0x11ff   : > { %v5965_v30 = vadd.f32 %v10198_v14, %v5961_v27  ;;  %v9156_v14 = vld [vmem:[%s11524_s8 + $0x58] sm:$0xff] }
0x1201   : > { %v5973_v31 = vsel %vm1510_vm4, %v5965_v30, -inf }
0x1202   : > { %5974 = vmax.xlane.f32.xlu0 %v5973_v31 }
0x1283   : > { %v5972_v32 = vpop.xlane.xlu1 %5971 }
0x1284   : > { %v5980_v33 = vsub.f32 %v5964_v15, %v5972_v32 }
0x1286   : > { %v5985_v34 = vmul.f32 1.442695, %v5980_v33 }
0x1287   : > { %v5978_v35 = vpop.xlane.xlu1 %5977 }
0x1288   : > { %10154 = vpow2.f32 %v5985_v34  ;;  %v5982_v37 = vsub.f32 %v5966_v20, %v5978_v35 }
0x128a   : > { %v5989_v38 = vmul.f32 1.442695, %v5982_v37 }
0x128b   : > { %v5969_v39 = vpop.xlane.xlu0 %5968 }
0x128c   : > { %10156 = vpow2.f32 %v5989_v38  ;;  %v5979_v40 = vsub.f32 %v5963_v25, %v5969_v39 }
0x128e   : > { %v5983_v41 = vmul.f32 1.442695, %v5979_v40  ;;  %v9161_v40 = vld [vmem:[%s11522_s6 + $0x120] sm:$0xff] }
0x128f   : > { %v5975_v42 = vpop.xlane.xlu0 %5974 }
0x1290   : > { %10158 = vpow2.f32 %v5983_v41  ;;  %v5981_v43 = vsub.f32 %v5965_v30, %v5975_v42 }
0x1292   : > { %v10155_v0 = vpop.eup %10154  ;;  %v5987_v44 = vmul.f32 1.442695, %v5981_v43 }
0x1293   : > { %v5994_v45 = vsel %vm1510_vm4, %v10155_v0, 0.0 }
0x1294   : > { %10160 = vpow2.f32 %v5987_v44  ;;  %5995 = vadd.xlane.f32.xlu1 %v5994_v45 }
0x1296   : > { %v10157_v46 = vpop.eup %10156 }
0x1297   : > { %v6000_v47 = vsel %vm1510_vm4, %v10157_v46, 0.0 }
0x1298   : > { %6001 = vadd.xlane.f32.xlu1 %v6000_v47 }
0x129a   : > { %v10159_v48 = vpop.eup %10158 }
0x129b   : > { %v5991_v49 = vsel %vm1510_vm4, %v10159_v48, 0.0 }
0x129c   : > { %5992 = vadd.xlane.f32.xlu0 %v5991_v49 }
0x129e   : > { %v10161_v50 = vpop.eup %10160 }
0x129f   : > { %v5997_v51 = vsel %vm1510_vm4, %v10161_v50, 0.0 }
0x12a0   : > { %5998 = vadd.xlane.f32.xlu0 %v5997_v51  ;;  %v9160_v51 = vld [vmem:[%s11521_s5 + $0x4] ss:$0 sm:$0xff] }
0x1321   : > { %v5996_v52 = vpop.xlane.xlu1 %5995 }
0x1322   : > { %10162 = vrcp.f32 %v5996_v52 }
0x1325   : > { %v6002_v53 = vpop.xlane.xlu1 %6001 }
0x1326   : > { %10164 = vrcp.f32 %v6002_v53 }
0x1329   : > { %v5993_v54 = vpop.xlane.xlu0 %5992 }
0x132a   : > { %10166 = vrcp.f32 %v5993_v54  ;;  %v9163_v54 = vld [vmem:[%s11522_s6 + $0x130] sm:$0xff] }
0x132c   : > { %v10163_v56 = vpop.eup %10162 }
0x132d   : > { %v6006_v58 = vmul.f32 %v10163_v56, %v10155_v0  ;;  %v5999_v59 = vpop.xlane.xlu0 %5998  ;;  %v9181_v56 = vld [vmem:[%s11522_s6 + $0x140] sm:$0xff] }
0x132e   : > { %10168 = vrcp.f32 %v5999_v59  ;;  %v9183_v59 = vld [vmem:[%s11522_s6 + $0x150] sm:$0xff] }
0x132f   : > { %9846 = vmatmul.mubr.msk.f32.vlgmr.msra.gmra.mrb[62].mxu1 %vm1510_vm4, %v6006_v58  ;;  %v9182_v58 = vld [vmem:[%s11522_s6 + $0x148] sm:$0xff] }
0x1330   : > { %v10165_v62 = vpop.eup %10164  ;;  %9854 = vmatpush3.msra.mxu1 %v5652_v60  ;;  %9855 = vmatprep.mubr.msk.f32.mxu1 %vm10266_vm1, %v10265_v7  ;;  %v9184_v60 = vld [vmem:[%s11522_s6 + $0x158] sm:$0xff] }
0x1331   : > { %v6010_v63 = vmul.f32 %v10165_v62, %v10157_v46  ;;  %9863 = vmatprep.subr.mxu1 %v10265_v7  ;;  %v10199_v62 = vld [vmem:[%s10671_s0] sm:$0xff]  ;;  %s8925_s0 = sshll.u32 %s482_s28, 3 }
0x1332   : > { %s484_s21 = scalar_lea.vmem [#allocation2], %s8925_s0  ;;  %s10205_s0 = sshll.u32 %s10268_s17, 4  ;;  %s10206_s0 = int_to_ptr.vmem [resolvable:$false] %s10205_s0 }
0x1333   : > { %9856 = vmatmul.mubr.msk.f32.vlgmr.msra.gmra.mrb[64].mxu1 %vm1510_vm4, %v6010_v63  ;;  %v9185_v63 = vld [vmem:[%s11522_s6 + $0x160] sm:$0xff]  ;;  %s8838_s25 = sshll.u32 %s484_s21, 4  ;;  %s10207_s26 = scalar_lea.vmem %s10206_s0, 256  ;;  %s11475_s25 = int_to_ptr.vmem [resolvable:$true] %s8838_s25 }
0x1334   : > { %v10167_v2 = vpop.eup %10166  ;;  %9865 = vmatprep.mubr.msk.f32.mxu1 %vm10266_vm1, %v10265_v7  ;;  %9864 = vmatpush3.msra.mxu1 %v9150_v9  ;;  %s10201_s18 = scalar_lea.vmem %s11475_s25, 128  ;;  %p10208_p0 = scmp.lt.s32.totalorder %s11475_s25, %s10206_s0 }
0x1335   : > { %v6004_v61 = vmul.f32 %v10167_v2, %v10159_v48  ;;  %9873 = vmatprep.subr.mxu1 %v10265_v7  ;;  %v9159_v48 = vld [vmem:[%s11520_s4 + $0x4] ss:$0 sm:$0xff]  ;;  %v9187_v2 = vld [vmem:[%s11522_s6 + $0x170] sm:$0xff]  ;;  %p10202_p11 = scmp.ne.s32.totalorder %s11475_s25, %s10201_s18  ;;  %p10209_p1 = scmp.lt.s32.totalorder %s10207_s26, %s10201_s18 }
0x1337   : > { %9841 = vmatmul.mubr.msk.f32.vlgmr.msra.gmra.mrb[70].mxu0 %vm1510_vm4, %v6004_v61  ;;  %v9188_v61 = vld [vmem:[%s11522_s6 + $0x178] sm:$0xff]  ;;  %p10203_p12 = pnand %p10202_p11, %p10382_p5  ;;  %p10210_p2 = por %p10209_p1, %p10208_p0 }
0x1338   : > { %v10169_v5 = vpop.eup %10168  ;;  %9849 = vmatpush3.msra.mxu0 %v5579_v4  ;;  %9850 = vmatprep.mubr.msk.f32.mxu0 %vm10266_vm1, %v10265_v7 }
0x1339   : > { %v6008_v6 = vmul.f32 %v10169_v5, %v10161_v50  ;;  %9858 = vmatprep.subr.mxu0 %v10265_v7  ;;  %p10204_p13 = pneg %p10203_p12 }
0x133b   : > { %9851 = vmatmul.mubr.msk.f32.vlgmr.msra.gmra.mrb[72].mxu0 %vm1510_vm4, %v6008_v6  ;;  %p10211_p3 = pnand %p10210_p2, %p10204_p13 }
0x133c   : > { %9860 = vmatprep.mubr.msk.f32.mxu0 %vm10266_vm1, %v10265_v7  ;;  %9859 = vmatpush3.msra.mxu0 %v9151_v8 }
0x133d   : > { %9868 = vmatprep.subr.mxu0 %v10265_v7 }
0x1402   : > { %v6153_v11 = vpop.f32.mrb[62].mxu1 }
0x1403   : > { %v9847_v3 = vpop.f32.mrb[63].mxu1  ;;  %9861 = vmatmul.mubr.msk.f32.vlgmr.msra.gmra.mrb[74].mxu0 %vm1510_vm4, %v6153_v11 }
0x1404   : > { %9869 = vmatpush3.msra.mxu0 %v9154_v10  ;;  %9870 = vmatprep.mubr.msk.f32.mxu0 %vm10266_vm1, %v10265_v7 }
0x1405   : > { %9878 = vmatprep.subr.mxu0 %v10265_v7 }
0x1406   : > { %v6299_v12 = vpop.f32.mrb[64].mxu1 }
0x1407   : > { %v9857_v13 = vpop.f32.mrb[65].mxu1 }
0x1408   : > { %v9198_v13 = vld [vmem:[%s11523_s7 + $0x29] ss:$0 sm:$0xff] }
0x140a   : > { %v6080_v15 = vpop.f32.mrb[70].mxu0 }
0x140b   : > { %v9842_v16 = vpop.f32.mrb[71].mxu0  ;;  %9866 = vmatmul.mubr.msk.f32.vlgmr.msra.gmra.mrb[66].mxu1 %vm1510_vm4, %v6080_v15 }
0x140c   : > { %9874 = vmatpush3.msra.mxu1 %v9156_v14  ;;  %9875 = vmatprep.mubr.msk.f32.mxu1 %vm10266_vm1, %v10265_v7  ;;  %v9169_v16 = vld [vmem:[%s11523_s7 + $0x24] ss:$0 sm:$0xff] }
0x140d   : > { %9883 = vmatprep.subr.mxu1 %v10265_v7 }
0x140e   : > { %v6226_v36 = vpop.f32.mrb[72].mxu0 }
0x140f   : > { %v9852_v17 = vpop.f32.mrb[73].mxu0  ;;  %9871 = vmatmul.mubr.msk.f32.vlgmr.msra.gmra.mrb[76].mxu0 %vm1510_vm4, %v6226_v36  ;;  %9876 = vmatmul.mubr.msk.f32.vlgmr.msra.gmra.mrb[68].mxu1 %vm1510_vm4, %v6299_v12  ;;  %v9197_v12 = vld [vmem:[%s11523_s7 + $0x28] ss:$0 sm:$0xff]  ;;  %v9170_v36 = vld [vmem:[%s11523_s7 + $0x25] ss:$0 sm:$0xff] }
0x1410   : > { %9880 = vmatprep.mubr.msk.f32.mxu0 %vm10266_vm1, %v10265_v7  ;;  %9885 = vmatprep.mubr.msk.f32.mxu1 %vm10266_vm1, %v10265_v7 }
0x1411   : > { %9879 = vmatpush3.xpose.msk.msra.mxu0 %vm503_vm0, %v9161_v40 }
0x1412   : > { %9888 = vmatprep.subr.mxu0 %v10265_v7 }
0x14d6   : > { %v6376_v19 = vpop.f32.mrb[74].mxu0 }
0x14d7   : > { %v9862_v20 = vpop.f32.mrb[75].mxu0 }
0x14de   : > { %v6449_v21 = vpop.f32.mrb[66].mxu1 }
0x14df   : > { %v6450_v22 = vadd.f32 %v6449_v21, %v6376_v19  ;;  %v9867_v23 = vpop.f32.mrb[67].mxu1 }
0x14e0   : > { %v9200_v23 = vld [vmem:[%s11523_s7 + $0x2b] ss:$0 sm:$0xff] }
0x14e2   : > { %v6524_v24 = vpop.f32.mrb[76].mxu0  ;;  %v6600_v25 = vpop.f32.mrb[68].mxu1 }
0x14e3   : > { %v6528_v26 = vadd.f32 %v6524_v24, %v6450_v22  ;;  %v9872_v27 = vpop.f32.mrb[77].mxu0  ;;  %v9877_v28 = vpop.f32.mrb[69].mxu1  ;;  %v9199_v22 = vld [vmem:[%s11523_s7 + $0x2a] ss:$0 sm:$0xff] }
0x14e4   : > { %v9171_v28 = vld [vmem:[%s11523_s7 + $0x26] ss:$0 sm:$0xff] }
0x14e5   : > { %v6604_v30 = vadd.f32 %v6600_v25, %v6528_v26 }
0x14e7   : > { %v6610_v31 = vadd.f32 %v9158_v29, %v6604_v30  ;;  %v9172_v29 = vld [vmem:[%s11523_s7 + $0x27] ss:$0 sm:$0xff] }
0x14e9   : > { %v11171_v32 = vadd.f32 %v6610_v31, %v10942_v57  ;;  %v9162_v57 = vld [vmem:[%s11522_s6 + $0x128] sm:$0xff] }
0x14ea   : > { %9884 = vmatpush3.xpose.msk.msra.mxu1 %vm503_vm0, %v9162_v57 }
0x14eb   : > { %v6614_v33 = vsel %vm503_vm0, %v11171_v32, 0.0  ;;  %9893 = vmatprep.subr.mxu1 %v10265_v7 }
0x14ec   : > { %6615 = vadd.xlane.f32.xlu0 %v6614_v33 }
0x1579   : > { %v6616_v34 = vpop.xlane.xlu0 %6615 }
0x157a   : > { %v6617_v35 = vmul.f32 0.03125, %v6616_v34 }
0x157c   : > { %v6618_v37 = vsub.f32 %v11171_v32, %v6617_v35 }
0x157e   : > { %v6619_v38 = vmul.f32 %v6618_v37, %v6618_v37  ;;  %v6628_v49 = vmul.f32 %v9159_v48, %v6618_v37 }
0x1580   : > { %v6620_v39 = vsel %vm503_vm0, %v6619_v38, 0.0  ;;  %v9201_v38 = vld [vmem:[%s11523_s7 + $0x2c] ss:$0 sm:$0xff] }
0x1581   : > { %6621 = vadd.xlane.f32.xlu1 %v6620_v39  ;;  %v9202_v39 = vld [vmem:[%s11523_s7 + $0x2d] ss:$0 sm:$0xff] }
0x160e   : > { %v6622_v41 = vpop.xlane.xlu1 %6621 }
0x160f   : > { %v6623_v42 = vmul.f32 0.032258064, %v6622_v41 }
0x1611   : > { %10170 = vrsqrt.f32 %v6623_v42  ;;  %vm6631_vm12 = vcmp.eq.f32.partialorder %v6623_v42, inf  ;;  %v6634_v44 = vand.u32 2147483648, %v6623_v42  ;;  %vm6633_vm13 = vcmp.eq.f32.partialorder %v6623_v42, 0.0 }
0x161b   : > { %v10171_v43 = vpop.eup %10170 }
0x161c   : > { %v6630_v0 = vmul.f32 %v10171_v43, %v6623_v42 }
0x161e   : > { %v6632_v45 = vsel %vm6631_vm12, %v6623_v42, %v6630_v0 }
0x161f   : > { %v6635_v46 = vsel %vm6633_vm13, %v6634_v44, %v6632_v45 }
0x1620   : > { %v6636_v47 = vadd.f32 1e-06, %v6635_v46 }
0x1622   : > { %10172 = vrcp.f32 %v6636_v47 }
0x162c   : > { %v10173_v50 = vpop.eup %10172 }
0x162d   : > { %v6638_v52 = vmul.f32 %v10173_v50, %v6628_v49 }
0x162f   : > { %v6643_v53 = vadd.f32 %v9160_v51, %v6638_v52 }
0x1631   : > { %9881 = vmatmul.mubr.msk.f32.vlgmr.msra.gmra.mrb[78].mxu0 %vm503_vm0, %v6643_v53  ;;  %9886 = vmatmul.mubr.msk.f32.vlgmr.msra.gmra.mrb[70].mxu1 %vm503_vm0, %v6643_v53 }
0x1632   : > { %9889 = vmatpush3.xpose.msk.msra.mxu0 %vm503_vm0, %v9163_v54  ;;  %9894 = vmatpush3.xpose.msk.msra.mxu1 %vm503_vm0, %v9164_v55  ;;  %v10200_v54 = vld [vmem:[%s10810_s22] sm:$0xff] }
0x1633   : > { %9890 = vmatprep.mubr.msk.f32.mxu0 %vm10266_vm1, %v10265_v7  ;;  %9895 = vmatprep.mubr.msk.f32.mxu1 %vm10266_vm1, %v10265_v7 }
0x1634   : > { %9898 = vmatprep.subr.mxu0 %v10265_v7  ;;  %9903 = vmatprep.subr.mxu1 %v10265_v7 }
0x1635   : > { %9891 = vmatmul.mubr.msk.f32.vlgmr.msra.gmra.mrb[80].mxu0 %vm503_vm0, %v6643_v53  ;;  %9896 = vmatmul.mubr.msk.f32.vlgmr.msra.gmra.mrb[72].mxu1 %vm503_vm0, %v6643_v53 }
0x1636   : > { %9899 = vmatpush3.xpose.msk.msra.mxu0 %vm503_vm0, %v9181_v56  ;;  %9904 = vmatpush3.xpose.msk.msra.mxu1 %vm503_vm0, %v9182_v58 }
0x1637   : > { %9900 = vmatprep.mubr.msk.f32.mxu0 %vm10266_vm1, %v10265_v7  ;;  %9905 = vmatprep.mubr.msk.f32.mxu1 %vm10266_vm1, %v10265_v7 }
0x1638   : > { %9908 = vmatprep.subr.mxu0 %v10265_v7  ;;  %9913 = vmatprep.subr.mxu1 %v10265_v7 }
0x1639   : > { %9901 = vmatmul.mubr.msk.f32.vlgmr.msra.gmra.mrb[82].mxu0 %vm503_vm0, %v10199_v62  ;;  %9906 = vmatmul.mubr.msk.f32.vlgmr.msra.gmra.mrb[74].mxu1 %vm503_vm0, %v10199_v62 }
0x163a   : > { %9909 = vmatpush3.xpose.msk.msra.mxu0 %vm503_vm0, %v9183_v59  ;;  %9914 = vmatpush3.xpose.msk.msra.mxu1 %vm503_vm0, %v9184_v60 }
0x163b   : > { %9910 = vmatprep.mubr.msk.f32.mxu0 %vm10266_vm1, %v10265_v7  ;;  %9915 = vmatprep.mubr.msk.f32.mxu1 %vm10266_vm1, %v10265_v7 }
0x163c   : > { %9918 = vmatprep.subr.mxu0 %v10265_v7  ;;  %9923 = vmatprep.subr.mxu1 %v10265_v7 }
0x163d   : > { %9911 = vmatmul.mubr.msk.f32.vlgmr.msra.gmra.mrb[84].mxu0 %vm503_vm0, %v10199_v62  ;;  %9916 = vmatmul.mubr.msk.f32.vlgmr.msra.gmra.mrb[76].mxu1 %vm503_vm0, %v10199_v62 }
0x163e   : > { %9920 = vmatprep.mubr.msk.f32.mxu0 %vm10266_vm1, %v10265_v7  ;;  %9925 = vmatprep.mubr.msk.f32.mxu1 %vm10266_vm1, %v10265_v7 }
0x163f   : > { %9919 = vmatpush3.xpose.msk.msra.mxu0 %vm503_vm0, %v9185_v63  ;;  %9924 = vmatpush3.xpose.msk.msra.mxu1 %vm503_vm0, %v9186_v1 }
0x1640   : > { %9928 = vmatprep.subr.mxu0 %v10265_v7  ;;  %9933 = vmatprep.subr.mxu1 %v10265_v7 }
0x1642   : > { %9921 = vmatmul.mubr.msk.f32.vlgmr.msra.gmra.mrb[86].mxu0 %vm503_vm0, %v10199_v62  ;;  %9926 = vmatmul.mubr.msk.f32.vlgmr.msra.gmra.mrb[78].mxu1 %vm503_vm0, %v10199_v62 }
0x1643   : > { %9929 = vmatpush3.xpose.msk.msra.mxu0 %vm503_vm0, %v9187_v2  ;;  %9934 = vmatpush3.xpose.msk.msra.mxu1 %vm503_vm0, %v9188_v61 }
0x1644   : > { %9930 = vmatprep.mubr.msk.f32.mxu0 %vm10266_vm1, %v10265_v7  ;;  %9935 = vmatprep.mubr.msk.f32.mxu1 %vm10266_vm1, %v10265_v7 }
0x1645   : > { %9938 = vmatprep.subr.mxu0 %v10265_v7  ;;  %9943 = vmatprep.subr.mxu1 %v10265_v7 }
0x1646   : > { %9931 = vmatmul.mubr.msk.f32.vlgmr.msra.gmra.mrb[88].mxu0 %vm503_vm0, %v10199_v62  ;;  %9936 = vmatmul.mubr.msk.f32.vlgmr.msra.gmra.mrb[80].mxu1 %vm503_vm0, %v10199_v62 }
0x1647   : > { %9940 = vmatprep.mubr.msk.f32.mxu0 %vm10266_vm1, %v10265_v7  ;;  %9945 = vmatprep.mubr.msk.f32.mxu1 %vm10266_vm1, %v10265_v7 }
0x1704   : > { %v6750_v4 = vpop.f32.mrb[78].mxu0  ;;  %v6823_v5 = vpop.f32.mrb[70].mxu1 }
0x1705   : > { %v9882_v6 = vpop.f32.mrb[79].mxu0  ;;  %v9887_v8 = vpop.f32.mrb[71].mxu1  ;;  %v6751_v24 = vadd.f32 %v9169_v16, %v6750_v4  ;;  %v6824_v25 = vadd.f32 %v9170_v36, %v6823_v5 }
0x1708   : > { %v6896_v9 = vpop.f32.mrb[80].mxu0  ;;  %v6969_v10 = vpop.f32.mrb[72].mxu1 }
0x1709   : > { %v9892_v11 = vpop.f32.mrb[81].mxu0  ;;  %v9897_v3 = vpop.f32.mrb[73].mxu1  ;;  %v6897_v35 = vadd.f32 %v9171_v28, %v6896_v9  ;;  %v6970_v37 = vadd.f32 %v9172_v29, %v6969_v10 }
0x170c   : > { %v7108_v14 = vpop.f32.mrb[82].mxu0  ;;  %v7181_v15 = vpop.f32.mrb[74].mxu1 }
0x170d   : > { %v7109_v17 = vadd.f32 %v9197_v12, %v7108_v14  ;;  %v7182_v19 = vadd.f32 %v9198_v13, %v7181_v15  ;;  %v9902_v20 = vpop.f32.mrb[83].mxu0  ;;  %v9907_v21 = vpop.f32.mrb[75].mxu1 }
0x170f   : > { %9939 = vmatpush3.xpose.msk.msra.mxu0 %vm1510_vm4, %v7109_v17  ;;  %9944 = vmatpush3.xpose.msk.msra.mxu1 %vm1510_vm4, %v7182_v19 }
0x1710   : > { %v7254_v26 = vpop.f32.mrb[84].mxu0  ;;  %v7327_v27 = vpop.f32.mrb[76].mxu1  ;;  %9948 = vmatprep.subr.mxu0 %v10265_v7  ;;  %9953 = vmatprep.subr.mxu1 %v10265_v7 }
0x1711   : > { %v7255_v30 = vadd.f32 %v9199_v22, %v7254_v26  ;;  %v7328_v31 = vadd.f32 %v9200_v23, %v7327_v27  ;;  %v9912_v33 = vpop.f32.mrb[85].mxu0  ;;  %v9917_v34 = vpop.f32.mrb[77].mxu1 }
0x1712   : > { %9941 = vmatmul.mubr.msk.f32.vlgmr.msra.gmra.mrb[90].mxu0 %vm1510_vm4, %v6751_v24  ;;  %9946 = vmatmul.mubr.msk.f32.vlgmr.msra.gmra.mrb[82].mxu1 %vm1510_vm4, %v6824_v25  ;;  %v9204_v33 = vld [vmem:[%s11523_s7 + $0x2f] ss:$0 sm:$0xff] }
0x1713   : > { %9949 = vmatpush3.xpose.msk.msra.mxu0 %vm1510_vm4, %v7255_v30  ;;  %9954 = vmatpush3.xpose.msk.msra.mxu1 %vm1510_vm4, %v7328_v31 }
0x1714   : > { %9950 = vmatprep.mubr.msk.f32.mxu0 %vm10266_vm1, %v10265_v7  ;;  %9955 = vmatprep.mubr.msk.f32.mxu1 %vm10266_vm1, %v10265_v7 }
0x1715   : > { %9958 = vmatprep.subr.mxu0 %v10265_v7  ;;  %9963 = vmatprep.subr.mxu1 %v10265_v7  ;;  %v7400_v40 = vpop.f32.mrb[86].mxu0  ;;  %v7473_v57 = vpop.f32.mrb[78].mxu1 }
0x1716   : > { %9951 = vmatmul.mubr.msk.f32.vlgmr.msra.gmra.mrb[92].mxu0 %vm1510_vm4, %v6897_v35  ;;  %9956 = vmatmul.mubr.msk.f32.vlgmr.msra.gmra.mrb[84].mxu1 %vm1510_vm4, %v6970_v37  ;;  %v7401_v41 = vadd.f32 %v9201_v38, %v7400_v40  ;;  %v7474_v42 = vadd.f32 %v9202_v39, %v7473_v57  ;;  %v9922_v43 = vpop.f32.mrb[87].mxu0  ;;  %v9927_v0 = vpop.f32.mrb[79].mxu1  ;;  %v9203_v35 = vld [vmem:[%s11523_s7 + $0x2e] ss:$0 sm:$0xff] }
0x1717   : > { %9960 = vmatprep.mubr.msk.f32.mxu0 %vm10266_vm1, %v10265_v7  ;;  %9965 = vmatprep.mubr.msk.f32.mxu1 %vm10266_vm1, %v10265_v7 }
0x1718   : > { %9959 = vmatpush3.msra.mxu0 %v7401_v41  ;;  %9964 = vmatpush3.msra.mxu1 %v7474_v42 }
0x1719   : > { %v11330_v44 = vpop.f32.mrb[88].mxu0  ;;  %v11332_v45 = vpop.f32.mrb[80].mxu1  ;;  %9968 = vmatprep.subr.mxu0 %v10265_v7  ;;  %9973 = vmatprep.subr.mxu1 %v10265_v7 }
0x171a   : > { %v9932_v46 = vpop.f32.mrb[89].mxu0  ;;  %v9937_v47 = vpop.f32.mrb[81].mxu1  ;;  %v7620_v39 = vadd.f32 %v9204_v33, %v11332_v45  ;;  %v7547_v57 = vadd.f32 %v9203_v35, %v11330_v44  ;;  %v9234_v44 = vld [vmem:[%s11524_s8 + $0x68] sm:$0xff]  ;;  %v9233_v45 = vld [vmem:[%s11524_s8 + $0x60] sm:$0xff] }
0x171b   : > { %v9237_v46 = vld [vmem:[%s11524_s8 + $0x70] sm:$0xff] }
0x17e5   : > { %v7695_v48 = vpop.f32.mrb[90].mxu0  ;;  %v7771_v49 = vpop.f32.mrb[82].mxu1 }
0x17e6   : > { %v7927_v50 = vmul.f32 0.35355338, %v7695_v48  ;;  %v7928_v51 = vmul.f32 0.35355338, %v7771_v49  ;;  %v9942_v52 = vpop.f32.mrb[91].mxu0  ;;  %v9947_v53 = vpop.f32.mrb[83].mxu1 }
0x17e7   : > { %v9239_v48 = vld [vmem:[%s11524_s8 + $0x78] sm:$0xff] }
0x17e8   : > { %v7932_v55 = vadd.f32 %v10200_v54, %v7928_v51  ;;  %v7931_v56 = vadd.f32 %v10200_v54, %v7927_v50 }
0x17e9   : > { %v7847_v58 = vpop.f32.mrb[92].mxu0  ;;  %v7923_v59 = vpop.f32.mrb[84].mxu1 }
0x17ea   : > { %v7929_v60 = vmul.f32 0.35355338, %v7847_v58  ;;  %v7930_v62 = vmul.f32 0.35355338, %v7923_v59  ;;  %v9952_v63 = vpop.f32.mrb[93].mxu0  ;;  %v9957_v1 = vpop.f32.mrb[85].mxu1 }
0x17eb   : > { %v7938_v2 = vsel %vm1510_vm4, %v7932_v55, -inf  ;;  %v7935_v61 = vsel %vm1510_vm4, %v7931_v56, -inf }
0x17ec   : > { %7939 = vmax.xlane.f32.xlu1 %v7938_v2  ;;  %7936 = vmax.xlane.f32.xlu0 %v7935_v61  ;;  %v7934_v4 = vadd.f32 %v10200_v54, %v7930_v62  ;;  %v7933_v5 = vadd.f32 %v10200_v54, %v7929_v60 }
0x17ee   : > { %v7944_v6 = vsel %vm1510_vm4, %v7934_v4, -inf  ;;  %v7941_v8 = vsel %vm1510_vm4, %v7933_v5, -inf }
0x17f0   : > { %7945 = vmax.xlane.f32.xlu1 %v7944_v6  ;;  %7942 = vmax.xlane.f32.xlu0 %v7941_v8 }
0x1879   : > { %v7940_v9 = vpop.xlane.xlu1 %7939  ;;  %v7937_v10 = vpop.xlane.xlu0 %7936 }
0x187a   : > { %v7948_v11 = vsub.f32 %v7932_v55, %v7940_v9  ;;  %v7947_v3 = vsub.f32 %v7931_v56, %v7937_v10 }
0x187c   : > { %v7953_v12 = vmul.f32 1.442695, %v7948_v11  ;;  %v7951_v13 = vmul.f32 1.442695, %v7947_v3 }
0x187d   : > { %v7946_v14 = vpop.xlane.xlu1 %7945  ;;  %v7943_v15 = vpop.xlane.xlu0 %7942 }
0x187e   : > { %10174 = vpow2.f32 %v7953_v12  ;;  %v7950_v16 = vsub.f32 %v7934_v4, %v7946_v14  ;;  %v7949_v36 = vsub.f32 %v7933_v5, %v7943_v15  ;;  %v9241_v5 = vld [vmem:[%s11525_s9 + $0x3] ss:$0 sm:$0xff]  ;;  %v9246_v15 = vld [vmem:[%s11526_s10 + $0x30] sm:$0xff] }
0x187f   : > { %10176 = vpow2.f32 %v7951_v13  ;;  %v9244_v14 = vld [vmem:[%s11526_s10 + $0x20] sm:$0xff] }
0x1880   : > { %v7957_v17 = vmul.f32 1.442695, %v7950_v16  ;;  %v7955_v19 = vmul.f32 1.442695, %v7949_v36  ;;  %v9247_v36 = vld [vmem:[%s11526_s10 + $0x38] sm:$0xff] }
0x1882   : > { %10178 = vpow2.f32 %v7957_v17  ;;  %v10050_v17 = vpack.c.bf16 %v9247_v36, %v9246_v15 }
0x1883   : > { %10180 = vpow2.f32 %v7955_v19  ;;  %v9251_v19 = vld [vmem:[%s11528_s12 + $0x40] sm:$0xff] }
0x1888   : > { %v10175_v20 = vpop.eup %10174 }
0x1889   : > { %v10177_v21 = vpop.eup %10176  ;;  %v7962_v22 = vsel %vm1510_vm4, %v10175_v20, 0.0 }
0x188a   : > { %7963 = vadd.xlane.f32.xlu1 %v7962_v22  ;;  %v7959_v23 = vsel %vm1510_vm4, %v10177_v21, 0.0 }
0x188b   : > { %7960 = vadd.xlane.f32.xlu0 %v7959_v23  ;;  %v9254_v23 = vld [vmem:[%s11528_s12 + $0x58] sm:$0xff] }
0x188c   : > { %v10179_v24 = vpop.eup %10178 }
0x188d   : > { %v10181_v25 = vpop.eup %10180  ;;  %v7968_v26 = vsel %vm1510_vm4, %v10179_v24, 0.0 }
0x188e   : > { %7969 = vadd.xlane.f32.xlu1 %v7968_v26  ;;  %v7965_v27 = vsel %vm1510_vm4, %v10181_v25, 0.0  ;;  %v9256_v26 = vld [vmem:[%s11528_s12 + $0x68] sm:$0xff] }
0x188f   : > { %7966 = vadd.xlane.f32.xlu0 %v7965_v27 }
0x1917   : > { %v7964_v28 = vpop.xlane.xlu1 %7963 }
0x1918   : > { %10182 = vrcp.f32 %v7964_v28  ;;  %v7961_v29 = vpop.xlane.xlu0 %7960 }
0x1919   : > { %10184 = vrcp.f32 %v7961_v29 }
0x191b   : > { %v7970_v30 = vpop.xlane.xlu1 %7969 }
0x191c   : > { %10186 = vrcp.f32 %v7970_v30  ;;  %v7967_v31 = vpop.xlane.xlu0 %7966 }
0x191d   : > { %10188 = vrcp.f32 %v7967_v31 }
0x1922   : > { %v10183_v34 = vpop.eup %10182 }
0x1923   : > { %v10185_v37 = vpop.eup %10184  ;;  %v7974_v38 = vmul.f32 %v10183_v34, %v10175_v20  ;;  %v9252_v20 = vld [vmem:[%s11528_s12 + $0x48] sm:$0xff] }
0x1924   : > { %v7972_v40 = vmul.f32 %v10185_v37, %v10177_v21  ;;  %v9253_v21 = vld [vmem:[%s11528_s12 + $0x50] sm:$0xff]  ;;  %v10053_v22 = vpack.c.bf16 %v9252_v20, %v9251_v19 }
0x1925   : > { %9966 = vmatmul.mubr.msk.f32.vlgmr.msra.gmra.mrb[86].mxu1 %vm1510_vm4, %v7974_v38  ;;  %v9242_v38 = vld [vmem:[%s11520_s4 + $0x5] ss:$0 sm:$0xff] }
0x1926   : > { %v10187_v41 = vpop.eup %10186  ;;  %9961 = vmatmul.mubr.msk.f32.vlgmr.msra.gmra.mrb[94].mxu0 %vm1510_vm4, %v7972_v40  ;;  %9974 = vmatpush3.msra.mxu1 %v7620_v39 }
0x1927   : > { %v10189_v42 = vpop.eup %10188  ;;  %v7978_v43 = vmul.f32 %v10187_v41, %v10179_v24  ;;  %9969 = vmatpush3.msra.mxu0 %v7547_v57  ;;  %9970 = vmatprep.mubr.msk.f32.mxu0 %vm10266_vm1, %v10265_v7  ;;  %v10056_v24 = vpack.c.bf16 %v9254_v23, %v9253_v21 }
0x1928   : > { %v7976_v0 = vmul.f32 %v10189_v42, %v10181_v25  ;;  %9975 = vmatprep.mubr.msk.f32.mxu1 %vm10266_vm1, %v10265_v7  ;;  %9978 = vmatprep.subr.mxu0 %v10265_v7  ;;  %v9255_v25 = vld [vmem:[%s11528_s12 + $0x60] sm:$0xff]  ;;  %v9257_v42 = vld [vmem:[%s11528_s12 + $0x70] sm:$0xff] }
0x1929   : > { %9976 = vmatmul.mubr.msk.f32.vlgmr.msra.gmra.mrb[88].mxu1 %vm1510_vm4, %v7978_v43  ;;  %9983 = vmatprep.subr.mxu1 %v10265_v7  ;;  %v10059_v27 = vpack.c.bf16 %v9256_v26, %v9255_v25  ;;  %v9258_v43 = vld [vmem:[%s11528_s12 + $0x78] sm:$0xff] }
0x192a   : > { %9971 = vmatmul.mubr.msk.f32.vlgmr.msra.gmra.mrb[96].mxu0 %vm1510_vm4, %v7976_v0  ;;  %9985 = vmatprep.mubr.msk.f32.mxu1 %vm10266_vm1, %v10265_v7  ;;  %v10062_v0 = vpack.c.bf16 %v9258_v43, %v9257_v42 }
0x192b   : > { %9979 = vmatpush3.msra.mxu0 %v9234_v44  ;;  %9980 = vmatprep.mubr.msk.f32.mxu0 %vm10266_vm1, %v10265_v7  ;;  %v9249_v44 = vld [vmem:[%s11527_s11 + $0x1] ss:$0 sm:$0xff] }
0x192c   : > { %9988 = vmatprep.subr.mxu0 %v10265_v7  ;;  %9984 = vmatpush3.msra.mxu1 %v9233_v45 }
0x192d   : > { %9993 = vmatprep.subr.mxu1 %v10265_v7 }
0x19f8   : > { %v8121_v47 = vpop.f32.mrb[86].mxu1 }
0x19f9   : > { %v8048_v49 = vpop.f32.mrb[94].mxu0  ;;  %v9967_v50 = vpop.f32.mrb[87].mxu1  ;;  %9981 = vmatmul.mubr.msk.f32.vlgmr.msra.gmra.mrb[98].mxu0 %vm1510_vm4, %v8121_v47 }
0x19fa   : > { %v9962_v51 = vpop.f32.mrb[95].mxu0  ;;  %9986 = vmatmul.mubr.msk.f32.vlgmr.msra.gmra.mrb[90].mxu1 %vm1510_vm4, %v8048_v49  ;;  %9989 = vmatpush3.msra.mxu0 %v9237_v46  ;;  %v9261_v50 = vld [vmem:[%s11529_s13 + $0x1] ss:$0 sm:$0xff] }
0x19fb   : > { %9990 = vmatprep.mubr.msk.f32.mxu0 %vm10266_vm1, %v10265_v7  ;;  %9994 = vmatpush3.msra.mxu1 %v9239_v48 }
0x19fc   : > { %v8267_v52 = vpop.f32.mrb[88].mxu1  ;;  %9995 = vmatprep.mubr.msk.f32.mxu1 %vm10266_vm1, %v10265_v7  ;;  %10046 = vmatprep.subr.bf16.mxu0 %v10267_v18 }
0x19fd   : > { %v8194_v53 = vpop.f32.mrb[96].mxu0  ;;  %v9977_v54 = vpop.f32.mrb[89].mxu1  ;;  %10052 = vmatprep.subr.bf16.mxu1 %v10267_v18 }
0x19fe   : > { %v9972_v55 = vpop.f32.mrb[97].mxu0  ;;  %9991 = vmatmul.mubr.msk.f32.vlgmr.msra.gmra.mrb[100].mxu0 %vm1510_vm4, %v8194_v53  ;;  %9996 = vmatmul.mubr.msk.f32.vlgmr.msra.gmra.mrb[92].mxu1 %vm1510_vm4, %v8267_v52 }
0x19ff   : > { %10006 = vmatprep.mubr.msk.f32.mxu0 %vm10266_vm1, %v10265_v7  ;;  %10025 = vmatprep.mubr.msk.f32.mxu1 %vm10266_vm1, %v10265_v7 }
0x1a00   : > { %10054 = vmatpush3.bf16.msra.mxu1 %v10053_v22 }
0x1a01   : > { %10055 = vmatprep.subr.bf16.mxu1 %v10267_v18 }
0x1a04   : > { %10057 = vmatpush3.bf16.msra.mxu1 %v10056_v24 }
0x1a05   : > { %10058 = vmatprep.subr.bf16.mxu1 %v10267_v18 }
0x1a08   : > { %10060 = vmatpush3.bf16.msra.mxu1 %v10059_v27 }
0x1a09   : > { %10061 = vmatprep.subr.bf16.mxu1 %v10267_v18 }
0x1a0c   : > { %10063 = vmatpush3.bf16.msra.mxu1 %v10062_v0 }
0x1acc   : > { %v8344_v56 = vpop.f32.mrb[98].mxu0 }
0x1acd   : > { %v8417_v58 = vpop.f32.mrb[90].mxu1  ;;  %v9982_v59 = vpop.f32.mrb[99].mxu0 }
0x1ace   : > { %v8418_v60 = vadd.f32 %v8417_v58, %v8344_v56  ;;  %v9987_v62 = vpop.f32.mrb[91].mxu1 }
0x1ad1   : > { %v8492_v63 = vpop.f32.mrb[100].mxu0  ;;  %v8568_v1 = vpop.f32.mrb[92].mxu1 }
0x1ad2   : > { %v8496_v2 = vadd.f32 %v8492_v63, %v8418_v60  ;;  %v9992_v61 = vpop.f32.mrb[101].mxu0  ;;  %v9997_v4 = vpop.f32.mrb[93].mxu1 }
0x1ad4   : > { %v8572_v6 = vadd.f32 %v8568_v1, %v8496_v2 }
0x1ad6   : > { %v8578_v8 = vadd.f32 %v9241_v5, %v8572_v6 }
0x1ad8   : > { %v11399_v9 = vadd.f32 %v8578_v8, %v11171_v32  ;;  %v9245_v32 = vld [vmem:[%s11526_s10 + $0x28] sm:$0xff]  ;;  %v9262_v8 = vld [vmem:[%s11520_s4 + $0x6] ss:$0 sm:$0xff] }
0x1ad9   : > { %v10047_v16 = vpack.c.bf16 %v9245_v32, %v9244_v14 }
0x1ada   : > { %v8582_v7 = vsel %vm503_vm0, %v11399_v9, 0.0 }
0x1adb   : > { %8583 = vadd.xlane.f32.xlu0 %v8582_v7  ;;  %10048 = vmatpush3.bf16.msra.mxu0 %v10047_v16 }
0x1adc   : > { %10049 = vmatprep.subr.bf16.mxu0 %v10267_v18  ;;  %v9243_v18 = vld [vmem:[%s11521_s5 + $0x5] ss:$0 sm:$0xff] }
0x1adf   : > { %10051 = vmatpush3.bf16.msra.mxu0 %v10050_v17 }
0x1b68   : > { %v8584_v10 = vpop.xlane.xlu0 %8583 }
0x1b69   : > { %v8585_v11 = vmul.f32 0.03125, %v8584_v10  ;;  %v9263_v10 = vld [vmem:[%s11521_s5 + $0x6] ss:$0 sm:$0xff] }
0x1b6b   : > { %v8586_v3 = vsub.f32 %v11399_v9, %v8585_v11 }
0x1b6d   : > { %v8587_v12 = vmul.f32 %v8586_v3, %v8586_v3  ;;  %v8596_v39 = vmul.f32 %v9242_v38, %v8586_v3 }
0x1b6f   : > { %v8588_v13 = vsel %vm503_vm0, %v8587_v12, 0.0 }
0x1b70   : > { %8589 = vadd.xlane.f32.xlu1 %v8588_v13 }
0x1bfd   : > { %v8590_v28 = vpop.xlane.xlu1 %8589 }
0x1bfe   : > { %v8591_v29 = vmul.f32 0.032258064, %v8590_v28 }
0x1c00   : > { %10190 = vrsqrt.f32 %v8591_v29  ;;  %vm8599_vm14 = vcmp.eq.f32.partialorder %v8591_v29, inf  ;;  %v8602_v33 = vand.u32 2147483648, %v8591_v29  ;;  %vm8601_vm15 = vcmp.eq.f32.partialorder %v8591_v29, 0.0 }
0x1c0a   : > { %v10191_v30 = vpop.eup %10190 }
0x1c0b   : > { %v8598_v31 = vmul.f32 %v10191_v30, %v8591_v29 }
0x1c0d   : > { %v8600_v34 = vsel %vm8599_vm14, %v8591_v29, %v8598_v31 }
0x1c0e   : > { %v8603_v35 = vsel %vm8601_vm15, %v8602_v33, %v8600_v34 }
0x1c0f   : > { %v8604_v37 = vadd.f32 1e-06, %v8603_v35 }
0x1c11   : > { %10192 = vrcp.f32 %v8604_v37 }
0x1c1b   : > { %v10193_v40 = vpop.eup %10192 }
0x1c1c   : > { %v8606_v57 = vmul.f32 %v10193_v40, %v8596_v39 }
0x1c1e   : > { %v8611_v41 = vadd.f32 %v9243_v18, %v8606_v57 }
0x1c20   : > { %10007 = vmatmul.mubr.msk.f32.vlgmr.msra.gmra.mrb[102].mxu0 %vm503_vm0, %v8611_v41 }
0x1cf3   : > { %v8694_v45 = vpop.f32.mrb[102].mxu0 }
0x1cf4   : > { %v8695_v46 = vadd.f32 %v9249_v44, %v8694_v45  ;;  %v10008_v47 = vpop.f32.mrb[103].mxu0 }
0x1cf6   : > { %v8698_v48 = vmax.f32 %v8695_v46, 0.0 }
0x1cf8   : > { %10026 = vmatmul.mubr.msk.f32.vlgmr.msra.gmra.mrb[94].mxu1 %vm4563_vm9, %v8698_v48 }
0x1dcb   : > { %v8777_v49 = vpop.f32.mrb[94].mxu1 }
0x1dcc   : > { %v8781_v51 = vadd.f32 %v8777_v49, %v11399_v9  ;;  %v10027_v52 = vpop.f32.mrb[95].mxu1 }
0x1dce   : > { %v8790_v53 = vadd.f32 %v9261_v50, %v8781_v51 }
0x1dd0   : > { %v8793_v54 = vsel %vm503_vm0, %v8790_v53, 0.0 }
0x1dd1   : > { %8794 = vadd.xlane.f32.xlu0 %v8793_v54 }
0x1e5e   : > { %v8795_v55 = vpop.xlane.xlu0 %8794 }
0x1e5f   : > { %v8796_v56 = vmul.f32 0.03125, %v8795_v55 }
0x1e61   : > { %v8797_v58 = vsub.f32 %v8790_v53, %v8796_v56 }
0x1e63   : > { %v8798_v59 = vmul.f32 %v8797_v58, %v8797_v58  ;;  %v8807_v9 = vmul.f32 %v9262_v8, %v8797_v58 }
0x1e65   : > { %v8799_v60 = vsel %vm503_vm0, %v8798_v59, 0.0 }
0x1e66   : > { %8800 = vadd.xlane.f32.xlu1 %v8799_v60 }
0x1ef3   : > { %v8801_v62 = vpop.xlane.xlu1 %8800 }
0x1ef4   : > { %v8802_v63 = vmul.f32 0.032258064, %v8801_v62 }
0x1ef6   : > { %10194 = vrsqrt.f32 %v8802_v63  ;;  %vm8810_vm1 = vcmp.eq.f32.partialorder %v8802_v63, inf  ;;  %v8813_v61 = vand.u32 2147483648, %v8802_v63  ;;  %vm8812_vm2 = vcmp.eq.f32.partialorder %v8802_v63, 0.0 }
0x1f00   : > { %v10195_v1 = vpop.eup %10194 }
0x1f01   : > { %v8809_v2 = vmul.f32 %v10195_v1, %v8802_v63 }
0x1f03   : > { %v8811_v4 = vsel %vm8810_vm1, %v8802_v63, %v8809_v2 }
0x1f04   : > { %v8814_v5 = vsel %vm8812_vm2, %v8813_v61, %v8811_v4 }
0x1f05   : > { %v8815_v6 = vadd.f32 1e-06, %v8814_v5 }
0x1f07   : > { %10196 = vrcp.f32 %v8815_v6 }
0x1f11   : > { %v10197_v7 = vpop.eup %10196 }
0x1f12   : > { %v8817_v11 = vmul.f32 %v10197_v7, %v8807_v9 }
0x1f14   : > { %v8822_v3 = vadd.f32 %v9263_v10, %v8817_v11 }
0x1f16   : > { %8823 = vst.msk [vmem:[%s484_s21] sm:$0xff] %vm503_vm0, %v8822_v3 }
0x1f17   : > { %10214 = shalt.err (!%p10211_p3)
}
0x1f18   : > { %s10215_s28 = scalar_lea.hbm %s11473_s2, 128  ;;  %s10219_s21 = scalar_lea.hbm %s11530_s14, 256 }
0x1f19   : > { %p10216_p4 = scmp.ne.s32.totalorder %s11473_s2, %s10215_s28  ;;  %p10220_p9 = scmp.lt.u32.totalorder %s11473_s2, %s11530_s14 }
0x1f1a   : > { %p10221_p10 = scmp.lt.u32.totalorder %s10219_s21, %s10215_s28  ;;  %p10223_p12 = scmp.lt.u32.totalorder %s10215_s28, %s11473_s2 }
0x1f1b   : > { %p10217_p7 = pnand %p10216_p4, %p10382_p5 }
0x1f1c   : > { %p10222_p11 = por %p10221_p10, %p10220_p9 }
0x1f1d   : > { %p10218_p8 = pneg %p10217_p7 }
0x1f1e   : > { %p10224_p13 = por %p10223_p12, %p10222_p11 }
0x1f20   : > { %p10225_p0 = pnand %p10224_p13, %p10218_p8 }
0x1f22   : > { %10228 = shalt.err (!%p10225_p0)
}
0x1f23   : > { %10064 = dma.vmem_to_hbm [thread:$0]  (%p10382_p5), %s11475_s25, 128, %s11473_s2, %s8825_s1  }
0x1f24 PF: > { %p10070_p1 = scmp.ge.s32.totalorder %s10263_s16, 2  ;;  %s8850_s18 = sand.u32 1, %s10251_s29  }
0x1f25   : > { %s8851_s17 = scalar_lea.sflag [#allocation3], %s8850_s18 }
0x1f26   : > { %p10067_p2 = pnand %p10070_p1, %p10386_p6 }
0x1f28   : > { %10246 = dma.done.wait (!%p10067_p2), %s8851_s17, 128  }
0x1f29   : > { %10248 = vsyncadd (!%p10067_p2), %s8851_s17, 4294967168  ;;  %s11542_s0 = sld [smem:[#allocation5_spill]]  ;;  %p24_p3 = scmp.ge.s32.totalorder %s10369_s19, 4  }
0x1f2a   : > { %s11543_s29 = smov %s10255_s30  ;;  %s11544_s30 = smov %s10259_s15 }
0x1f2b   : > { %s11546_s16 = smov %s10369_s19  ;;  %26 = sbr.rel (!%p24_p3) target bundleno = 8 (0x8), region = 146 }
0x1f2f   : > { %s11545_s15 = smov %s11542_s0 }
0x1f32   :  { %8856 = vsyncpa [#allocation3], 1 }
0x1f33   :  { %8858 = vsyncpa [#allocation3 + $0x1], 1 }

</bundles_post_ra>
